<compile_context>
chip_gen: v7x
topology: tpu7x:2x2x1
jax: 0.10.0
libtpu: 0.0.40
codegen_flags: <defaults>
</compile_context>

<pallas_src>
from functools import partial

import jax
import jax.numpy as jnp
from jax.experimental import pallas as pl
from jax.experimental.pallas import tpu as pltpu

EPS = 1e-5


def _bottleneck_kernel(M, PAD, offsets,
                       xT_ref, w1_ref, w2_ref, w3_ref, masks_ref,
                       g1_ref, b1_ref, g2_ref, b2_ref, g3_ref, b3_ref,
                       out_ref, y1p_ref):
    """relu(bn3(conv3(relu(bn2(conv2(relu(bn1(conv1(x)))))))) + x) in (C, M)."""

    def bn(y, g_ref, b_ref):
        # training-mode BatchNorm3d: biased batch stats over all M columns,
        # folded into one per-channel scale/shift (single pass over y).
        mean = jnp.mean(y, axis=1, keepdims=True)
        var = jnp.maximum(jnp.mean(y * y, axis=1, keepdims=True) - mean * mean, 0.0)
        scale = g_ref[...] * jax.lax.rsqrt(var + EPS)
        shift = b_ref[...] - mean * scale
        return y * scale + shift

    xT = xT_ref[...]                                            # (Cin, M) f32

    # ---- conv1 (1x1x1) + bn1 + relu ----
    y1 = jnp.dot(w1_ref[...], xT.astype(jnp.bfloat16),
                 preferred_element_type=jnp.float32)            # (width, M)
    y1 = jnp.maximum(bn(y1, g1_ref, b1_ref), 0.0)

    # Stash into a zero-padded VMEM scratch so the 27 conv taps become
    # statically shifted lane slices (PAD is a multiple of 128 -> aligned store).
    y1p_ref[...] = jnp.zeros_like(y1p_ref)
    y1p_ref[:, pl.ds(PAD, M)] = y1.astype(y1p_ref.dtype)

    # ---- conv2 (3x3x3, stride 1, pad 1, groups 1) + bn2 + relu ----
    width = y1p_ref.shape[0]
    y2 = jnp.zeros((width, M), jnp.float32)
    for t, off in enumerate(offsets):                           # 27 static taps
        shifted = y1p_ref[:, pl.ds(PAD + off, M)]               # (width, M) bf16
        contrib = jnp.dot(w2_ref[t], shifted,
                          preferred_element_type=jnp.float32)   # (width, M) f32
        # per-tap validity mask kills halo / spatial-wrap columns
        y2 = y2 + contrib * masks_ref[pl.ds(t, 1), :]
    y2 = jnp.maximum(bn(y2, g2_ref, b2_ref), 0.0)

    # ---- conv3 (1x1x1) + bn3 + residual + relu ----
    # (module has no `concrete_dropout` attribute, so the conv3 branch is taken)
    y3 = jnp.dot(w3_ref[...], y2.astype(jnp.bfloat16),
                 preferred_element_type=jnp.float32)            # (out_ch, M)
    y3 = bn(y3, g3_ref, b3_ref) + xT                            # residual in f32
    out_ref[...] = jnp.maximum(y3, 0.0).astype(out_ref.dtype)


def bottleneck_forward(x_ncdhw, params):
    """Bottleneck forward (stride=1, downsample=None, groups=1, dilation=1).

    x_ncdhw: (N, C, D, H, W) like the PyTorch module; returns NCDHW as well.
    """
    N, Cin, D, H, W = x_ncdhw.shape
    width = params["w1"].shape[0]
    out_ch = params["w3"].shape[0]
    assert Cin == out_ch, "downsample=None requires inplanes == planes * 4"
    M = N * D * H * W

    # max |flattened lane offset| of a 3x3x3 tap, rounded up to a lane tile so
    # the scratch store stays 128-aligned.
    pad_needed = H * W + W + 1
    PAD = ((pad_needed + 127) // 128) * 128

    # transposed, lane-dense layout: channels on sublanes, M on lanes
    xT = jnp.transpose(x_ncdhw, (1, 0, 2, 3, 4)).reshape(Cin, M).astype(jnp.float32)

    # matmul-ready weights (bf16 operands feed the MXU; accumulation is f32)
    w1 = params["w1"].reshape(width, Cin).astype(jnp.bfloat16)               # (width, Cin)
    w2 = jnp.transpose(params["w2"], (2, 3, 4, 0, 1)).reshape(
        27, width, width).astype(jnp.bfloat16)                               # (27, out, in)
    w3 = params["w3"].reshape(out_ch, width).astype(jnp.bfloat16)            # (out_ch, width)

    # per-tap validity masks + flattened lane offsets (zero-pad conv semantics)
    m = jnp.arange(M, dtype=jnp.int32)
    w_i = m % W
    h_i = (m // W) % H
    d_i = (m // (W * H)) % D
    masks, offsets = [], []
    for kd in (-1, 0, 1):
        for kh in (-1, 0, 1):
            for kw in (-1, 0, 1):
                valid = ((d_i + kd >= 0) & (d_i + kd < D)
                         & (h_i + kh >= 0) & (h_i + kh < H)
                         & (w_i + kw >= 0) & (w_i + kw < W))
                masks.append(valid)
                offsets.append(kd * H * W + kh * W + kw)
    masks = jnp.stack(masks).astype(jnp.float32)                             # (27, M)

    col = lambda v: v.reshape(-1, 1).astype(jnp.float32)
    args = (xT, w1, w2, w3, masks,
            col(params["g1"]), col(params["b1"]),
            col(params["g2"]), col(params["b2"]),
            col(params["g3"]), col(params["b3"]))

    vmem = pltpu.MemorySpace.VMEM
    yT = pl.pallas_call(
        partial(_bottleneck_kernel, M, PAD, tuple(offsets)),
        out_shape=jax.ShapeDtypeStruct((out_ch, M), jnp.float32),
        in_specs=[pl.BlockSpec(memory_space=vmem)] * len(args),
        out_specs=pl.BlockSpec(memory_space=vmem),
        scratch_shapes=[pltpu.VMEM((width, M + 2 * PAD), jnp.bfloat16)],
    )(*args)

    # back to PyTorch NCDHW
    return jnp.transpose(yT.reshape(out_ch, N, D, H, W), (1, 0, 2, 3, 4))


def reference_forward(x, params):
    """Pure-JAX f32 reference mirroring the PyTorch Bottleneck (train-mode BN)."""
    def bn(y, g, b):
        mean = jnp.mean(y, axis=(0, 2, 3, 4), keepdims=True)
        var = jnp.mean(jnp.square(y - mean), axis=(0, 2, 3, 4), keepdims=True)
        yh = (y - mean) * jax.lax.rsqrt(var + EPS)
        return yh * g.reshape(1, -1, 1, 1, 1) + b.reshape(1, -1, 1, 1, 1)

    dn = ("NCDHW", "OIDHW", "NCDHW")
    conv = lambda inp, w, pad: jax.lax.conv_general_dilated(
        inp, w, window_strides=(1, 1, 1), padding=pad, dimension_numbers=dn)

    out = jnp.maximum(bn(conv(x, params["w1"], "VALID"),
                         params["g1"], params["b1"]), 0.0)
    out = jnp.maximum(bn(conv(out, params["w2"], [(1, 1)] * 3),
                         params["g2"], params["b2"]), 0.0)
    out = bn(conv(out, params["w3"], "VALID"), params["g3"], params["b3"])
    return jnp.maximum(out + x, 0.0)


def make_params(key, inplanes, planes, base_width=64, groups=1):
    width = int(planes * (base_width / 64.0)) * groups
    out_ch = planes * 4  # Bottleneck.expansion = 4
    ks = jax.random.split(key, 9)
    rnd = lambda k, shape, s: s * jax.random.normal(k, shape, jnp.float32)
    return {
        # PyTorch Conv3d weight layouts (out, in, kd, kh, kw), bias=False
        "w1": rnd(ks[0], (width, inplanes, 1, 1, 1), 0.05),
        "w2": rnd(ks[1], (width, width, 3, 3, 3), 0.05),
        "w3": rnd(ks[2], (out_ch, width, 1, 1, 1), 0.05),
        # BatchNorm affine params (randomized so the test exercises them)
        "g1": 1.0 + 0.1 * jax.random.normal(ks[3], (width,), jnp.float32),
        "b1": 0.1 * jax.random.normal(ks[4], (width,), jnp.float32),
        "g2": 1.0 + 0.1 * jax.random.normal(ks[5], (width,), jnp.float32),
        "b2": 0.1 * jax.random.normal(ks[6], (width,), jnp.float32),
        "g3": 1.0 + 0.1 * jax.random.normal(ks[7], (out_ch,), jnp.float32),
        "b3": 0.1 * jax.random.normal(ks[8], (out_ch,), jnp.float32),
    }


if __name__ == "__main__":
    key = jax.random.PRNGKey(0)
    kx, kp = jax.random.split(key)

    # downsample=None => inplanes must equal planes * expansion (= 4)
    inplanes, planes = 16, 4
    N, D, H, W = 2, 8, 8, 8

    x = jax.random.normal(kx, (N, inplanes, D, H, W), jnp.float32)   # NCDHW
    params = make_params(kp, inplanes, planes)

    out = jax.jit(bottleneck_forward)(x, params)
    out = jax.block_until_ready(out)

    assert out.shape == (N, planes * 4, D, H, W)
    assert bool(jnp.all(jnp.isfinite(out)))

    # correctness vs. a pure-JAX f32 reference (loose tol: bf16 MXU operands)
    ref = reference_forward(x, params)
    max_err = float(jnp.max(jnp.abs(out - ref)))
    assert max_err < 0.25, f"kernel/reference mismatch: max abs err {max_err}"

    print("KERNEL_OK")
</pallas_src>

<mosaic_0001>
module attributes {stable_mosaic.version = 11 : i64} {
  func.func @_bottleneck_kernel(%arg0: memref<16x1024xf32, #tpu.memory_space<vmem>>, %arg1: memref<4x16xbf16, #tpu.memory_space<vmem>>, %arg2: memref<27x4x4xbf16, #tpu.memory_space<vmem>>, %arg3: memref<16x4xbf16, #tpu.memory_space<vmem>>, %arg4: memref<27x1024xf32, #tpu.memory_space<vmem>>, %arg5: memref<4x1xf32, #tpu.memory_space<vmem>>, %arg6: memref<4x1xf32, #tpu.memory_space<vmem>>, %arg7: memref<4x1xf32, #tpu.memory_space<vmem>>, %arg8: memref<4x1xf32, #tpu.memory_space<vmem>>, %arg9: memref<16x1xf32, #tpu.memory_space<vmem>>, %arg10: memref<16x1xf32, #tpu.memory_space<vmem>>, %arg11: memref<16x1024xf32, #tpu.memory_space<vmem>>, %arg12: memref<4x1280xbf16, #tpu.memory_space<vmem>>) attributes {dimension_semantics = [], scalar_prefetch = 0 : i64, scratch_operands = 1 : i64, tpu.core_type = #tpu.core_type<tc>} {
    %c0 = arith.constant 0 : index
    %c0_0 = arith.constant 0 : index
    %0 = vector.load %arg0[%c0, %c0_0] : memref<16x1024xf32, #tpu.memory_space<vmem>>, vector<16x1024xf32>
    %c0_1 = arith.constant 0 : index
    %c0_2 = arith.constant 0 : index
    %1 = vector.load %arg1[%c0_1, %c0_2] : memref<4x16xbf16, #tpu.memory_space<vmem>>, vector<4x16xbf16>
    %2 = arith.truncf %0 : vector<16x1024xf32> to vector<16x1024xbf16>
    %cst = arith.constant dense<0.000000e+00> : vector<4x1024xf32>
    %3 = tpu.matmul %1, %2, %cst {dimension_numbers = #tpu.dot_dimension_numbers<[1], [0], [0], [1], [0, 0, 1, 1], [], []>} : vector<4x16xbf16>, vector<16x1024xbf16>, vector<4x1024xf32> -> vector<4x1024xf32>
    %cst_3 = arith.constant dense<0.000000e+00> : vector<4xf32>
    %4 = vector.multi_reduction <add>, %3, %cst_3 [1] : vector<4x1024xf32> to vector<4xf32>
    %5 = vector.shape_cast %4 : vector<4xf32> to vector<4x1xf32>
    %cst_4 = arith.constant 1.024000e+03 : f32
    %6 = vector.broadcast %cst_4 : f32 to vector<4x1xf32>
    %7 = arith.divf %5, %6 : vector<4x1xf32>
    %8 = arith.mulf %3, %3 : vector<4x1024xf32>
    %cst_5 = arith.constant dense<0.000000e+00> : vector<4xf32>
    %9 = vector.multi_reduction <add>, %8, %cst_5 [1] : vector<4x1024xf32> to vector<4xf32>
    %10 = vector.shape_cast %9 : vector<4xf32> to vector<4x1xf32>
    %cst_6 = arith.constant 1.024000e+03 : f32
    %11 = vector.broadcast %cst_6 : f32 to vector<4x1xf32>
    %12 = arith.divf %10, %11 : vector<4x1xf32>
    %13 = arith.mulf %7, %7 : vector<4x1xf32>
    %14 = arith.subf %12, %13 : vector<4x1xf32>
    %cst_7 = arith.constant 0.000000e+00 : f32
    %15 = vector.broadcast %cst_7 : f32 to vector<4x1xf32>
    %16 = arith.maximumf %14, %15 : vector<4x1xf32>
    %c0_8 = arith.constant 0 : index
    %c0_9 = arith.constant 0 : index
    %17 = vector.load %arg5[%c0_8, %c0_9] : memref<4x1xf32, #tpu.memory_space<vmem>>, vector<4x1xf32>
    %cst_10 = arith.constant 9.99999974E-6 : f32
    %18 = vector.broadcast %cst_10 : f32 to vector<4x1xf32>
    %19 = arith.addf %16, %18 : vector<4x1xf32>
    %20 = math.rsqrt %19 : vector<4x1xf32>
    %21 = arith.mulf %17, %20 : vector<4x1xf32>
    %c0_11 = arith.constant 0 : index
    %c0_12 = arith.constant 0 : index
    %22 = vector.load %arg6[%c0_11, %c0_12] : memref<4x1xf32, #tpu.memory_space<vmem>>, vector<4x1xf32>
    %23 = arith.mulf %7, %21 : vector<4x1xf32>
    %24 = arith.subf %22, %23 : vector<4x1xf32>
    %25 = vector.broadcast %21 : vector<4x1xf32> to vector<4x1024xf32>
    %26 = arith.mulf %3, %25 : vector<4x1024xf32>
    %27 = vector.broadcast %24 : vector<4x1xf32> to vector<4x1024xf32>
    %28 = arith.addf %26, %27 : vector<4x1024xf32>
    %cst_13 = arith.constant 0.000000e+00 : f32
    %29 = vector.broadcast %cst_13 : f32 to vector<4x1024xf32>
    %30 = arith.maximumf %28, %29 : vector<4x1024xf32>
    %cst_14 = arith.constant 0.000000e+00 : bf16
    %31 = vector.broadcast %cst_14 : bf16 to vector<4x1280xbf16>
    %c0_15 = arith.constant 0 : index
    %c0_16 = arith.constant 0 : index
    %32 = vector.load %arg12[%c0_15, %c0_16] : memref<4x1280xbf16, #tpu.memory_space<vmem>>, vector<4x1280xbf16>
    tpu.vector_store %arg12[%c0_15, %c0_16], %31 {strides = array<i32>} : memref<4x1280xbf16, #tpu.memory_space<vmem>>, vector<4x1280xbf16>,
    %33 = arith.truncf %30 : vector<4x1024xf32> to vector<4x1024xbf16>
    %c0_17 = arith.constant 0 : index
    %c128 = arith.constant 128 : index
    %34 = vector.load %arg12[%c0_17, %c128] : memref<4x1280xbf16, #tpu.memory_space<vmem>>, vector<4x1024xbf16>
    tpu.vector_store %arg12[%c0_17, %c128], %33 {strides = array<i32>} : memref<4x1280xbf16, #tpu.memory_space<vmem>>, vector<4x1024xbf16>,
    %cst_18 = arith.constant 0.000000e+00 : f32
    %35 = vector.broadcast %cst_18 : f32 to vector<4x1024xf32>
    %c0_19 = arith.constant 0 : index
    %c55 = arith.constant 55 : index
    %36 = vector.load %arg12[%c0_19, %c55] : memref<4x1280xbf16, #tpu.memory_space<vmem>>, vector<4x1024xbf16>
    %c0_20 = arith.constant 0 : index
    %c0_21 = arith.constant 0 : index
    %c0_22 = arith.constant 0 : index
    %37 = vector.load %arg2[%c0_20, %c0_21, %c0_22] : memref<27x4x4xbf16, #tpu.memory_space<vmem>>, vector<1x4x4xbf16>
    %38 = vector.shape_cast %37 : vector<1x4x4xbf16> to vector<4x4xbf16>
    %cst_23 = arith.constant dense<0.000000e+00> : vector<4x1024xf32>
    %39 = tpu.matmul %38, %36, %cst_23 {dimension_numbers = #tpu.dot_dimension_numbers<[1], [0], [0], [1], [0, 0, 1, 1], [], []>} : vector<4x4xbf16>, vector<4x1024xbf16>, vector<4x1024xf32> -> vector<4x1024xf32>
    %c0_24 = arith.constant 0 : index
    %c0_25 = arith.constant 0 : index
    %40 = vector.load %arg4[%c0_24, %c0_25] : memref<27x1024xf32, #tpu.memory_space<vmem>>, vector<1x1024xf32>
    %41 = vector.broadcast %40 : vector<1x1024xf32> to vector<4x1024xf32>
    %42 = arith.mulf %39, %41 : vector<4x1024xf32>
    %43 = arith.addf %35, %42 : vector<4x1024xf32>
    %c0_26 = arith.constant 0 : index
    %c56 = arith.constant 56 : index
    %44 = vector.load %arg12[%c0_26, %c56] : memref<4x1280xbf16, #tpu.memory_space<vmem>>, vector<4x1024xbf16>
    %c1 = arith.constant 1 : index
    %c0_27 = arith.constant 0 : index
    %c0_28 = arith.constant 0 : index
    %45 = vector.load %arg2[%c1, %c0_27, %c0_28] : memref<27x4x4xbf16, #tpu.memory_space<vmem>>, vector<1x4x4xbf16>
    %46 = vector.shape_cast %45 : vector<1x4x4xbf16> to vector<4x4xbf16>
    %cst_29 = arith.constant dense<0.000000e+00> : vector<4x1024xf32>
    %47 = tpu.matmul %46, %44, %cst_29 {dimension_numbers = #tpu.dot_dimension_numbers<[1], [0], [0], [1], [0, 0, 1, 1], [], []>} : vector<4x4xbf16>, vector<4x1024xbf16>, vector<4x1024xf32> -> vector<4x1024xf32>
    %c1_30 = arith.constant 1 : index
    %c0_31 = arith.constant 0 : index
    %48 = vector.load %arg4[%c1_30, %c0_31] : memref<27x1024xf32, #tpu.memory_space<vmem>>, vector<1x1024xf32>
    %49 = vector.broadcast %48 : vector<1x1024xf32> to vector<4x1024xf32>
    %50 = arith.mulf %47, %49 : vector<4x1024xf32>
    %51 = arith.addf %43, %50 : vector<4x1024xf32>
    %c0_32 = arith.constant 0 : index
    %c57 = arith.constant 57 : index
    %52 = vector.load %arg12[%c0_32, %c57] : memref<4x1280xbf16, #tpu.memory_space<vmem>>, vector<4x1024xbf16>
    %c2 = arith.constant 2 : index
    %c0_33 = arith.constant 0 : index
    %c0_34 = arith.constant 0 : index
    %53 = vector.load %arg2[%c2, %c0_33, %c0_34] : memref<27x4x4xbf16, #tpu.memory_space<vmem>>, vector<1x4x4xbf16>
    %54 = vector.shape_cast %53 : vector<1x4x4xbf16> to vector<4x4xbf16>
    %cst_35 = arith.constant dense<0.000000e+00> : vector<4x1024xf32>
    %55 = tpu.matmul %54, %52, %cst_35 {dimension_numbers = #tpu.dot_dimension_numbers<[1], [0], [0], [1], [0, 0, 1, 1], [], []>} : vector<4x4xbf16>, vector<4x1024xbf16>, vector<4x1024xf32> -> vector<4x1024xf32>
    %c2_36 = arith.constant 2 : index
    %c0_37 = arith.constant 0 : index
    %56 = vector.load %arg4[%c2_36, %c0_37] : memref<27x1024xf32, #tpu.memory_space<vmem>>, vector<1x1024xf32>
    %57 = vector.broadcast %56 : vector<1x1024xf32> to vector<4x1024xf32>
    %58 = arith.mulf %55, %57 : vector<4x1024xf32>
    %59 = arith.addf %51, %58 : vector<4x1024xf32>
    %c0_38 = arith.constant 0 : index
    %c63 = arith.constant 63 : index
    %60 = vector.load %arg12[%c0_38, %c63] : memref<4x1280xbf16, #tpu.memory_space<vmem>>, vector<4x1024xbf16>
    %c3 = arith.constant 3 : index
    %c0_39 = arith.constant 0 : index
    %c0_40 = arith.constant 0 : index
    %61 = vector.load %arg2[%c3, %c0_39, %c0_40] : memref<27x4x4xbf16, #tpu.memory_space<vmem>>, vector<1x4x4xbf16>
    %62 = vector.shape_cast %61 : vector<1x4x4xbf16> to vector<4x4xbf16>
    %cst_41 = arith.constant dense<0.000000e+00> : vector<4x1024xf32>
    %63 = tpu.matmul %62, %60, %cst_41 {dimension_numbers = #tpu.dot_dimension_numbers<[1], [0], [0], [1], [0, 0, 1, 1], [], []>} : vector<4x4xbf16>, vector<4x1024xbf16>, vector<4x1024xf32> -> vector<4x1024xf32>
    %c3_42 = arith.constant 3 : index
    %c0_43 = arith.constant 0 : index
    %64 = vector.load %arg4[%c3_42, %c0_43] : memref<27x1024xf32, #tpu.memory_space<vmem>>, vector<1x1024xf32>
    %65 = vector.broadcast %64 : vector<1x1024xf32> to vector<4x1024xf32>
    %66 = arith.mulf %63, %65 : vector<4x1024xf32>
    %67 = arith.addf %59, %66 : vector<4x1024xf32>
    %c0_44 = arith.constant 0 : index
    %c64 = arith.constant 64 : index
    %68 = vector.load %arg12[%c0_44, %c64] : memref<4x1280xbf16, #tpu.memory_space<vmem>>, vector<4x1024xbf16>
    %c4 = arith.constant 4 : index
    %c0_45 = arith.constant 0 : index
    %c0_46 = arith.constant 0 : index
    %69 = vector.load %arg2[%c4, %c0_45, %c0_46] : memref<27x4x4xbf16, #tpu.memory_space<vmem>>, vector<1x4x4xbf16>
    %70 = vector.shape_cast %69 : vector<1x4x4xbf16> to vector<4x4xbf16>
    %cst_47 = arith.constant dense<0.000000e+00> : vector<4x1024xf32>
    %71 = tpu.matmul %70, %68, %cst_47 {dimension_numbers = #tpu.dot_dimension_numbers<[1], [0], [0], [1], [0, 0, 1, 1], [], []>} : vector<4x4xbf16>, vector<4x1024xbf16>, vector<4x1024xf32> -> vector<4x1024xf32>
    %c4_48 = arith.constant 4 : index
    %c0_49 = arith.constant 0 : index
    %72 = vector.load %arg4[%c4_48, %c0_49] : memref<27x1024xf32, #tpu.memory_space<vmem>>, vector<1x1024xf32>
    %73 = vector.broadcast %72 : vector<1x1024xf32> to vector<4x1024xf32>
    %74 = arith.mulf %71, %73 : vector<4x1024xf32>
    %75 = arith.addf %67, %74 : vector<4x1024xf32>
    %c0_50 = arith.constant 0 : index
    %c65 = arith.constant 65 : index
    %76 = vector.load %arg12[%c0_50, %c65] : memref<4x1280xbf16, #tpu.memory_space<vmem>>, vector<4x1024xbf16>
    %c5 = arith.constant 5 : index
    %c0_51 = arith.constant 0 : index
    %c0_52 = arith.constant 0 : index
    %77 = vector.load %arg2[%c5, %c0_51, %c0_52] : memref<27x4x4xbf16, #tpu.memory_space<vmem>>, vector<1x4x4xbf16>
    %78 = vector.shape_cast %77 : vector<1x4x4xbf16> to vector<4x4xbf16>
    %cst_53 = arith.constant dense<0.000000e+00> : vector<4x1024xf32>
    %79 = tpu.matmul %78, %76, %cst_53 {dimension_numbers = #tpu.dot_dimension_numbers<[1], [0], [0], [1], [0, 0, 1, 1], [], []>} : vector<4x4xbf16>, vector<4x1024xbf16>, vector<4x1024xf32> -> vector<4x1024xf32>
    %c5_54 = arith.constant 5 : index
    %c0_55 = arith.constant 0 : index
    %80 = vector.load %arg4[%c5_54, %c0_55] : memref<27x1024xf32, #tpu.memory_space<vmem>>, vector<1x1024xf32>
    %81 = vector.broadcast %80 : vector<1x1024xf32> to vector<4x1024xf32>
    %82 = arith.mulf %79, %81 : vector<4x1024xf32>
    %83 = arith.addf %75, %82 : vector<4x1024xf32>
    %c0_56 = arith.constant 0 : index
    %c71 = arith.constant 71 : index
    %84 = vector.load %arg12[%c0_56, %c71] : memref<4x1280xbf16, #tpu.memory_space<vmem>>, vector<4x1024xbf16>
    %c6 = arith.constant 6 : index
    %c0_57 = arith.constant 0 : index
    %c0_58 = arith.constant 0 : index
    %85 = vector.load %arg2[%c6, %c0_57, %c0_58] : memref<27x4x4xbf16, #tpu.memory_space<vmem>>, vector<1x4x4xbf16>
    %86 = vector.shape_cast %85 : vector<1x4x4xbf16> to vector<4x4xbf16>
    %cst_59 = arith.constant dense<0.000000e+00> : vector<4x1024xf32>
    %87 = tpu.matmul %86, %84, %cst_59 {dimension_numbers = #tpu.dot_dimension_numbers<[1], [0], [0], [1], [0, 0, 1, 1], [], []>} : vector<4x4xbf16>, vector<4x1024xbf16>, vector<4x1024xf32> -> vector<4x1024xf32>
    %c6_60 = arith.constant 6 : index
    %c0_61 = arith.constant 0 : index
    %88 = vector.load %arg4[%c6_60, %c0_61] : memref<27x1024xf32, #tpu.memory_space<vmem>>, vector<1x1024xf32>
    %89 = vector.broadcast %88 : vector<1x1024xf32> to vector<4x1024xf32>
    %90 = arith.mulf %87, %89 : vector<4x1024xf32>
    %91 = arith.addf %83, %90 : vector<4x1024xf32>
    %c0_62 = arith.constant 0 : index
    %c72 = arith.constant 72 : index
    %92 = vector.load %arg12[%c0_62, %c72] : memref<4x1280xbf16, #tpu.memory_space<vmem>>, vector<4x1024xbf16>
    %c7 = arith.constant 7 : index
    %c0_63 = arith.constant 0 : index
    %c0_64 = arith.constant 0 : index
    %93 = vector.load %arg2[%c7, %c0_63, %c0_64] : memref<27x4x4xbf16, #tpu.memory_space<vmem>>, vector<1x4x4xbf16>
    %94 = vector.shape_cast %93 : vector<1x4x4xbf16> to vector<4x4xbf16>
    %cst_65 = arith.constant dense<0.000000e+00> : vector<4x1024xf32>
    %95 = tpu.matmul %94, %92, %cst_65 {dimension_numbers = #tpu.dot_dimension_numbers<[1], [0], [0], [1], [0, 0, 1, 1], [], []>} : vector<4x4xbf16>, vector<4x1024xbf16>, vector<4x1024xf32> -> vector<4x1024xf32>
    %c7_66 = arith.constant 7 : index
    %c0_67 = arith.constant 0 : index
    %96 = vector.load %arg4[%c7_66, %c0_67] : memref<27x1024xf32, #tpu.memory_space<vmem>>, vector<1x1024xf32>
    %97 = vector.broadcast %96 : vector<1x1024xf32> to vector<4x1024xf32>
    %98 = arith.mulf %95, %97 : vector<4x1024xf32>
    %99 = arith.addf %91, %98 : vector<4x1024xf32>
    %c0_68 = arith.constant 0 : index
    %c73 = arith.constant 73 : index
    %100 = vector.load %arg12[%c0_68, %c73] : memref<4x1280xbf16, #tpu.memory_space<vmem>>, vector<4x1024xbf16>
    %c8 = arith.constant 8 : index
    %c0_69 = arith.constant 0 : index
    %c0_70 = arith.constant 0 : index
    %101 = vector.load %arg2[%c8, %c0_69, %c0_70] : memref<27x4x4xbf16, #tpu.memory_space<vmem>>, vector<1x4x4xbf16>
    %102 = vector.shape_cast %101 : vector<1x4x4xbf16> to vector<4x4xbf16>
    %cst_71 = arith.constant dense<0.000000e+00> : vector<4x1024xf32>
    %103 = tpu.matmul %102, %100, %cst_71 {dimension_numbers = #tpu.dot_dimension_numbers<[1], [0], [0], [1], [0, 0, 1, 1], [], []>} : vector<4x4xbf16>, vector<4x1024xbf16>, vector<4x1024xf32> -> vector<4x1024xf32>
    %c8_72 = arith.constant 8 : index
    %c0_73 = arith.constant 0 : index
    %104 = vector.load %arg4[%c8_72, %c0_73] : memref<27x1024xf32, #tpu.memory_space<vmem>>, vector<1x1024xf32>
    %105 = vector.broadcast %104 : vector<1x1024xf32> to vector<4x1024xf32>
    %106 = arith.mulf %103, %105 : vector<4x1024xf32>
    %107 = arith.addf %99, %106 : vector<4x1024xf32>
    %c0_74 = arith.constant 0 : index
    %c119 = arith.constant 119 : index
    %108 = vector.load %arg12[%c0_74, %c119] : memref<4x1280xbf16, #tpu.memory_space<vmem>>, vector<4x1024xbf16>
    %c9 = arith.constant 9 : index
    %c0_75 = arith.constant 0 : index
    %c0_76 = arith.constant 0 : index
    %109 = vector.load %arg2[%c9, %c0_75, %c0_76] : memref<27x4x4xbf16, #tpu.memory_space<vmem>>, vector<1x4x4xbf16>
    %110 = vector.shape_cast %109 : vector<1x4x4xbf16> to vector<4x4xbf16>
    %cst_77 = arith.constant dense<0.000000e+00> : vector<4x1024xf32>
    %111 = tpu.matmul %110, %108, %cst_77 {dimension_numbers = #tpu.dot_dimension_numbers<[1], [0], [0], [1], [0, 0, 1, 1], [], []>} : vector<4x4xbf16>, vector<4x1024xbf16>, vector<4x1024xf32> -> vector<4x1024xf32>
    %c9_78 = arith.constant 9 : index
    %c0_79 = arith.constant 0 : index
    %112 = vector.load %arg4[%c9_78, %c0_79] : memref<27x1024xf32, #tpu.memory_space<vmem>>, vector<1x1024xf32>
    %113 = vector.broadcast %112 : vector<1x1024xf32> to vector<4x1024xf32>
    %114 = arith.mulf %111, %113 : vector<4x1024xf32>
    %115 = arith.addf %107, %114 : vector<4x1024xf32>
    %c0_80 = arith.constant 0 : index
    %c120 = arith.constant 120 : index
    %116 = vector.load %arg12[%c0_80, %c120] : memref<4x1280xbf16, #tpu.memory_space<vmem>>, vector<4x1024xbf16>
    %c10 = arith.constant 10 : index
    %c0_81 = arith.constant 0 : index
    %c0_82 = arith.constant 0 : index
    %117 = vector.load %arg2[%c10, %c0_81, %c0_82] : memref<27x4x4xbf16, #tpu.memory_space<vmem>>, vector<1x4x4xbf16>
    %118 = vector.shape_cast %117 : vector<1x4x4xbf16> to vector<4x4xbf16>
    %cst_83 = arith.constant dense<0.000000e+00> : vector<4x1024xf32>
    %119 = tpu.matmul %118, %116, %cst_83 {dimension_numbers = #tpu.dot_dimension_numbers<[1], [0], [0], [1], [0, 0, 1, 1], [], []>} : vector<4x4xbf16>, vector<4x1024xbf16>, vector<4x1024xf32> -> vector<4x1024xf32>
    %c10_84 = arith.constant 10 : index
    %c0_85 = arith.constant 0 : index
    %120 = vector.load %arg4[%c10_84, %c0_85] : memref<27x1024xf32, #tpu.memory_space<vmem>>, vector<1x1024xf32>
    %121 = vector.broadcast %120 : vector<1x1024xf32> to vector<4x1024xf32>
    %122 = arith.mulf %119, %121 : vector<4x1024xf32>
    %123 = arith.addf %115, %122 : vector<4x1024xf32>
    %c0_86 = arith.constant 0 : index
    %c121 = arith.constant 121 : index
    %124 = vector.load %arg12[%c0_86, %c121] : memref<4x1280xbf16, #tpu.memory_space<vmem>>, vector<4x1024xbf16>
    %c11 = arith.constant 11 : index
    %c0_87 = arith.constant 0 : index
    %c0_88 = arith.constant 0 : index
    %125 = vector.load %arg2[%c11, %c0_87, %c0_88] : memref<27x4x4xbf16, #tpu.memory_space<vmem>>, vector<1x4x4xbf16>
    %126 = vector.shape_cast %125 : vector<1x4x4xbf16> to vector<4x4xbf16>
    %cst_89 = arith.constant dense<0.000000e+00> : vector<4x1024xf32>
    %127 = tpu.matmul %126, %124, %cst_89 {dimension_numbers = #tpu.dot_dimension_numbers<[1], [0], [0], [1], [0, 0, 1, 1], [], []>} : vector<4x4xbf16>, vector<4x1024xbf16>, vector<4x1024xf32> -> vector<4x1024xf32>
    %c11_90 = arith.constant 11 : index
    %c0_91 = arith.constant 0 : index
    %128 = vector.load %arg4[%c11_90, %c0_91] : memref<27x1024xf32, #tpu.memory_space<vmem>>, vector<1x1024xf32>
    %129 = vector.broadcast %128 : vector<1x1024xf32> to vector<4x1024xf32>
    %130 = arith.mulf %127, %129 : vector<4x1024xf32>
    %131 = arith.addf %123, %130 : vector<4x1024xf32>
    %c0_92 = arith.constant 0 : index
    %c127 = arith.constant 127 : index
    %132 = vector.load %arg12[%c0_92, %c127] : memref<4x1280xbf16, #tpu.memory_space<vmem>>, vector<4x1024xbf16>
    %c12 = arith.constant 12 : index
    %c0_93 = arith.constant 0 : index
    %c0_94 = arith.constant 0 : index
    %133 = vector.load %arg2[%c12, %c0_93, %c0_94] : memref<27x4x4xbf16, #tpu.memory_space<vmem>>, vector<1x4x4xbf16>
    %134 = vector.shape_cast %133 : vector<1x4x4xbf16> to vector<4x4xbf16>
    %cst_95 = arith.constant dense<0.000000e+00> : vector<4x1024xf32>
    %135 = tpu.matmul %134, %132, %cst_95 {dimension_numbers = #tpu.dot_dimension_numbers<[1], [0], [0], [1], [0, 0, 1, 1], [], []>} : vector<4x4xbf16>, vector<4x1024xbf16>, vector<4x1024xf32> -> vector<4x1024xf32>
    %c12_96 = arith.constant 12 : index
    %c0_97 = arith.constant 0 : index
    %136 = vector.load %arg4[%c12_96, %c0_97] : memref<27x1024xf32, #tpu.memory_space<vmem>>, vector<1x1024xf32>
    %137 = vector.broadcast %136 : vector<1x1024xf32> to vector<4x1024xf32>
    %138 = arith.mulf %135, %137 : vector<4x1024xf32>
    %139 = arith.addf %131, %138 : vector<4x1024xf32>
    %c0_98 = arith.constant 0 : index
    %c128_99 = arith.constant 128 : index
    %140 = vector.load %arg12[%c0_98, %c128_99] : memref<4x1280xbf16, #tpu.memory_space<vmem>>, vector<4x1024xbf16>
    %c13 = arith.constant 13 : index
    %c0_100 = arith.constant 0 : index
    %c0_101 = arith.constant 0 : index
    %141 = vector.load %arg2[%c13, %c0_100, %c0_101] : memref<27x4x4xbf16, #tpu.memory_space<vmem>>, vector<1x4x4xbf16>
    %142 = vector.shape_cast %141 : vector<1x4x4xbf16> to vector<4x4xbf16>
    %cst_102 = arith.constant dense<0.000000e+00> : vector<4x1024xf32>
    %143 = tpu.matmul %142, %140, %cst_102 {dimension_numbers = #tpu.dot_dimension_numbers<[1], [0], [0], [1], [0, 0, 1, 1], [], []>} : vector<4x4xbf16>, vector<4x1024xbf16>, vector<4x1024xf32> -> vector<4x1024xf32>
    %c13_103 = arith.constant 13 : index
    %c0_104 = arith.constant 0 : index
    %144 = vector.load %arg4[%c13_103, %c0_104] : memref<27x1024xf32, #tpu.memory_space<vmem>>, vector<1x1024xf32>
    %145 = vector.broadcast %144 : vector<1x1024xf32> to vector<4x1024xf32>
    %146 = arith.mulf %143, %145 : vector<4x1024xf32>
    %147 = arith.addf %139, %146 : vector<4x1024xf32>
    %c0_105 = arith.constant 0 : index
    %c129 = arith.constant 129 : index
    %148 = vector.load %arg12[%c0_105, %c129] : memref<4x1280xbf16, #tpu.memory_space<vmem>>, vector<4x1024xbf16>
    %c14 = arith.constant 14 : index
    %c0_106 = arith.constant 0 : index
    %c0_107 = arith.constant 0 : index
    %149 = vector.load %arg2[%c14, %c0_106, %c0_107] : memref<27x4x4xbf16, #tpu.memory_space<vmem>>, vector<1x4x4xbf16>
    %150 = vector.shape_cast %149 : vector<1x4x4xbf16> to vector<4x4xbf16>
    %cst_108 = arith.constant dense<0.000000e+00> : vector<4x1024xf32>
    %151 = tpu.matmul %150, %148, %cst_108 {dimension_numbers = #tpu.dot_dimension_numbers<[1], [0], [0], [1], [0, 0, 1, 1], [], []>} : vector<4x4xbf16>, vector<4x1024xbf16>, vector<4x1024xf32> -> vector<4x1024xf32>
    %c14_109 = arith.constant 14 : index
    %c0_110 = arith.constant 0 : index
    %152 = vector.load %arg4[%c14_109, %c0_110] : memref<27x1024xf32, #tpu.memory_space<vmem>>, vector<1x1024xf32>
    %153 = vector.broadcast %152 : vector<1x1024xf32> to vector<4x1024xf32>
    %154 = arith.mulf %151, %153 : vector<4x1024xf32>
    %155 = arith.addf %147, %154 : vector<4x1024xf32>
    %c0_111 = arith.constant 0 : index
    %c135 = arith.constant 135 : index
    %156 = vector.load %arg12[%c0_111, %c135] : memref<4x1280xbf16, #tpu.memory_space<vmem>>, vector<4x1024xbf16>
    %c15 = arith.constant 15 : index
    %c0_112 = arith.constant 0 : index
    %c0_113 = arith.constant 0 : index
    %157 = vector.load %arg2[%c15, %c0_112, %c0_113] : memref<27x4x4xbf16, #tpu.memory_space<vmem>>, vector<1x4x4xbf16>
    %158 = vector.shape_cast %157 : vector<1x4x4xbf16> to vector<4x4xbf16>
    %cst_114 = arith.constant dense<0.000000e+00> : vector<4x1024xf32>
    %159 = tpu.matmul %158, %156, %cst_114 {dimension_numbers = #tpu.dot_dimension_numbers<[1], [0], [0], [1], [0, 0, 1, 1], [], []>} : vector<4x4xbf16>, vector<4x1024xbf16>, vector<4x1024xf32> -> vector<4x1024xf32>
    %c15_115 = arith.constant 15 : index
    %c0_116 = arith.constant 0 : index
    %160 = vector.load %arg4[%c15_115, %c0_116] : memref<27x1024xf32, #tpu.memory_space<vmem>>, vector<1x1024xf32>
    %161 = vector.broadcast %160 : vector<1x1024xf32> to vector<4x1024xf32>
    %162 = arith.mulf %159, %161 : vector<4x1024xf32>
    %163 = arith.addf %155, %162 : vector<4x1024xf32>
    %c0_117 = arith.constant 0 : index
    %c136 = arith.constant 136 : index
    %164 = vector.load %arg12[%c0_117, %c136] : memref<4x1280xbf16, #tpu.memory_space<vmem>>, vector<4x1024xbf16>
    %c16 = arith.constant 16 : index
    %c0_118 = arith.constant 0 : index
    %c0_119 = arith.constant 0 : index
    %165 = vector.load %arg2[%c16, %c0_118, %c0_119] : memref<27x4x4xbf16, #tpu.memory_space<vmem>>, vector<1x4x4xbf16>
    %166 = vector.shape_cast %165 : vector<1x4x4xbf16> to vector<4x4xbf16>
    %cst_120 = arith.constant dense<0.000000e+00> : vector<4x1024xf32>
    %167 = tpu.matmul %166, %164, %cst_120 {dimension_numbers = #tpu.dot_dimension_numbers<[1], [0], [0], [1], [0, 0, 1, 1], [], []>} : vector<4x4xbf16>, vector<4x1024xbf16>, vector<4x1024xf32> -> vector<4x1024xf32>
    %c16_121 = arith.constant 16 : index
    %c0_122 = arith.constant 0 : index
    %168 = vector.load %arg4[%c16_121, %c0_122] : memref<27x1024xf32, #tpu.memory_space<vmem>>, vector<1x1024xf32>
    %169 = vector.broadcast %168 : vector<1x1024xf32> to vector<4x1024xf32>
    %170 = arith.mulf %167, %169 : vector<4x1024xf32>
    %171 = arith.addf %163, %170 : vector<4x1024xf32>
    %c0_123 = arith.constant 0 : index
    %c137 = arith.constant 137 : index
    %172 = vector.load %arg12[%c0_123, %c137] : memref<4x1280xbf16, #tpu.memory_space<vmem>>, vector<4x1024xbf16>
    %c17 = arith.constant 17 : index
    %c0_124 = arith.constant 0 : index
    %c0_125 = arith.constant 0 : index
    %173 = vector.load %arg2[%c17, %c0_124, %c0_125] : memref<27x4x4xbf16, #tpu.memory_space<vmem>>, vector<1x4x4xbf16>
    %174 = vector.shape_cast %173 : vector<1x4x4xbf16> to vector<4x4xbf16>
    %cst_126 = arith.constant dense<0.000000e+00> : vector<4x1024xf32>
    %175 = tpu.matmul %174, %172, %cst_126 {dimension_numbers = #tpu.dot_dimension_numbers<[1], [0], [0], [1], [0, 0, 1, 1], [], []>} : vector<4x4xbf16>, vector<4x1024xbf16>, vector<4x1024xf32> -> vector<4x1024xf32>
    %c17_127 = arith.constant 17 : index
    %c0_128 = arith.constant 0 : index
    %176 = vector.load %arg4[%c17_127, %c0_128] : memref<27x1024xf32, #tpu.memory_space<vmem>>, vector<1x1024xf32>
    %177 = vector.broadcast %176 : vector<1x1024xf32> to vector<4x1024xf32>
    %178 = arith.mulf %175, %177 : vector<4x1024xf32>
    %179 = arith.addf %171, %178 : vector<4x1024xf32>
    %c0_129 = arith.constant 0 : index
    %c183 = arith.constant 183 : index
    %180 = vector.load %arg12[%c0_129, %c183] : memref<4x1280xbf16, #tpu.memory_space<vmem>>, vector<4x1024xbf16>
    %c18 = arith.constant 18 : index
    %c0_130 = arith.constant 0 : index
    %c0_131 = arith.constant 0 : index
    %181 = vector.load %arg2[%c18, %c0_130, %c0_131] : memref<27x4x4xbf16, #tpu.memory_space<vmem>>, vector<1x4x4xbf16>
    %182 = vector.shape_cast %181 : vector<1x4x4xbf16> to vector<4x4xbf16>
    %cst_132 = arith.constant dense<0.000000e+00> : vector<4x1024xf32>
    %183 = tpu.matmul %182, %180, %cst_132 {dimension_numbers = #tpu.dot_dimension_numbers<[1], [0], [0], [1], [0, 0, 1, 1], [], []>} : vector<4x4xbf16>, vector<4x1024xbf16>, vector<4x1024xf32> -> vector<4x1024xf32>
    %c18_133 = arith.constant 18 : index
    %c0_134 = arith.constant 0 : index
    %184 = vector.load %arg4[%c18_133, %c0_134] : memref<27x1024xf32, #tpu.memory_space<vmem>>, vector<1x1024xf32>
    %185 = vector.broadcast %184 : vector<1x1024xf32> to vector<4x1024xf32>
    %186 = arith.mulf %183, %185 : vector<4x1024xf32>
    %187 = arith.addf %179, %186 : vector<4x1024xf32>
    %c0_135 = arith.constant 0 : index
    %c184 = arith.constant 184 : index
    %188 = vector.load %arg12[%c0_135, %c184] : memref<4x1280xbf16, #tpu.memory_space<vmem>>, vector<4x1024xbf16>
    %c19 = arith.constant 19 : index
    %c0_136 = arith.constant 0 : index
    %c0_137 = arith.constant 0 : index
    %189 = vector.load %arg2[%c19, %c0_136, %c0_137] : memref<27x4x4xbf16, #tpu.memory_space<vmem>>, vector<1x4x4xbf16>
    %190 = vector.shape_cast %189 : vector<1x4x4xbf16> to vector<4x4xbf16>
    %cst_138 = arith.constant dense<0.000000e+00> : vector<4x1024xf32>
    %191 = tpu.matmul %190, %188, %cst_138 {dimension_numbers = #tpu.dot_dimension_numbers<[1], [0], [0], [1], [0, 0, 1, 1], [], []>} : vector<4x4xbf16>, vector<4x1024xbf16>, vector<4x1024xf32> -> vector<4x1024xf32>
    %c19_139 = arith.constant 19 : index
    %c0_140 = arith.constant 0 : index
    %192 = vector.load %arg4[%c19_139, %c0_140] : memref<27x1024xf32, #tpu.memory_space<vmem>>, vector<1x1024xf32>
    %193 = vector.broadcast %192 : vector<1x1024xf32> to vector<4x1024xf32>
    %194 = arith.mulf %191, %193 : vector<4x1024xf32>
    %195 = arith.addf %187, %194 : vector<4x1024xf32>
    %c0_141 = arith.constant 0 : index
    %c185 = arith.constant 185 : index
    %196 = vector.load %arg12[%c0_141, %c185] : memref<4x1280xbf16, #tpu.memory_space<vmem>>, vector<4x1024xbf16>
    %c20 = arith.constant 20 : index
    %c0_142 = arith.constant 0 : index
    %c0_143 = arith.constant 0 : index
    %197 = vector.load %arg2[%c20, %c0_142, %c0_143] : memref<27x4x4xbf16, #tpu.memory_space<vmem>>, vector<1x4x4xbf16>
    %198 = vector.shape_cast %197 : vector<1x4x4xbf16> to vector<4x4xbf16>
    %cst_144 = arith.constant dense<0.000000e+00> : vector<4x1024xf32>
    %199 = tpu.matmul %198, %196, %cst_144 {dimension_numbers = #tpu.dot_dimension_numbers<[1], [0], [0], [1], [0, 0, 1, 1], [], []>} : vector<4x4xbf16>, vector<4x1024xbf16>, vector<4x1024xf32> -> vector<4x1024xf32>
    %c20_145 = arith.constant 20 : index
    %c0_146 = arith.constant 0 : index
    %200 = vector.load %arg4[%c20_145, %c0_146] : memref<27x1024xf32, #tpu.memory_space<vmem>>, vector<1x1024xf32>
    %201 = vector.broadcast %200 : vector<1x1024xf32> to vector<4x1024xf32>
    %202 = arith.mulf %199, %201 : vector<4x1024xf32>
    %203 = arith.addf %195, %202 : vector<4x1024xf32>
    %c0_147 = arith.constant 0 : index
    %c191 = arith.constant 191 : index
    %204 = vector.load %arg12[%c0_147, %c191] : memref<4x1280xbf16, #tpu.memory_space<vmem>>, vector<4x1024xbf16>
    %c21 = arith.constant 21 : index
    %c0_148 = arith.constant 0 : index
    %c0_149 = arith.constant 0 : index
    %205 = vector.load %arg2[%c21, %c0_148, %c0_149] : memref<27x4x4xbf16, #tpu.memory_space<vmem>>, vector<1x4x4xbf16>
    %206 = vector.shape_cast %205 : vector<1x4x4xbf16> to vector<4x4xbf16>
    %cst_150 = arith.constant dense<0.000000e+00> : vector<4x1024xf32>
    %207 = tpu.matmul %206, %204, %cst_150 {dimension_numbers = #tpu.dot_dimension_numbers<[1], [0], [0], [1], [0, 0, 1, 1], [], []>} : vector<4x4xbf16>, vector<4x1024xbf16>, vector<4x1024xf32> -> vector<4x1024xf32>
    %c21_151 = arith.constant 21 : index
    %c0_152 = arith.constant 0 : index
    %208 = vector.load %arg4[%c21_151, %c0_152] : memref<27x1024xf32, #tpu.memory_space<vmem>>, vector<1x1024xf32>
    %209 = vector.broadcast %208 : vector<1x1024xf32> to vector<4x1024xf32>
    %210 = arith.mulf %207, %209 : vector<4x1024xf32>
    %211 = arith.addf %203, %210 : vector<4x1024xf32>
    %c0_153 = arith.constant 0 : index
    %c192 = arith.constant 192 : index
    %212 = vector.load %arg12[%c0_153, %c192] : memref<4x1280xbf16, #tpu.memory_space<vmem>>, vector<4x1024xbf16>
    %c22 = arith.constant 22 : index
    %c0_154 = arith.constant 0 : index
    %c0_155 = arith.constant 0 : index
    %213 = vector.load %arg2[%c22, %c0_154, %c0_155] : memref<27x4x4xbf16, #tpu.memory_space<vmem>>, vector<1x4x4xbf16>
    %214 = vector.shape_cast %213 : vector<1x4x4xbf16> to vector<4x4xbf16>
    %cst_156 = arith.constant dense<0.000000e+00> : vector<4x1024xf32>
    %215 = tpu.matmul %214, %212, %cst_156 {dimension_numbers = #tpu.dot_dimension_numbers<[1], [0], [0], [1], [0, 0, 1, 1], [], []>} : vector<4x4xbf16>, vector<4x1024xbf16>, vector<4x1024xf32> -> vector<4x1024xf32>
    %c22_157 = arith.constant 22 : index
    %c0_158 = arith.constant 0 : index
    %216 = vector.load %arg4[%c22_157, %c0_158] : memref<27x1024xf32, #tpu.memory_space<vmem>>, vector<1x1024xf32>
    %217 = vector.broadcast %216 : vector<1x1024xf32> to vector<4x1024xf32>
    %218 = arith.mulf %215, %217 : vector<4x1024xf32>
    %219 = arith.addf %211, %218 : vector<4x1024xf32>
    %c0_159 = arith.constant 0 : index
    %c193 = arith.constant 193 : index
    %220 = vector.load %arg12[%c0_159, %c193] : memref<4x1280xbf16, #tpu.memory_space<vmem>>, vector<4x1024xbf16>
    %c23 = arith.constant 23 : index
    %c0_160 = arith.constant 0 : index
    %c0_161 = arith.constant 0 : index
    %221 = vector.load %arg2[%c23, %c0_160, %c0_161] : memref<27x4x4xbf16, #tpu.memory_space<vmem>>, vector<1x4x4xbf16>
    %222 = vector.shape_cast %221 : vector<1x4x4xbf16> to vector<4x4xbf16>
    %cst_162 = arith.constant dense<0.000000e+00> : vector<4x1024xf32>
    %223 = tpu.matmul %222, %220, %cst_162 {dimension_numbers = #tpu.dot_dimension_numbers<[1], [0], [0], [1], [0, 0, 1, 1], [], []>} : vector<4x4xbf16>, vector<4x1024xbf16>, vector<4x1024xf32> -> vector<4x1024xf32>
    %c23_163 = arith.constant 23 : index
    %c0_164 = arith.constant 0 : index
    %224 = vector.load %arg4[%c23_163, %c0_164] : memref<27x1024xf32, #tpu.memory_space<vmem>>, vector<1x1024xf32>
    %225 = vector.broadcast %224 : vector<1x1024xf32> to vector<4x1024xf32>
    %226 = arith.mulf %223, %225 : vector<4x1024xf32>
    %227 = arith.addf %219, %226 : vector<4x1024xf32>
    %c0_165 = arith.constant 0 : index
    %c199 = arith.constant 199 : index
    %228 = vector.load %arg12[%c0_165, %c199] : memref<4x1280xbf16, #tpu.memory_space<vmem>>, vector<4x1024xbf16>
    %c24 = arith.constant 24 : index
    %c0_166 = arith.constant 0 : index
    %c0_167 = arith.constant 0 : index
    %229 = vector.load %arg2[%c24, %c0_166, %c0_167] : memref<27x4x4xbf16, #tpu.memory_space<vmem>>, vector<1x4x4xbf16>
    %230 = vector.shape_cast %229 : vector<1x4x4xbf16> to vector<4x4xbf16>
    %cst_168 = arith.constant dense<0.000000e+00> : vector<4x1024xf32>
    %231 = tpu.matmul %230, %228, %cst_168 {dimension_numbers = #tpu.dot_dimension_numbers<[1], [0], [0], [1], [0, 0, 1, 1], [], []>} : vector<4x4xbf16>, vector<4x1024xbf16>, vector<4x1024xf32> -> vector<4x1024xf32>
    %c24_169 = arith.constant 24 : index
    %c0_170 = arith.constant 0 : index
    %232 = vector.load %arg4[%c24_169, %c0_170] : memref<27x1024xf32, #tpu.memory_space<vmem>>, vector<1x1024xf32>
    %233 = vector.broadcast %232 : vector<1x1024xf32> to vector<4x1024xf32>
    %234 = arith.mulf %231, %233 : vector<4x1024xf32>
    %235 = arith.addf %227, %234 : vector<4x1024xf32>
    %c0_171 = arith.constant 0 : index
    %c200 = arith.constant 200 : index
    %236 = vector.load %arg12[%c0_171, %c200] : memref<4x1280xbf16, #tpu.memory_space<vmem>>, vector<4x1024xbf16>
    %c25 = arith.constant 25 : index
    %c0_172 = arith.constant 0 : index
    %c0_173 = arith.constant 0 : index
    %237 = vector.load %arg2[%c25, %c0_172, %c0_173] : memref<27x4x4xbf16, #tpu.memory_space<vmem>>, vector<1x4x4xbf16>
    %238 = vector.shape_cast %237 : vector<1x4x4xbf16> to vector<4x4xbf16>
    %cst_174 = arith.constant dense<0.000000e+00> : vector<4x1024xf32>
    %239 = tpu.matmul %238, %236, %cst_174 {dimension_numbers = #tpu.dot_dimension_numbers<[1], [0], [0], [1], [0, 0, 1, 1], [], []>} : vector<4x4xbf16>, vector<4x1024xbf16>, vector<4x1024xf32> -> vector<4x1024xf32>
    %c25_175 = arith.constant 25 : index
    %c0_176 = arith.constant 0 : index
    %240 = vector.load %arg4[%c25_175, %c0_176] : memref<27x1024xf32, #tpu.memory_space<vmem>>, vector<1x1024xf32>
    %241 = vector.broadcast %240 : vector<1x1024xf32> to vector<4x1024xf32>
    %242 = arith.mulf %239, %241 : vector<4x1024xf32>
    %243 = arith.addf %235, %242 : vector<4x1024xf32>
    %c0_177 = arith.constant 0 : index
    %c201 = arith.constant 201 : index
    %244 = vector.load %arg12[%c0_177, %c201] : memref<4x1280xbf16, #tpu.memory_space<vmem>>, vector<4x1024xbf16>
    %c26 = arith.constant 26 : index
    %c0_178 = arith.constant 0 : index
    %c0_179 = arith.constant 0 : index
    %245 = vector.load %arg2[%c26, %c0_178, %c0_179] : memref<27x4x4xbf16, #tpu.memory_space<vmem>>, vector<1x4x4xbf16>
    %246 = vector.shape_cast %245 : vector<1x4x4xbf16> to vector<4x4xbf16>
    %cst_180 = arith.constant dense<0.000000e+00> : vector<4x1024xf32>
    %247 = tpu.matmul %246, %244, %cst_180 {dimension_numbers = #tpu.dot_dimension_numbers<[1], [0], [0], [1], [0, 0, 1, 1], [], []>} : vector<4x4xbf16>, vector<4x1024xbf16>, vector<4x1024xf32> -> vector<4x1024xf32>
    %c26_181 = arith.constant 26 : index
    %c0_182 = arith.constant 0 : index
    %248 = vector.load %arg4[%c26_181, %c0_182] : memref<27x1024xf32, #tpu.memory_space<vmem>>, vector<1x1024xf32>
    %249 = vector.broadcast %248 : vector<1x1024xf32> to vector<4x1024xf32>
    %250 = arith.mulf %247, %249 : vector<4x1024xf32>
    %251 = arith.addf %243, %250 : vector<4x1024xf32>
    %cst_183 = arith.constant dense<0.000000e+00> : vector<4xf32>
    %252 = vector.multi_reduction <add>, %251, %cst_183 [1] : vector<4x1024xf32> to vector<4xf32>
    %253 = vector.shape_cast %252 : vector<4xf32> to vector<4x1xf32>
    %cst_184 = arith.constant 1.024000e+03 : f32
    %254 = vector.broadcast %cst_184 : f32 to vector<4x1xf32>
    %255 = arith.divf %253, %254 : vector<4x1xf32>
    %256 = arith.mulf %251, %251 : vector<4x1024xf32>
    %cst_185 = arith.constant dense<0.000000e+00> : vector<4xf32>
    %257 = vector.multi_reduction <add>, %256, %cst_185 [1] : vector<4x1024xf32> to vector<4xf32>
    %258 = vector.shape_cast %257 : vector<4xf32> to vector<4x1xf32>
    %cst_186 = arith.constant 1.024000e+03 : f32
    %259 = vector.broadcast %cst_186 : f32 to vector<4x1xf32>
    %260 = arith.divf %258, %259 : vector<4x1xf32>
    %261 = arith.mulf %255, %255 : vector<4x1xf32>
    %262 = arith.subf %260, %261 : vector<4x1xf32>
    %cst_187 = arith.constant 0.000000e+00 : f32
    %263 = vector.broadcast %cst_187 : f32 to vector<4x1xf32>
    %264 = arith.maximumf %262, %263 : vector<4x1xf32>
    %c0_188 = arith.constant 0 : index
    %c0_189 = arith.constant 0 : index
    %265 = vector.load %arg7[%c0_188, %c0_189] : memref<4x1xf32, #tpu.memory_space<vmem>>, vector<4x1xf32>
    %cst_190 = arith.constant 9.99999974E-6 : f32
    %266 = vector.broadcast %cst_190 : f32 to vector<4x1xf32>
    %267 = arith.addf %264, %266 : vector<4x1xf32>
    %268 = math.rsqrt %267 : vector<4x1xf32>
    %269 = arith.mulf %265, %268 : vector<4x1xf32>
    %c0_191 = arith.constant 0 : index
    %c0_192 = arith.constant 0 : index
    %270 = vector.load %arg8[%c0_191, %c0_192] : memref<4x1xf32, #tpu.memory_space<vmem>>, vector<4x1xf32>
    %271 = arith.mulf %255, %269 : vector<4x1xf32>
    %272 = arith.subf %270, %271 : vector<4x1xf32>
    %273 = vector.broadcast %269 : vector<4x1xf32> to vector<4x1024xf32>
    %274 = arith.mulf %251, %273 : vector<4x1024xf32>
    %275 = vector.broadcast %272 : vector<4x1xf32> to vector<4x1024xf32>
    %276 = arith.addf %274, %275 : vector<4x1024xf32>
    %cst_193 = arith.constant 0.000000e+00 : f32
    %277 = vector.broadcast %cst_193 : f32 to vector<4x1024xf32>
    %278 = arith.maximumf %276, %277 : vector<4x1024xf32>
    %c0_194 = arith.constant 0 : index
    %c0_195 = arith.constant 0 : index
    %279 = vector.load %arg3[%c0_194, %c0_195] : memref<16x4xbf16, #tpu.memory_space<vmem>>, vector<16x4xbf16>
    %280 = arith.truncf %278 : vector<4x1024xf32> to vector<4x1024xbf16>
    %cst_196 = arith.constant dense<0.000000e+00> : vector<16x1024xf32>
    %281 = tpu.matmul %279, %280, %cst_196 {dimension_numbers = #tpu.dot_dimension_numbers<[1], [0], [0], [1], [0, 0, 1, 1], [], []>} : vector<16x4xbf16>, vector<4x1024xbf16>, vector<16x1024xf32> -> vector<16x1024xf32>
    %cst_197 = arith.constant dense<0.000000e+00> : vector<16xf32>
    %282 = vector.multi_reduction <add>, %281, %cst_197 [1] : vector<16x1024xf32> to vector<16xf32>
    %283 = vector.shape_cast %282 : vector<16xf32> to vector<16x1xf32>
    %cst_198 = arith.constant 1.024000e+03 : f32
    %284 = vector.broadcast %cst_198 : f32 to vector<16x1xf32>
    %285 = arith.divf %283, %284 : vector<16x1xf32>
    %286 = arith.mulf %281, %281 : vector<16x1024xf32>
    %cst_199 = arith.constant dense<0.000000e+00> : vector<16xf32>
    %287 = vector.multi_reduction <add>, %286, %cst_199 [1] : vector<16x1024xf32> to vector<16xf32>
    %288 = vector.shape_cast %287 : vector<16xf32> to vector<16x1xf32>
    %cst_200 = arith.constant 1.024000e+03 : f32
    %289 = vector.broadcast %cst_200 : f32 to vector<16x1xf32>
    %290 = arith.divf %288, %289 : vector<16x1xf32>
    %291 = arith.mulf %285, %285 : vector<16x1xf32>
    %292 = arith.subf %290, %291 : vector<16x1xf32>
    %cst_201 = arith.constant 0.000000e+00 : f32
    %293 = vector.broadcast %cst_201 : f32 to vector<16x1xf32>
    %294 = arith.maximumf %292, %293 : vector<16x1xf32>
    %c0_202 = arith.constant 0 : index
    %c0_203 = arith.constant 0 : index
    %295 = vector.load %arg9[%c0_202, %c0_203] : memref<16x1xf32, #tpu.memory_space<vmem>>, vector<16x1xf32>
    %cst_204 = arith.constant 9.99999974E-6 : f32
    %296 = vector.broadcast %cst_204 : f32 to vector<16x1xf32>
    %297 = arith.addf %294, %296 : vector<16x1xf32>
    %298 = math.rsqrt %297 : vector<16x1xf32>
    %299 = arith.mulf %295, %298 : vector<16x1xf32>
    %c0_205 = arith.constant 0 : index
    %c0_206 = arith.constant 0 : index
    %300 = vector.load %arg10[%c0_205, %c0_206] : memref<16x1xf32, #tpu.memory_space<vmem>>, vector<16x1xf32>
    %301 = arith.mulf %285, %299 : vector<16x1xf32>
    %302 = arith.subf %300, %301 : vector<16x1xf32>
    %303 = vector.broadcast %299 : vector<16x1xf32> to vector<16x1024xf32>
    %304 = arith.mulf %281, %303 : vector<16x1024xf32>
    %305 = vector.broadcast %302 : vector<16x1xf32> to vector<16x1024xf32>
    %306 = arith.addf %304, %305 : vector<16x1024xf32>
    %307 = arith.addf %306, %0 : vector<16x1024xf32>
    %cst_207 = arith.constant 0.000000e+00 : f32
    %308 = vector.broadcast %cst_207 : f32 to vector<16x1024xf32>
    %309 = arith.maximumf %307, %308 : vector<16x1024xf32>
    %c0_208 = arith.constant 0 : index
    %c0_209 = arith.constant 0 : index
    %310 = vector.load %arg11[%c0_208, %c0_209] : memref<16x1024xf32, #tpu.memory_space<vmem>>, vector<16x1024xf32>
    tpu.vector_store %arg11[%c0_208, %c0_209], %309 {strides = array<i32>} : memref<16x1024xf32, #tpu.memory_space<vmem>>, vector<16x1024xf32>,
    return
  }
}

</mosaic_0001>

<bundles_post_ra>
// kernel: bottleneck_forward.1
= control target key start
LH: loop header
LB: loop body
LE: loop exit
PB: predicated region body
PF: predicated region fallthrough
CT: control target
= control target key end

     0   :  { %v10063_v3 = vmov 0   ;;  %vm64_vm0 = vcmask 130048   ;;  %vm232_vm1 = vcmask 1043456   ;;  %s10067_s16 = smov 71   ;;  %s10068_s17 = smov 65   ;;  %vm445_vm2 = vcmask 596992   ;;  %s13433_s0 = inlined_call_operand.vmem [shape: f32[16,1024], index: 0, kind: input, shape index: {}]   ;;  %s13434_s1 = inlined_call_operand.vmem [shape: bf16[4,16], index: 1, kind: input, shape index: {}]   ;;  %s13435_s5 = inlined_call_operand.vmem [shape: f32[4,1], index: 5, kind: input, shape index: {}]   ;;  %s13436_s6 = inlined_call_operand.vmem [shape: f32[4,1], index: 6, kind: input, shape index: {}]   ;;  %s13437_s2 = inlined_call_operand.vmem [shape: bf16[27,4,4], index: 2, kind: input, shape index: {}]   ;;  %s13438_s4 = inlined_call_operand.vmem [shape: f32[27,1024], index: 4, kind: input, shape index: {}]   ;;  %s13439_s7 = inlined_call_operand.vmem [shape: f32[4,1], index: 7, kind: input, shape index: {}]   ;;  %s13440_s8 = inlined_call_operand.vmem [shape: f32[4,1], index: 8, kind: input, shape index: {}]   ;;  %s13441_s3 = inlined_call_operand.vmem [shape: bf16[16,4], index: 3, kind: input, shape index: {}]   ;;  %s13442_s9 = inlined_call_operand.vmem [shape: f32[16,1], index: 9, kind: input, shape index: {}]   ;;  %s13443_s10 = inlined_call_operand.vmem [shape: f32[16,1], index: 10, kind: input, shape index: {}]   ;;  %s13444_s11 = inlined_call_operand.vmem [shape: f32[16,1024], index: 11, kind: output, shape index: {}]  }
   0x1   :  { %v40_v0 = vld [vmem:[%s13433_s0 + $0x8] sm:$0xff]  ;;  %v39_v2 = vld [vmem:[%s13433_s0] sm:$0xff]  ;;  %100 = vmatprep.mubr.bf16.mxu0 %v10063_v3  ;;  %322 = vst [vmem:[#allocation2] sm:$0xff] %v10063_v3  ;;  %323 = vst [vmem:[#allocation2 + $0x8] sm:$0xff] %v10063_v3  ;;  %141 = vmatprep.mubr.bf16.mxu1 %v10063_v3  ;;  %s10069_s18 = smov 64   ;;  %s10070_s19 = smov 63  }
   0x2   :  { %v48_v1 = vld [vmem:[%s13433_s0 + $0x48] sm:$0xff]  ;;  %324 = vst [vmem:[#allocation2 + $0x10] sm:$0xf] %v10063_v3  ;;  %v47_v5 = vld [vmem:[%s13433_s0 + $0x40] sm:$0xff]  ;;  %v42_v6 = vld [vmem:[%s13433_s0 + $0x18] sm:$0xff]  ;;  %10028 = vset.pattern.permute.xlu1 %v10063_v3  ;;  %10029 = vset.pattern.permute.xlu0 %v10063_v3  ;;  %s10071_s20 = smov 57  }
   0x3   :  { %v57_v4 = vpack.c.bf16 %v48_v1, %v40_v0  ;;  %v50_v7 = vld [vmem:[%s13433_s0 + $0x58] sm:$0xff]  ;;  %v56_v8 = vpack.c.bf16 %v47_v5, %v39_v2  ;;  %v41_v10 = vld [vmem:[%s13433_s0 + $0x10] sm:$0xff]  ;;  %v55_v12 = vld [vmem:[%s13434_s1] sm:$0x3]  ;;  %s10072_s21 = smov 56   ;;  %s10073_s22 = smov 55  }
   0x4   :  { %v59_v9 = vpack.c.bf16 %v50_v7, %v42_v6  ;;  %v49_v11 = vld [vmem:[%s13433_s0 + $0x50] sm:$0xff]  ;;  %v44_v14 = vld [vmem:[%s13433_s0 + $0x28] sm:$0xff]  ;;  %v43_v16 = vld [vmem:[%s13433_s0 + $0x20] sm:$0xff]  ;;  %vm458_vm3 = vcmask 1041408   ;;  %vm454_vm4 = vcmask 31744   ;;  %s10074_s24 = smov 9  }
   0x5   :  { %68 = vmatprep.subr.bf16.mxu0 %v57_v4  ;;  %v58_v13 = vpack.c.bf16 %v49_v11, %v41_v10  ;;  %v52_v15 = vld [vmem:[%s13433_s0 + $0x68] sm:$0xff]  ;;  %v51_v18 = vld [vmem:[%s13433_s0 + $0x60] sm:$0xff]  ;;  %v46_v19 = vld [vmem:[%s13433_s0 + $0x38] sm:$0xff]  ;;  %vm774_vm5 = vcmask 588800   ;;  %vm1102_vm6 = vcmask 580608   ;;  %vm1430_vm7 = vcmask 531456  }
   0x6   :  { %69 = vmatpush1.bf16.msra.mxu0 %v56_v8  ;;  %109 = vmatprep.subr.bf16.mxu1 %v59_v9  ;;  %v61_v17 = vpack.c.bf16 %v52_v15, %v44_v14  ;;  %v54_v20 = vld [vmem:[%s13433_s0 + $0x78] sm:$0xff]  ;;  %v60_v21 = vpack.c.bf16 %v51_v18, %v43_v16  ;;  %v45_v23 = vld [vmem:[%s13433_s0 + $0x30] sm:$0xff]  ;;  %s10075_s29 = smov 8   ;;  %s10076_s30 = smov 7   ;;  %vm1758_vm8 = vcmask 523264   ;;  %vm2086_vm9 = vcmask 515072  }
   0x7   :  { %110 = vmatpush1.bf16.msra.mxu1 %v58_v13  ;;  %v63_v22 = vpack.c.bf16 %v54_v20, %v46_v19  ;;  %v53_v24 = vld [vmem:[%s13433_s0 + $0x70] sm:$0xff]  ;;  %s10077_s1 = smov 1   ;;  %s10078_s23 = smov 127   ;;  %vm2414_vm10 = vcmask 465920   ;;  %vm2742_vm11 = vcmask 457728   ;;  %vm3070_vm12 = vcmask 449536  }
   0x8   :  { %150 = vmatprep.subr.bf16.mxu0 %v61_v17  ;;  %v62_v25 = vpack.c.bf16 %v53_v24, %v45_v23  ;;  %s10079_s28 = smov 121   ;;  %s10080_s12 = smov 120   ;;  %vm3398_vm13 = vcmask 72704   ;;  %vm3726_vm14 = vcmask 64512   ;;  %vm4054_vm15 = vcmask 56320  }
   0x9   :  { %9672 = vmatmul.mubr.msk.bf16.vlgmr.msra.gmra.mrb[0].mxu0 %vm64_vm0, %v55_v12  ;;  %191 = vmatprep.subr.bf16.mxu1 %v63_v22  ;;  %s10081_s15 = smov 119  }
   0xa   :  { %9673 = vmatmul.mubr.msk.bf16.vlgmr.msra.gmra.mrb[0].mxu1 %vm64_vm0, %v55_v12  ;;  %151 = vmatpush1.bf16.msra.mxu0 %v60_v21 }
   0xb   :  { %192 = vmatpush1.bf16.msra.mxu1 %v62_v25  ;;  %182 = vmatprep.mubr.bf16.mxu0 %v10063_v3  ;;  %v281_v25 = vld [vmem:[%s13435_s5] sm:$0xf]  ;;  %s10065_s5 = smov 72  }
   0xc   :  { %223 = vmatprep.mubr.bf16.mxu1 %v10063_v3 }
  0x11   :  { %9674 = vmatmul.mubr.msk.bf16.vlgmr.msra.gmra.mrb[4].mxu0 %vm64_vm0, %v55_v12 }
  0x12   :  { %9675 = vmatmul.mubr.msk.bf16.vlgmr.msra.gmra.mrb[4].mxu1 %vm64_vm0, %v55_v12  ;;  %515 = vmatprep.mubr.bf16.mxu0 %v10063_v3  ;;  %vm4382_vm0 = vcmask 7168  }
  0x13   :  { %556 = vmatprep.mubr.bf16.mxu1 %v10063_v3 }
  0xdc   :  { %v10208_v26 = vpop.f32.mrb[0].mxu0 }
  0xdd   :  { %v233_v27 = vsel %vm232_vm1, %v10208_v26, 0.0  ;;  %v252_v28 = vmul.f32 %v10208_v26, %v10208_v26  ;;  %v10214_v29 = vpop.f32.mrb[1].mxu0  ;;  %v10216_v30 = vpop.f32.mrb[0].mxu1 }
  0xde   :  { %v234_v31 = vsel %vm232_vm1, %v10214_v29, 0.0  ;;  %v253_v32 = vmul.f32 %v10214_v29, %v10214_v29  ;;  %v236_v33 = vsel %vm232_vm1, %v10216_v30, 0.0  ;;  %v254_v34 = vmul.f32 %v10216_v30, %v10216_v30  ;;  %v106_v35 = vpop.f32.mrb[2].mxu0  ;;  %v10226_v36 = vpop.f32.mrb[1].mxu1 }
  0xdf   :  { %v260_v37 = vsel %vm232_vm1, %v252_v28, 0.0  ;;  %v235_v38 = vadd.f32 %v234_v31, %v233_v27  ;;  %v255_v39 = vmul.f32 %v10226_v36, %v10226_v36  ;;  %v107_v40 = vpop.f32.mrb[3].mxu0  ;;  %v147_v41 = vpop.f32.mrb[2].mxu1  ;;  %v238_v44 = vsel %vm232_vm1, %v10226_v36, 0.0  ;;  %v285_v31 = vld [vmem:[%s13436_s6] sm:$0xf] }
  0xe0   :  { %v261_v42 = vsel %vm232_vm1, %v253_v32, 0.0  ;;  %v263_v43 = vsel %vm232_vm1, %v254_v34, 0.0  ;;  %v148_v45 = vpop.f32.mrb[3].mxu1  ;;  %v10064_v34 = vmov 1983009808   ;;  %s10066_s6 = smov 73  }
  0xe1   :  { %v262_v46 = vadd.f32 %v261_v42, %v260_v37  ;;  %v237_v47 = vadd.f32 %v236_v33, %v235_v38  ;;  %v265_v48 = vsel %vm232_vm1, %v255_v39, 0.0  ;;  %v344_v35 = vunpack.c.l.s4 %v10064_v34 }
  0xe2   :  { %v346_v37 = vlaneseq }
  0xe3   :  { %v264_v49 = vadd.f32 %v263_v43, %v262_v46  ;;  %v239_v50 = vadd.f32 %v238_v44, %v237_v47  ;;  %v345_v38 = vunpack.c.0.s8 %v344_v35 }
  0xe4   :  { %v184_v51 = vpop.f32.mrb[4].mxu0  ;;  %v10250_v39 = vshrl.u32 %v346_v37, 7 }
  0xe5   :  { %v266_v52 = vadd.f32 %v265_v48, %v264_v49  ;;  %v240_v53 = vsel %vm232_vm1, %v184_v51, 0.0  ;;  %v256_v54 = vmul.f32 %v184_v51, %v184_v51  ;;  %v186_v55 = vpop.f32.mrb[5].mxu0  ;;  %v225_v56 = vpop.f32.mrb[4].mxu1 }
  0xe6   :  { %v241_v57 = vadd.f32 %v240_v53, %v239_v50  ;;  %v242_v58 = vsel %vm232_vm1, %v186_v55, 0.0  ;;  %v257_v59 = vmul.f32 %v186_v55, %v186_v55  ;;  %v258_v60 = vmul.f32 %v225_v56, %v225_v56  ;;  %v188_v61 = vpop.f32.mrb[6].mxu0  ;;  %v227_v62 = vpop.f32.mrb[5].mxu1 }
  0xe7   :  { %v267_v63 = vsel %vm232_vm1, %v256_v54, 0.0  ;;  %v189_v0 = vpop.f32.mrb[7].mxu0  ;;  %v229_v1 = vpop.f32.mrb[6].mxu1  ;;  %v244_v2 = vsel %vm232_vm1, %v225_v56, 0.0  ;;  %v259_v8 = vmul.f32 %v227_v62, %v227_v62  ;;  %v246_v12 = vsel %vm232_vm1, %v227_v62, 0.0 }
  0xe8   :  { %v268_v4 = vadd.f32 %v267_v63, %v266_v52  ;;  %v269_v5 = vsel %vm232_vm1, %v257_v59, 0.0  ;;  %v230_v6 = vpop.f32.mrb[7].mxu1  ;;  %v243_v7 = vadd.f32 %v242_v58, %v241_v57  ;;  %v271_v9 = vsel %vm232_vm1, %v258_v60, 0.0 }
  0xe9   :  { %v273_v15 = vsel %vm232_vm1, %v259_v8, 0.0  ;;  %v10253_v41 = vsub.s32 %v345_v38, %v10250_v39 }
  0xea   :  { %v245_v10 = vadd.f32 %v244_v2, %v243_v7  ;;  %v270_v11 = vadd.f32 %v269_v5, %v268_v4 }
  0xec   :  { %v247_v13 = vadd.f32 %v246_v12, %v245_v10  ;;  %v272_v14 = vadd.f32 %v271_v9, %v270_v11 }
  0xee   :  { %248 = vadd.xlane.f32.xlu0 %v247_v13  ;;  %v274_v16 = vadd.f32 %v273_v15, %v272_v14 }
  0xf2   :  { %275 = vadd.xlane.f32.xlu0 %v274_v16 }
 0x17b   :  { %v249_v17 = vpop.xlane.xlu0 %248 }
 0x17c   :  { %v251_v18 = vmul.f32 0.0009765625, %v249_v17 }
 0x17e   :  { %v278_v20 = vmul.f32 %v251_v18, %v251_v18 }
 0x17f   :  { %v276_v19 = vpop.xlane.xlu0 %275 }
 0x180   :  { %v277_v21 = vmul.f32 0.0009765625, %v276_v19 }
 0x182   :  { %v279_v22 = vsub.f32 %v277_v21, %v278_v20 }
 0x184   :  { %v280_v23 = vmax.f32 %v279_v22, 0.0 }
 0x186   :  { %v282_v24 = vadd.f32 1e-05, %v280_v23 }
 0x188   :  { %10038 = vrsqrt.f32 %v282_v24 }
 0x192   :  { %v10039_v27 = vpop.eup %10038 }
 0x193   :  { %v284_v28 = vmul.f32 %v10039_v27, %v281_v25 }
 0x195   :  { %290 = vperm.xlu1 %10028, %v284_v28   ;;  %v286_v32 = vmul.f32 %v284_v28, %v251_v18 }
 0x197   :  { %v287_v33 = vsub.f32 %v285_v31, %v286_v32 }
 0x199   :  { %303 = vperm.xlu1 %10028, %v287_v33  }
 0x214   :  { %v291_v40 = vpop.permute.xlu1 %290 }
 0x215   :  { %v293_v42 = vmul.f32 %v291_v40, %v10208_v26  ;;  %v294_v43 = vmul.f32 %v291_v40, %v10214_v29  ;;  %v295_v44 = vmul.f32 %v291_v40, %v10216_v30  ;;  %v296_v45 = vmul.f32 %v291_v40, %v10226_v36 }
 0x216   :  { %v297_v46 = vmul.f32 %v291_v40, %v184_v51  ;;  %v298_v47 = vmul.f32 %v291_v40, %v186_v55  ;;  %v299_v48 = vmul.f32 %v291_v40, %v225_v56  ;;  %v300_v49 = vmul.f32 %v291_v40, %v227_v62 }
 0x218   :  { %v304_v50 = vpop.permute.xlu1 %303 }
 0x219   :  { %v306_v52 = vadd.f32 %v304_v50, %v293_v42  ;;  %v307_v53 = vadd.f32 %v304_v50, %v294_v43  ;;  %v308_v54 = vadd.f32 %v304_v50, %v295_v44  ;;  %v309_v57 = vadd.f32 %v304_v50, %v296_v45 }
 0x21a   :  { %v310_v58 = vadd.f32 %v304_v50, %v297_v46  ;;  %v311_v59 = vadd.f32 %v304_v50, %v298_v47  ;;  %v312_v60 = vadd.f32 %v304_v50, %v299_v48  ;;  %v313_v61 = vadd.f32 %v304_v50, %v300_v49  ;;  %v10472_v50 = vld [vmem:[%s13437_s2] sm:$0x3] }
 0x21b   :  { %v314_v26 = vmax.f32 %v306_v52, 0.0  ;;  %v315_v63 = vmax.f32 %v307_v53, 0.0  ;;  %v316_v29 = vmax.f32 %v308_v54, 0.0  ;;  %v317_v0 = vmax.f32 %v309_v57, 0.0 }
 0x21c   :  { %v318_v30 = vmax.f32 %v310_v58, 0.0  ;;  %v319_v1 = vmax.f32 %v311_v59, 0.0  ;;  %v320_v36 = vmax.f32 %v312_v60, 0.0  ;;  %v321_v51 = vmax.f32 %v313_v61, 0.0 }
 0x21d   :  { %v9676_v55 = vpack.c.bf16 %v315_v63, %v314_v26  ;;  %v9677_v56 = vpack.c.bf16 %v317_v0, %v316_v29 }
 0x21e   :  { %v9678_v62 = vpack.c.bf16 %v319_v1, %v318_v30  ;;  %v9679_v2 = vpack.c.bf16 %v321_v51, %v320_v36 }
 0x21f   :  { %v349_v4 = vrot.slane %v9676_v55, %v10253_v41  ;;  %v356_v5 = vrot.slane %v9677_v56, %v10253_v41  ;;  %v10520_v55 = vld [vmem:[%s13437_s2 + $0x2] sm:$0x3] }
 0x220   :  { %v366_v6 = vrot.slane %v9678_v62, %v10253_v41  ;;  %v373_v7 = vrot.slane %v9679_v2, %v10253_v41 }
 0x221   :  { %v357_v8 = vcombine.low %v349_v4, %v356_v5  ;;  %v10062_v11 = vcombine.low %v356_v5, %v356_v5 }
 0x222   :  { %v374_v9 = vcombine.low %v366_v6, %v373_v7 }
 0x223   :  { %377 = vst [vmem:[#allocation2 + $0x2] sm:$0xff] %v357_v8  ;;  %v10264_v10 = vrot.slane %v357_v8, %v10253_v41  ;;  %v10267_v12 = vrot.slane %v10062_v11, %v10253_v41 }
 0x224   :  { %378 = vst [vmem:[#allocation2 + $0xa] sm:$0xff] %v374_v9 }
 0x22a   :  { %v379_v15 = vld [vmem:[#allocation2] sm:$0xff] }
 0x22b   :  { %v10269_v13 = vld.sshfl [vmem:[#allocation2 + $0x10] sm:$0x3 pattern:$0x76325410]  ;;  %v380_v14 = vld [vmem:[#allocation2 + $0x8] sm:$0xff]  ;;  %v10279_v17 = vrot.slane %v379_v15, %v10253_v41  ;;  %v715_v21 = vcombine.high %v379_v15, %v379_v15 }
 0x22c   :  { %772 = vrot.lane.b32.xlu0 %v10269_v13, %s10065_s5  ;;  %443 = vrot.lane.b32.xlu1 %v10269_v13, %s10066_s6  ;;  %v10276_v16 = vrot.slane %v380_v14, %v10253_v41  ;;  %v10281_v18 = vld [vmem:[#allocation2 + $0xa] sm:$0xff]  ;;  %v732_v24 = vcombine.high %v380_v14, %v380_v14 }
 0x22d   :  { %v7253_v19 = vcombine.high %v10281_v18, %v10281_v18  ;;  %v10301_v22 = vrot.slane %v715_v21, %v10253_v41  ;;  %v10305_v23 = vcombine.high %v10279_v17, %v10279_v17 }
 0x22e   :  { %v10312_v25 = vrot.slane %v732_v24, %v10253_v41  ;;  %v10320_v27 = vcombine.high %v10276_v16, %v10276_v16 }
 0x22f   :  { %v10294_v20 = vrot.slane %v7253_v19, %v10253_v41  ;;  %v10352_v31 = vcombine.high %v10301_v22, %v10301_v22 }
 0x230   :  { %435 = vrot.lane.b32.xlu1 %v10276_v16, %s10066_s6  ;;  %427 = vrot.lane.b32.xlu0 %v10279_v17, %s10066_s6  ;;  %v10340_v28 = vcombine.high %v10312_v25, %v10312_v25 }
 0x234   :  { %1084 = vrot.lane.b32.xlu1 %v10279_v17, %s10067_s16  ;;  %756 = vrot.lane.b32.xlu0 %v10279_v17, %s10065_s5 }
 0x238   :  { %1092 = vrot.lane.b32.xlu1 %v10276_v16, %s10067_s16  ;;  %764 = vrot.lane.b32.xlu0 %v10276_v16, %s10065_s5 }
 0x23c   :  { %760 = vrot.lane.b32.xlu0 %v10301_v22, %s10065_s5  ;;  %429 = vrot.lane.b32.xlu1 %v10305_v23, %s10066_s6 }
 0x240   :  { %768 = vrot.lane.b32.xlu0 %v10312_v25, %s10065_s5  ;;  %431 = vrot.lane.b32.xlu1 %v10301_v22, %s10066_s6 }
 0x244   :  { %1086 = vrot.lane.b32.xlu0 %v10305_v23, %s10067_s16  ;;  %437 = vrot.lane.b32.xlu1 %v10320_v27, %s10066_s6 }
 0x248   :  { %1094 = vrot.lane.b32.xlu0 %v10320_v27, %s10067_s16  ;;  %439 = vrot.lane.b32.xlu1 %v10312_v25, %s10066_s6 }
 0x24c   :  { %1412 = vrot.lane.b32.xlu0 %v10279_v17, %s10068_s17  ;;  %758 = vrot.lane.b32.xlu1 %v10305_v23, %s10065_s5 }
 0x250   :  { %1416 = vrot.lane.b32.xlu0 %v10301_v22, %s10068_s17  ;;  %766 = vrot.lane.b32.xlu1 %v10320_v27, %s10065_s5 }
 0x254   :  { %441 = vrot.lane.b32.xlu0 %v10340_v28, %s10066_s6  ;;  %1088 = vrot.lane.b32.xlu1 %v10301_v22, %s10067_s16 }
 0x258   :  { %1420 = vrot.lane.b32.xlu0 %v10276_v16, %s10068_s17  ;;  %1096 = vrot.lane.b32.xlu1 %v10312_v25, %s10067_s16 }
 0x25c   :  { %1424 = vrot.lane.b32.xlu0 %v10312_v25, %s10068_s17  ;;  %433 = vrot.lane.b32.xlu1 %v10352_v31, %s10066_s6 }
 0x260   :  { %1428 = vrot.lane.b32.xlu0 %v10269_v13, %s10068_s17  ;;  %1100 = vrot.lane.b32.xlu1 %v10269_v13, %s10067_s16 }
 0x264   :  { %1742 = vrot.lane.b32.xlu0 %v10305_v23, %s10069_s18  ;;  %1414 = vrot.lane.b32.xlu1 %v10305_v23, %s10068_s17 }
 0x268   :  { %1750 = vrot.lane.b32.xlu0 %v10320_v27, %s10069_s18  ;;  %1422 = vrot.lane.b32.xlu1 %v10320_v27, %s10068_s17 }
 0x26c   :  { %1090 = vrot.lane.b32.xlu0 %v10352_v31, %s10067_s16  ;;  %762 = vrot.lane.b32.xlu1 %v10352_v31, %s10065_s5 }
 0x270   :  { %2068 = vrot.lane.b32.xlu0 %v10279_v17, %s10070_s19  ;;  %1740 = vrot.lane.b32.xlu1 %v10279_v17, %s10069_s18 }
 0x274   :  { %1098 = vrot.lane.b32.xlu0 %v10340_v28, %s10067_s16  ;;  %770 = vrot.lane.b32.xlu1 %v10340_v28, %s10065_s5 }
 0x278   :  { %2072 = vrot.lane.b32.xlu0 %v10301_v22, %s10070_s19  ;;  %1744 = vrot.lane.b32.xlu1 %v10301_v22, %s10069_s18 }
 0x27c   :  { %2076 = vrot.lane.b32.xlu0 %v10276_v16, %s10070_s19  ;;  %1748 = vrot.lane.b32.xlu1 %v10276_v16, %s10069_s18 }
 0x280   :  { %2080 = vrot.lane.b32.xlu0 %v10312_v25, %s10070_s19  ;;  %1752 = vrot.lane.b32.xlu1 %v10312_v25, %s10069_s18 }
 0x284   :  { %2084 = vrot.lane.b32.xlu0 %v10269_v13, %s10070_s19  ;;  %1756 = vrot.lane.b32.xlu1 %v10269_v13, %s10069_s18 }
 0x288   :  { %2398 = vrot.lane.b32.xlu0 %v10305_v23, %s10071_s20  ;;  %2070 = vrot.lane.b32.xlu1 %v10305_v23, %s10070_s19 }
 0x28c   :  { %1746 = vrot.lane.b32.xlu0 %v10352_v31, %s10069_s18  ;;  %1418 = vrot.lane.b32.xlu1 %v10352_v31, %s10068_s17 }
 0x290   :  { %2406 = vrot.lane.b32.xlu0 %v10320_v27, %s10071_s20  ;;  %2078 = vrot.lane.b32.xlu1 %v10320_v27, %s10070_s19 }
 0x294   :  { %1754 = vrot.lane.b32.xlu0 %v10340_v28, %s10069_s18  ;;  %1426 = vrot.lane.b32.xlu1 %v10340_v28, %s10068_s17 }
 0x298   :  { %2724 = vrot.lane.b32.xlu0 %v10279_v17, %s10072_s21  ;;  %2396 = vrot.lane.b32.xlu1 %v10279_v17, %s10071_s20 }
 0x29c   :  { %2728 = vrot.lane.b32.xlu0 %v10301_v22, %s10072_s21  ;;  %2400 = vrot.lane.b32.xlu1 %v10301_v22, %s10071_s20 }
 0x29e   :  { %v10422_v32 = vpop.permute.xlu0 %772  ;;  %v10424_v33 = vpop.permute.xlu1 %443 }
 0x2a0   :  { %2732 = vrot.lane.b32.xlu0 %v10276_v16, %s10072_s21  ;;  %2404 = vrot.lane.b32.xlu1 %v10276_v16, %s10071_s20 }
 0x2a2   :  { %v10430_v34 = vpop.permute.xlu1 %435  ;;  %v428_v35 = vpop.permute.xlu0 %427 }
 0x2a4   :  { %2736 = vrot.lane.b32.xlu0 %v10312_v25, %s10072_s21  ;;  %2408 = vrot.lane.b32.xlu1 %v10312_v25, %s10071_s20 }
 0x2a6   :  { %v10436_v37 = vpop.permute.xlu1 %1084  ;;  %v757_v38 = vpop.permute.xlu0 %756 }
 0x2a8   :  { %2740 = vrot.lane.b32.xlu0 %v10269_v13, %s10072_s21  ;;  %2412 = vrot.lane.b32.xlu1 %v10269_v13, %s10071_s20 }
 0x2aa   :  { %v10442_v40 = vpop.permute.xlu1 %1092  ;;  %v10444_v42 = vpop.permute.xlu0 %764 }
 0x2ac   :  { %2402 = vrot.lane.b32.xlu0 %v10352_v31, %s10071_s20  ;;  %2074 = vrot.lane.b32.xlu1 %v10352_v31, %s10070_s19 }
 0x2ae   :  { %v10450_v43 = vpop.permute.xlu0 %760  ;;  %v430_v44 = vpop.permute.xlu1 %429 }
 0x2af   :  { %v446_v45 = vsel %vm445_vm2, %v428_v35, %v430_v44 }
 0x2b0   :  { %3054 = vrot.lane.b32.xlu0 %v10305_v23, %s10073_s22  ;;  %2726 = vrot.lane.b32.xlu1 %v10305_v23, %s10072_s21  ;;  %v460_v49 = vsel %vm458_vm3, %v446_v45, 0 }
 0x2b2   :  { %v10457_v46 = vpop.permute.xlu0 %768  ;;  %v10459_v47 = vpop.permute.xlu1 %431 }
 0x2b3   :  { %v447_v48 = vsel %vm445_vm2, %v430_v44, %v10459_v47  ;;  %v10583_v44 = vld [vmem:[%s13437_s2 + $0x4] sm:$0x3] }
 0x2b4   :  { %2410 = vrot.lane.b32.xlu0 %v10340_v28, %s10071_s20  ;;  %9681 = vmatprep.subr.msk.bf16.mxu0 %vm458_vm3, %v447_v48 }
 0x2b5   :  { %2082 = vrot.lane.b32.xlu1 %v10340_v28, %s10070_s19  ;;  %484 = vmatpush1.bf16.msra.mxu0 %v460_v49 }
 0x2b6   :  { %v1087_v52 = vpop.permute.xlu0 %1086  ;;  %v438_v53 = vpop.permute.xlu1 %437 }
 0x2b7   :  { %v450_v54 = vsel %vm445_vm2, %v10430_v34, %v438_v53  ;;  %v1103_v7 = vsel %vm1102_vm6, %v10436_v37, %v1087_v52 }
 0x2b8   :  { %3062 = vrot.lane.b32.xlu0 %v10320_v27, %s10073_s22  ;;  %9682 = vmatmul.mubr.msk.bf16.vlgmr.msra.gmra.mrb[8].mxu0 %vm454_vm4, %v10472_v50  ;;  %v472_v60 = vsel %vm458_vm3, %v450_v54, 0  ;;  %v1115_v15 = vsel %vm458_vm3, %v1103_v7, 0 }
 0x2b9   :  { %2734 = vrot.lane.b32.xlu1 %v10320_v27, %s10072_s21  ;;  %597 = vmatprep.mubr.bf16.mxu0 %v10063_v3 }
 0x2ba   :  { %v10483_v57 = vpop.permute.xlu0 %1094  ;;  %v440_v58 = vpop.permute.xlu1 %439 }
 0x2bb   :  { %v451_v59 = vsel %vm445_vm2, %v438_v53, %v440_v58 }
 0x2bc   :  { %3380 = vrot.lane.b32.xlu0 %v10279_v17, %s10074_s24  ;;  %9685 = vmatprep.subr.msk.bf16.mxu0 %vm458_vm3, %v451_v59 }
 0x2bd   :  { %3052 = vrot.lane.b32.xlu1 %v10279_v17, %s10073_s22  ;;  %566 = vmatpush1.bf16.msra.mxu0 %v472_v60 }
 0x2be   :  { %v10492_v61 = vpop.permute.xlu0 %1412  ;;  %v759_v26 = vpop.permute.xlu1 %758 }
 0x2bf   :  { %v775_v63 = vsel %vm774_vm5, %v757_v38, %v759_v26  ;;  %v776_v29 = vsel %vm774_vm5, %v759_v26, %v10450_v43  ;;  %v1107_v38 = vsel %vm1102_vm6, %v10442_v40, %v10483_v57 }
 0x2c0   :  { %3384 = vrot.lane.b32.xlu0 %v10301_v22, %s10074_s24  ;;  %9686 = vmatmul.mubr.msk.bf16.vlgmr.msra.gmra.mrb[12].mxu0 %vm454_vm4, %v10472_v50  ;;  %v787_v0 = vsel %vm458_vm3, %v775_v63, 0  ;;  %v1127_v49 = vsel %vm458_vm3, %v1107_v38, 0 }
 0x2c1   :  { %9691 = vmatprep.subr.msk.bf16.mxu0 %vm458_vm3, %v776_v29  ;;  %3056 = vrot.lane.b32.xlu1 %v10301_v22, %s10073_s22 }
 0x2c2   :  { %811 = vmatpush1.bf16.msra.mxu0 %v787_v0  ;;  %v10505_v30 = vpop.permute.xlu0 %1416  ;;  %v767_v1 = vpop.permute.xlu1 %766  ;;  %842 = vmatprep.mubr.bf16.mxu0 %v10063_v3 }
 0x2c3   :  { %v780_v36 = vsel %vm774_vm5, %v767_v1, %v10457_v46  ;;  %v779_v51 = vsel %vm774_vm5, %v10444_v42, %v767_v1  ;;  %v10643_v1 = vld [vmem:[%s13437_s2 + $0x6] sm:$0x3] }
 0x2c4   :  { %3388 = vrot.lane.b32.xlu0 %v10276_v16, %s10074_s24  ;;  %9695 = vmatprep.subr.msk.bf16.mxu0 %vm458_vm3, %v780_v36  ;;  %v799_v4 = vsel %vm458_vm3, %v779_v51, 0 }
 0x2c5   :  { %3060 = vrot.lane.b32.xlu1 %v10276_v16, %s10073_s22 }
 0x2c6   :  { %v442_v56 = vpop.permute.xlu0 %441  ;;  %v10522_v62 = vpop.permute.xlu1 %1088 }
 0x2c7   :  { %v1104_v2 = vsel %vm1102_vm6, %v1087_v52, %v10522_v62  ;;  %v452_v35 = vsel %vm445_vm2, %v440_v58, %v442_v56  ;;  %v453_v37 = vsel %vm445_vm2, %v442_v56, %v10424_v33 }
 0x2c8   :  { %3392 = vrot.lane.b32.xlu0 %v10312_v25, %s10074_s24  ;;  %9692 = vmatmul.mubr.msk.bf16.vlgmr.msra.gmra.mrb[16].mxu0 %vm454_vm4, %v10520_v55  ;;  %v478_v33 = vsel %vm458_vm3, %v452_v35, 0 }
 0x2c9   :  { %893 = vmatpush1.bf16.msra.mxu0 %v799_v4  ;;  %3064 = vrot.lane.b32.xlu1 %v10312_v25, %s10073_s22 }
 0x2ca   :  { %9703 = vmatprep.subr.msk.bf16.mxu0 %vm458_vm3, %v1104_v2  ;;  %v10534_v5 = vpop.permute.xlu0 %1420  ;;  %v10536_v6 = vpop.permute.xlu1 %1096  ;;  %924 = vmatprep.mubr.bf16.mxu0 %v10063_v3 }
 0x2cb   :  { %v1108_v21 = vsel %vm1102_vm6, %v10483_v57, %v10536_v6 }
 0x2cc   :  { %3058 = vrot.lane.b32.xlu0 %v10352_v31, %s10073_s22 }
 0x2cd   :  { %2730 = vrot.lane.b32.xlu1 %v10352_v31, %s10072_s21 }
 0x2ce   :  { %v10545_v8 = vpop.permute.xlu0 %1424  ;;  %v434_v9 = vpop.permute.xlu1 %433 }
 0x2cf   :  { %v448_v11 = vsel %vm445_vm2, %v10459_v47, %v434_v9  ;;  %v449_v14 = vsel %vm445_vm2, %v434_v9, %v10430_v34 }
 0x2d0   :  { %3396 = vrot.lane.b32.xlu0 %v10269_v13, %s10074_s24  ;;  %9696 = vmatmul.mubr.msk.bf16.vlgmr.msra.gmra.mrb[20].mxu0 %vm454_vm4, %v10520_v55  ;;  %v466_v19 = vsel %vm458_vm3, %v448_v11, 0 }
 0x2d1   :  { %1139 = vmatpush1.bf16.msra.mxu0 %v1115_v15  ;;  %3068 = vrot.lane.b32.xlu1 %v10269_v13, %s10073_s22 }
 0x2d2   :  { %9683 = vmatprep.subr.msk.bf16.mxu1 %vm458_vm3, %v449_v14  ;;  %9707 = vmatprep.subr.msk.bf16.mxu0 %vm458_vm3, %v1108_v21  ;;  %v10564_v24 = vpop.permute.xlu0 %1428  ;;  %v10566_v34 = vpop.permute.xlu1 %1100 }
 0x2d3   :  { %525 = vmatpush1.bf16.msra.mxu1 %v466_v19  ;;  %1170 = vmatprep.mubr.bf16.mxu0 %v10063_v3 }
 0x2d4   :  { %9687 = vmatprep.subr.msk.bf16.mxu1 %vm458_vm3, %v453_v37  ;;  %3066 = vrot.lane.b32.xlu0 %v10340_v28, %s10073_s22 }
 0x2d5   :  { %2738 = vrot.lane.b32.xlu1 %v10340_v28, %s10072_s21 }
 0x2d6   :  { %9684 = vmatmul.mubr.msk.bf16.vlgmr.msra.gmra.mrb[8].mxu1 %vm454_vm4, %v10472_v50  ;;  %v10588_v45 = vpop.permute.xlu0 %1742  ;;  %v1415_v47 = vpop.permute.xlu1 %1414 }
 0x2d7   :  { %607 = vmatpush1.bf16.msra.mxu1 %v478_v33  ;;  %v1432_v48 = vsel %vm1430_vm7, %v1415_v47, %v10505_v30  ;;  %638 = vmatprep.mubr.bf16.mxu1 %v10063_v3  ;;  %v1431_v54 = vsel %vm1430_vm7, %v10492_v61, %v1415_v47 }
 0x2d8   :  { %3710 = vrot.lane.b32.xlu0 %v10305_v23, %s10075_s29  ;;  %9704 = vmatmul.mubr.msk.bf16.vlgmr.msra.gmra.mrb[24].mxu0 %vm454_vm4, %v10583_v44 }
 0x2d9   :  { %1221 = vmatpush1.bf16.msra.mxu0 %v1127_v49  ;;  %3382 = vrot.lane.b32.xlu1 %v10305_v23, %s10074_s24 }
 0x2da   :  { %9715 = vmatprep.subr.msk.bf16.mxu0 %vm458_vm3, %v1432_v48  ;;  %v10601_v52 = vpop.permute.xlu0 %1750  ;;  %v1423_v53 = vpop.permute.xlu1 %1422  ;;  %1252 = vmatprep.mubr.bf16.mxu0 %v10063_v3 }
 0x2db   :  { %v1435_v63 = vsel %vm1430_vm7, %v10534_v5, %v1423_v53 }
 0x2dc   :  { %3718 = vrot.lane.b32.xlu0 %v10320_v27, %s10075_s29 }
 0x2dd   :  { %3390 = vrot.lane.b32.xlu1 %v10320_v27, %s10074_s24 }
 0x2de   :  { %9688 = vmatmul.mubr.msk.bf16.vlgmr.msra.gmra.mrb[12].mxu1 %vm454_vm4, %v10472_v50  ;;  %v1091_v57 = vpop.permute.xlu0 %1090  ;;  %v763_v58 = vpop.permute.xlu1 %762 }
 0x2df   :  { %v777_v59 = vsel %vm774_vm5, %v10450_v43, %v763_v58  ;;  %v778_v60 = vsel %vm774_vm5, %v763_v58, %v10444_v42  ;;  %883 = vmatprep.mubr.bf16.mxu1 %v10063_v3  ;;  %v1443_v43 = vsel %vm458_vm3, %v1431_v54, 0  ;;  %v1436_v42 = vsel %vm1430_vm7, %v1423_v53, %v10545_v8 }
 0x2e0   :  { %4036 = vrot.lane.b32.xlu0 %v10279_v17, %s10076_s30  ;;  %9708 = vmatmul.mubr.msk.bf16.vlgmr.msra.gmra.mrb[28].mxu0 %vm454_vm4, %v10583_v44  ;;  %v793_v61 = vsel %vm458_vm3, %v777_v59, 0  ;;  %v1106_v2 = vsel %vm1102_vm6, %v1091_v57, %v10442_v40  ;;  %v1105_v7 = vsel %vm1102_vm6, %v10522_v62, %v1091_v57 }
 0x2e1   :  { %3708 = vrot.lane.b32.xlu1 %v10279_v17, %s10075_s29  ;;  %9693 = vmatprep.subr.msk.bf16.mxu1 %vm458_vm3, %v778_v60  ;;  %v1121_v62 = vsel %vm458_vm3, %v1105_v7, 0 }
 0x2e2   :  { %1467 = vmatpush1.bf16.msra.mxu0 %v1443_v43  ;;  %852 = vmatpush1.bf16.msra.mxu1 %v793_v61  ;;  %v10628_v50 = vpop.permute.xlu0 %2068  ;;  %v1741_v26 = vpop.permute.xlu1 %1740  ;;  %v10780_v43 = vld [vmem:[%s13437_s2 + $0xa] sm:$0x3] }
 0x2e3   :  { %9719 = vmatprep.subr.msk.bf16.mxu0 %vm458_vm3, %v1436_v42  ;;  %1498 = vmatprep.mubr.bf16.mxu0 %v10063_v3  ;;  %v1759_v40 = vsel %vm1758_vm8, %v1741_v26, %v10588_v45 }
 0x2e4   :  { %4040 = vrot.lane.b32.xlu0 %v10301_v22, %s10076_s30  ;;  %v1771_v19 = vsel %vm458_vm3, %v1759_v40, 0 }
 0x2e5   :  { %3712 = vrot.lane.b32.xlu1 %v10301_v22, %s10075_s29 }
 0x2e6   :  { %9694 = vmatmul.mubr.msk.bf16.vlgmr.msra.gmra.mrb[16].mxu1 %vm454_vm4, %v10520_v55  ;;  %v1099_v29 = vpop.permute.xlu0 %1098  ;;  %v771_v0 = vpop.permute.xlu1 %770 }
 0x2e7   :  { %v781_v36 = vsel %vm774_vm5, %v10457_v46, %v771_v0  ;;  %v782_v51 = vsel %vm774_vm5, %v771_v0, %v10422_v32  ;;  %965 = vmatprep.mubr.bf16.mxu1 %v10063_v3  ;;  %v1455_v46 = vsel %vm458_vm3, %v1435_v63, 0  ;;  %v1110_v15 = vsel %vm1102_vm6, %v1099_v29, %v10566_v34 }
 0x2e8   :  { %4044 = vrot.lane.b32.xlu0 %v10276_v16, %s10076_s30  ;;  %9697 = vmatprep.subr.msk.bf16.mxu1 %vm458_vm3, %v782_v51  ;;  %v805_v56 = vsel %vm458_vm3, %v781_v36, 0  ;;  %v1109_v34 = vsel %vm1102_vm6, %v10536_v6, %v1099_v29  ;;  %v10817_v51 = vrot.slane %v10281_v18, %v10253_v41 }
 0x2e9   :  { %3716 = vrot.lane.b32.xlu1 %v10276_v16, %s10075_s29  ;;  %9716 = vmatmul.mubr.msk.bf16.vlgmr.msra.gmra.mrb[32].mxu0 %vm454_vm4, %v10643_v1  ;;  %v1133_v6 = vsel %vm458_vm3, %v1109_v34, 0 }
 0x2ea   :  { %1549 = vmatpush1.bf16.msra.mxu0 %v1455_v46  ;;  %934 = vmatpush1.bf16.msra.mxu1 %v805_v56  ;;  %v10659_v32 = vpop.permute.xlu0 %2072  ;;  %v10663_v4 = vpop.permute.xlu1 %1744 }
 0x2eb   :  { %9705 = vmatprep.subr.msk.bf16.mxu1 %vm458_vm3, %v1106_v2  ;;  %v1760_v9 = vsel %vm1758_vm8, %v10588_v45, %v10663_v4  ;;  %1580 = vmatprep.mubr.bf16.mxu0 %v10063_v3  ;;  %v10725_v45 = vld [vmem:[%s13437_s2 + $0x8] sm:$0x3] }
 0x2ec   :  { %3714 = vrot.lane.b32.xlu0 %v10352_v31, %s10075_s29  ;;  %9727 = vmatprep.subr.msk.bf16.mxu0 %vm458_vm3, %v1760_v9 }
 0x2ed   :  { %3386 = vrot.lane.b32.xlu1 %v10352_v31, %s10074_s24 }
 0x2ee   :  { %9698 = vmatmul.mubr.msk.bf16.vlgmr.msra.gmra.mrb[20].mxu1 %vm454_vm4, %v10520_v55  ;;  %v10682_v11 = vpop.permute.xlu0 %2076  ;;  %v10684_v14 = vpop.permute.xlu1 %1748 }
 0x2ef   :  { %1180 = vmatpush1.bf16.msra.mxu1 %v1121_v62  ;;  %1211 = vmatprep.mubr.bf16.mxu1 %v10063_v3  ;;  %v1763_v37 = vsel %vm1758_vm8, %v10684_v14, %v10601_v52  ;;  %v10860_v62 = vld [vmem:[%s13437_s2 + $0xc] sm:$0x3] }
 0x2f0   :  { %9709 = vmatprep.subr.msk.bf16.mxu1 %vm458_vm3, %v1110_v15  ;;  %4048 = vrot.lane.b32.xlu0 %v10312_v25, %s10076_s30  ;;  %v1783_v47 = vsel %vm458_vm3, %v1763_v37, 0 }
 0x2f1   :  { %3720 = vrot.lane.b32.xlu1 %v10312_v25, %s10075_s29  ;;  %9720 = vmatmul.mubr.msk.bf16.vlgmr.msra.gmra.mrb[36].mxu0 %vm454_vm4, %v10643_v1 }
 0x2f2   :  { %1795 = vmatpush1.bf16.msra.mxu0 %v1771_v19  ;;  %v10697_v55 = vpop.permute.xlu0 %2080  ;;  %v10699_v21 = vpop.permute.xlu1 %1752  ;;  %1826 = vmatprep.mubr.bf16.mxu0 %v10063_v3  ;;  %v10874_v19 = vld.sshfl [vmem:[#allocation2 + $0x12] sm:$0x3 pattern:$0x76325410] }
 0x2f3   :  { %v1764_v35 = vsel %vm1758_vm8, %v10601_v52, %v10699_v21 }
 0x2f4   :  { %3722 = vrot.lane.b32.xlu0 %v10340_v28, %s10075_s29  ;;  %9731 = vmatprep.subr.msk.bf16.mxu0 %vm458_vm3, %v1764_v35 }
 0x2f5   :  { %3394 = vrot.lane.b32.xlu1 %v10340_v28, %s10074_s24 }
 0x2f6   :  { %9706 = vmatmul.mubr.msk.bf16.vlgmr.msra.gmra.mrb[24].mxu1 %vm454_vm4, %v10583_v44  ;;  %v10718_v38 = vpop.permute.xlu0 %2084  ;;  %v10720_v33 = vpop.permute.xlu1 %1756 }
 0x2f7   :  { %1262 = vmatpush1.bf16.msra.mxu1 %v1133_v6  ;;  %1293 = vmatprep.mubr.bf16.mxu1 %v10063_v3 }
 0x2f8   :  { %4052 = vrot.lane.b32.xlu0 %v10269_v13, %s10076_s30 }
 0x2f9   :  { %3724 = vrot.lane.b32.xlu1 %v10269_v13, %s10075_s29  ;;  %9728 = vmatmul.mubr.msk.bf16.vlgmr.msra.gmra.mrb[40].mxu0 %vm454_vm4, %v10725_v45 }
 0x2fa   :  { %1877 = vmatpush1.bf16.msra.mxu0 %v1783_v47  ;;  %v10735_v48 = vpop.permute.xlu0 %2398  ;;  %v2071_v49 = vpop.permute.xlu1 %2070  ;;  %1908 = vmatprep.mubr.bf16.mxu0 %v10063_v3 }
 0x2fb   :  { %v2088_v52 = vsel %vm2086_vm9, %v2071_v49, %v10659_v32  ;;  %v2087_v13 = vsel %vm2086_vm9, %v10628_v50, %v2071_v49 }
 0x2fc   :  { %4366 = vrot.lane.b32.xlu0 %v10305_v23, %s10077_s1  ;;  %9739 = vmatprep.subr.msk.bf16.mxu0 %vm458_vm3, %v2088_v52 }
 0x2fd   :  { %4038 = vrot.lane.b32.xlu1 %v10305_v23, %s10076_s30 }
 0x2fe   :  { %9710 = vmatmul.mubr.msk.bf16.vlgmr.msra.gmra.mrb[28].mxu1 %vm454_vm4, %v10583_v44  ;;  %v1747_v53 = vpop.permute.xlu0 %1746  ;;  %v1419_v54 = vpop.permute.xlu1 %1418 }
 0x2ff   :  { %v1433_v57 = vsel %vm1430_vm7, %v10505_v30, %v1419_v54  ;;  %v1434_v58 = vsel %vm1430_vm7, %v1419_v54, %v10534_v5  ;;  %1539 = vmatprep.mubr.bf16.mxu1 %v10063_v3  ;;  %v2099_v30 = vsel %vm458_vm3, %v2087_v13, 0  ;;  %v1762_v26 = vsel %vm1758_vm8, %v1747_v53, %v10684_v14  ;;  %v5263_v14 = vld [vmem:[#allocation2 + $0x2] sm:$0xff] }
 0x300   :  { %4374 = vrot.lane.b32.xlu0 %v10320_v27, %s10077_s1  ;;  %9717 = vmatprep.subr.msk.bf16.mxu1 %vm458_vm3, %v1434_v58  ;;  %v1449_v23 = vsel %vm458_vm3, %v1433_v57, 0  ;;  %v1761_v29 = vsel %vm1758_vm8, %v10663_v4, %v1747_v53  ;;  %v10882_v35 = vrot.slane %v5263_v14, %v10253_v41  ;;  %v5599_v57 = vcombine.high %v5263_v14, %v5263_v14 }
 0x301   :  { %4046 = vrot.lane.b32.xlu1 %v10320_v27, %s10076_s30  ;;  %9732 = vmatmul.mubr.msk.bf16.vlgmr.msra.gmra.mrb[44].mxu0 %vm454_vm4, %v10725_v45 }
 0x302   :  { %2123 = vmatpush1.bf16.msra.mxu0 %v2099_v30  ;;  %1508 = vmatpush1.bf16.msra.mxu1 %v1449_v23  ;;  %v10763_v5 = vpop.permute.xlu0 %2406  ;;  %v2079_v44 = vpop.permute.xlu1 %2078  ;;  %v10927_v23 = vld [vmem:[%s13437_s2 + $0xe] sm:$0x3] }
 0x303   :  { %v2092_v59 = vsel %vm2086_vm9, %v2079_v44, %v10697_v55  ;;  %2154 = vmatprep.mubr.bf16.mxu0 %v10063_v3  ;;  %v2091_v27 = vsel %vm2086_vm9, %v10682_v11, %v2079_v44 }
 0x304   :  { %4984 = vrot.lane.b32.xlu0 %v10264_v10, %s10078_s23  ;;  %9743 = vmatprep.subr.msk.bf16.mxu0 %vm458_vm3, %v2092_v59 }
 0x305   :  { %4364 = vrot.lane.b32.xlu1 %v10279_v17, %s10077_s1 }
 0x306   :  { %9718 = vmatmul.mubr.msk.bf16.vlgmr.msra.gmra.mrb[32].mxu1 %vm454_vm4, %v10643_v1  ;;  %v1755_v60 = vpop.permute.xlu0 %1754  ;;  %v1427_v61 = vpop.permute.xlu1 %1426 }
 0x307   :  { %v1437_v42 = vsel %vm1430_vm7, %v10545_v8, %v1427_v61  ;;  %v1438_v50 = vsel %vm1430_vm7, %v1427_v61, %v10564_v24  ;;  %1621 = vmatprep.mubr.bf16.mxu1 %v10063_v3  ;;  %v2111_v8 = vsel %vm458_vm3, %v2091_v27, 0  ;;  %v1765_v4 = vsel %vm1758_vm8, %v10699_v21, %v1755_v60 }
 0x308   :  { %4988 = vrot.lane.b32.xlu0 %v10267_v12, %s10078_s23  ;;  %9721 = vmatprep.subr.msk.bf16.mxu1 %vm458_vm3, %v1438_v50  ;;  %v1461_v17 = vsel %vm458_vm3, %v1437_v42, 0  ;;  %v1789_v7 = vsel %vm458_vm3, %v1765_v4, 0  ;;  %v10945_v27 = vrot.slane %v5599_v57, %v10253_v41 }
 0x309   :  { %4368 = vrot.lane.b32.xlu1 %v10301_v22, %s10077_s1  ;;  %9740 = vmatmul.mubr.msk.bf16.vlgmr.msra.gmra.mrb[48].mxu0 %vm454_vm4, %v10780_v43  ;;  %v1777_v22 = vsel %vm458_vm3, %v1761_v29, 0 }
 0x30a   :  { %2205 = vmatpush1.bf16.msra.mxu0 %v2111_v8  ;;  %1590 = vmatpush1.bf16.msra.mxu1 %v1461_v17  ;;  %v10796_v24 = vpop.permute.xlu0 %2724  ;;  %v2397_v63 = vpop.permute.xlu1 %2396 }
 0x30b   :  { %9729 = vmatprep.subr.msk.bf16.mxu1 %vm458_vm3, %v1762_v26  ;;  %2236 = vmatprep.mubr.bf16.mxu0 %v10063_v3  ;;  %v2415_v56 = vsel %vm2414_vm10, %v2397_v63, %v10735_v48 }
 0x30c   :  { %4370 = vrot.lane.b32.xlu0 %v10352_v31, %s10077_s1  ;;  %v2427_v18 = vsel %vm458_vm3, %v2415_v56, 0 }
 0x30d   :  { %4042 = vrot.lane.b32.xlu1 %v10352_v31, %s10076_s30  ;;  %v1766_v31 = vsel %vm1758_vm8, %v1755_v60, %v10720_v33  ;;  %v10891_v33 = vcombine.high %v10882_v35, %v10882_v35 }
 0x30e   :  { %9722 = vmatmul.mubr.msk.bf16.vlgmr.msra.gmra.mrb[36].mxu1 %vm454_vm4, %v10643_v1  ;;  %v10811_v0 = vpop.permute.xlu0 %2728  ;;  %v10813_v36 = vpop.permute.xlu1 %2400 }
 0x30f   :  { %1836 = vmatpush1.bf16.msra.mxu1 %v1777_v22  ;;  %v2416_v1 = vsel %vm2414_vm10, %v10735_v48, %v10813_v36  ;;  %1867 = vmatprep.mubr.bf16.mxu1 %v10063_v3  ;;  %v4958_v48 = vcombine.high %v10264_v10, %v10264_v10 }
 0x310   :  { %9733 = vmatprep.subr.msk.bf16.mxu1 %vm458_vm3, %v1766_v31  ;;  %4992 = vrot.lane.b32.xlu0 %v10817_v51, %s10078_s23 }
 0x311   :  { %4372 = vrot.lane.b32.xlu1 %v10276_v16, %s10077_s1  ;;  %9744 = vmatmul.mubr.msk.bf16.vlgmr.msra.gmra.mrb[52].mxu0 %vm454_vm4, %v10780_v43 }
 0x312   :  { %9751 = vmatprep.subr.msk.bf16.mxu0 %vm458_vm3, %v2416_v1  ;;  %v10836_v46 = vpop.permute.xlu0 %2732  ;;  %v10838_v2 = vpop.permute.xlu1 %2404  ;;  %2482 = vmatprep.mubr.bf16.mxu0 %v10063_v3 }
 0x313   :  { %2451 = vmatpush1.bf16.msra.mxu0 %v2427_v18  ;;  %v2419_v16 = vsel %vm2414_vm10, %v10838_v2, %v10763_v5 }
 0x314   :  { %4378 = vrot.lane.b32.xlu0 %v10340_v28, %s10077_s1  ;;  %v2439_v15 = vsel %vm458_vm3, %v2419_v16, 0 }
 0x315   :  { %4050 = vrot.lane.b32.xlu1 %v10340_v28, %s10076_s30 }
 0x316   :  { %9730 = vmatmul.mubr.msk.bf16.vlgmr.msra.gmra.mrb[40].mxu1 %vm454_vm4, %v10725_v45  ;;  %v10853_v9 = vpop.permute.xlu0 %2736  ;;  %v10855_v40 = vpop.permute.xlu1 %2408 }
 0x317   :  { %1918 = vmatpush1.bf16.msra.mxu1 %v1789_v7  ;;  %v2420_v28 = vsel %vm2414_vm10, %v10763_v5, %v10855_v40  ;;  %1949 = vmatprep.mubr.bf16.mxu1 %v10063_v3  ;;  %v11014_v7 = vcombine.high %v10945_v27, %v10945_v27 }
 0x318   :  { %4996 = vrot.lane.b32.xlu0 %v10294_v20, %s10078_s23  ;;  %9755 = vmatprep.subr.msk.bf16.mxu0 %vm458_vm3, %v2420_v28  ;;  %v4959_v28 = vcombine.high %v10267_v12, %v10267_v12 }
 0x319   :  { %4376 = vrot.lane.b32.xlu1 %v10312_v25, %s10077_s1  ;;  %9752 = vmatmul.mubr.msk.bf16.vlgmr.msra.gmra.mrb[56].mxu0 %vm454_vm4, %v10860_v62  ;;  %v9822_v25 = vld.sshfl [vmem:[#allocation2 + $0x10] sm:$0x3 pattern:$0x76325410] }
 0x31a   :  { %2533 = vmatpush1.bf16.msra.mxu0 %v2439_v15  ;;  %v10876_v21 = vpop.permute.xlu0 %2740  ;;  %v10878_v34 = vpop.permute.xlu1 %2412  ;;  %2564 = vmatprep.mubr.bf16.mxu0 %v10063_v3 }
 0x31c   :  { %5000 = vrot.lane.b32.xlu0 %v10874_v19, %s10078_s23 }
 0x31d   :  { %4380 = vrot.lane.b32.xlu1 %v9822_v25, %s10077_s1 }
 0x31e   :  { %9734 = vmatmul.mubr.msk.bf16.vlgmr.msra.gmra.mrb[44].mxu1 %vm454_vm4, %v10725_v45  ;;  %v2403_v37 = vpop.permute.xlu0 %2402  ;;  %v2075_v6 = vpop.permute.xlu1 %2074 }
 0x31f   :  { %v2089_v47 = vsel %vm2086_vm9, %v10659_v32, %v2075_v6  ;;  %v2090_v49 = vsel %vm2086_vm9, %v2075_v6, %v10682_v11  ;;  %2195 = vmatprep.mubr.bf16.mxu1 %v10063_v3  ;;  %v10909_v11 = vcombine.high %v10817_v51, %v10817_v51 }
 0x320   :  { %5314 = vrot.lane.b32.xlu0 %v10891_v33, %s10079_s28  ;;  %9741 = vmatprep.subr.msk.bf16.mxu1 %vm458_vm3, %v2090_v49  ;;  %v2105_v45 = vsel %vm458_vm3, %v2089_v47, 0 }
 0x321   :  { %4986 = vrot.lane.b32.xlu1 %v4958_v48, %s10078_s23  ;;  %9756 = vmatmul.mubr.msk.bf16.vlgmr.msra.gmra.mrb[60].mxu0 %vm454_vm4, %v10860_v62 }
 0x322   :  { %2164 = vmatpush1.bf16.msra.mxu1 %v2105_v45  ;;  %v3055_v10 = vpop.permute.xlu0 %3054  ;;  %v2727_v32 = vpop.permute.xlu1 %2726  ;;  %2810 = vmatprep.mubr.bf16.mxu0 %v10063_v3 }
 0x323   :  { %v2743_v52 = vsel %vm2742_vm11, %v10796_v24, %v2727_v32  ;;  %v2744_v13 = vsel %vm2742_vm11, %v2727_v32, %v10811_v0 }
 0x324   :  { %5322 = vrot.lane.b32.xlu0 %v10909_v11, %s10079_s28  ;;  %9763 = vmatprep.subr.msk.bf16.mxu0 %vm458_vm3, %v2744_v13  ;;  %v2755_v53 = vsel %vm458_vm3, %v2743_v52, 0 }
 0x325   :  { %4994 = vrot.lane.b32.xlu1 %v10909_v11, %s10078_s23  ;;  %2779 = vmatpush1.bf16.msra.mxu0 %v2755_v53 }
 0x326   :  { %9742 = vmatmul.mubr.msk.bf16.vlgmr.msra.gmra.mrb[48].mxu1 %vm454_vm4, %v10780_v43  ;;  %v2411_v54 = vpop.permute.xlu0 %2410 }
 0x327   :  { %v2083_v58 = vpop.permute.xlu1 %2082  ;;  %2277 = vmatprep.mubr.bf16.mxu1 %v10063_v3  ;;  %v2422_v24 = vsel %vm2414_vm10, %v2411_v54, %v10878_v34  ;;  %v2421_v29 = vsel %vm2414_vm10, %v10855_v40, %v2411_v54 }
 0x328   :  { %v2093_v30 = vsel %vm2086_vm9, %v10697_v55, %v2083_v58  ;;  %5640 = vrot.lane.b32.xlu0 %v10882_v35, %s10080_s12  ;;  %v2094_v5 = vsel %vm2086_vm9, %v2083_v58, %v10718_v38  ;;  %v2418_v55 = vsel %vm2414_vm10, %v2403_v37, %v10838_v2  ;;  %v2417_v38 = vsel %vm2414_vm10, %v10813_v36, %v2403_v37  ;;  %v11000_v2 = vld [vmem:[%s13437_s2 + $0x10] sm:$0x3] }
 0x329   :  { %5312 = vrot.lane.b32.xlu1 %v10882_v35, %s10079_s28  ;;  %9745 = vmatprep.subr.msk.bf16.mxu1 %vm458_vm3, %v2094_v5  ;;  %v2117_v44 = vsel %vm458_vm3, %v2093_v30, 0  ;;  %v2433_v17 = vsel %vm458_vm3, %v2417_v38, 0  ;;  %v2445_v31 = vsel %vm458_vm3, %v2421_v29, 0  ;;  %v11087_v30 = vld [vmem:[%s13437_s2 + $0x12] sm:$0x3] }
 0x32a   :  { %9764 = vmatmul.mubr.msk.bf16.vlgmr.msra.gmra.mrb[64].mxu0 %vm454_vm4, %v10927_v23  ;;  %2246 = vmatpush1.bf16.msra.mxu1 %v2117_v44  ;;  %v3063_v59 = vpop.permute.xlu0 %3062 }
 0x32b   :  { %9753 = vmatprep.subr.msk.bf16.mxu1 %vm458_vm3, %v2418_v55  ;;  %v2735_v60 = vpop.permute.xlu1 %2734  ;;  %2892 = vmatprep.mubr.bf16.mxu0 %v10063_v3 }
 0x32c   :  { %v2747_v61 = vsel %vm2742_vm11, %v10836_v46, %v2735_v60  ;;  %5644 = vrot.lane.b32.xlu0 %v10945_v27, %s10080_s12  ;;  %v2748_v42 = vsel %vm2742_vm11, %v2735_v60, %v10853_v9 }
 0x32d   :  { %5316 = vrot.lane.b32.xlu1 %v10945_v27, %s10079_s28  ;;  %9767 = vmatprep.subr.msk.bf16.mxu0 %vm458_vm3, %v2748_v42  ;;  %v2767_v50 = vsel %vm458_vm3, %v2747_v61, 0 }
 0x32e   :  { %9746 = vmatmul.mubr.msk.bf16.vlgmr.msra.gmra.mrb[52].mxu1 %vm454_vm4, %v10780_v43  ;;  %2861 = vmatpush1.bf16.msra.mxu0 %v2767_v50  ;;  %v10964_v8 = vpop.permute.xlu0 %3380 }
 0x32f   :  { %2492 = vmatpush1.bf16.msra.mxu1 %v2433_v17  ;;  %v3053_v26 = vpop.permute.xlu1 %3052  ;;  %2523 = vmatprep.mubr.bf16.mxu1 %v10063_v3 }
 0x330   :  { %9757 = vmatprep.subr.msk.bf16.mxu1 %vm458_vm3, %v2422_v24  ;;  %5648 = vrot.lane.b32.xlu0 %v10817_v51, %s10080_s12  ;;  %v3071_v43 = vsel %vm3070_vm12, %v3053_v26, %v3055_v10 }
 0x331   :  { %5320 = vrot.lane.b32.xlu1 %v10817_v51, %s10079_s28  ;;  %v3083_v56 = vsel %vm458_vm3, %v3071_v43, 0 }
 0x332   :  { %9768 = vmatmul.mubr.msk.bf16.vlgmr.msra.gmra.mrb[68].mxu0 %vm454_vm4, %v10927_v23  ;;  %v10977_v63 = vpop.permute.xlu0 %3384 }
 0x333   :  { %v10981_v22 = vpop.permute.xlu1 %3056  ;;  %3138 = vmatprep.mubr.bf16.mxu0 %v10063_v3 }
 0x334   :  { %5652 = vrot.lane.b32.xlu0 %v10294_v20, %s10080_s12  ;;  %v3072_v36 = vsel %vm3070_vm12, %v3055_v10, %v10981_v22 }
 0x335   :  { %5324 = vrot.lane.b32.xlu1 %v10294_v20, %s10079_s28  ;;  %9775 = vmatprep.subr.msk.bf16.mxu0 %vm458_vm3, %v3072_v36 }
 0x336   :  { %9754 = vmatmul.mubr.msk.bf16.vlgmr.msra.gmra.mrb[56].mxu1 %vm454_vm4, %v10860_v62  ;;  %3107 = vmatpush1.bf16.msra.mxu0 %v3083_v56  ;;  %v10995_v1 = vpop.permute.xlu0 %3388  ;;  %v11141_v56 = vld [vmem:[%s13437_s2 + $0x14] sm:$0x3] }
 0x337   :  { %2574 = vmatpush1.bf16.msra.mxu1 %v2445_v31  ;;  %v3061_v18 = vpop.permute.xlu1 %3060  ;;  %2605 = vmatprep.mubr.bf16.mxu1 %v10063_v3 }
 0x338   :  { %5656 = vrot.lane.b32.xlu0 %v10874_v19, %s10080_s12  ;;  %v3075_v4 = vsel %vm3070_vm12, %v3061_v18, %v3063_v59 }
 0x339   :  { %5328 = vrot.lane.b32.xlu1 %v10874_v19, %s10079_s28  ;;  %v3095_v15 = vsel %vm458_vm3, %v3075_v4, 0 }
 0x33a   :  { %9776 = vmatmul.mubr.msk.bf16.vlgmr.msra.gmra.mrb[72].mxu0 %vm454_vm4, %v11000_v2  ;;  %v11010_v16 = vpop.permute.xlu0 %3392 }
 0x33b   :  { %v11016_v40 = vpop.permute.xlu1 %3064  ;;  %3220 = vmatprep.mubr.bf16.mxu0 %v10063_v3 }
 0x33c   :  { %5318 = vrot.lane.b32.xlu0 %v11014_v7, %s10079_s28  ;;  %v3076_v14 = vsel %vm3070_vm12, %v3063_v59, %v11016_v40 }
 0x33d   :  { %4990 = vrot.lane.b32.xlu1 %v4959_v28, %s10078_s23  ;;  %9779 = vmatprep.subr.msk.bf16.mxu0 %vm458_vm3, %v3076_v14 }
 0x33e   :  { %9758 = vmatmul.mubr.msk.bf16.vlgmr.msra.gmra.mrb[60].mxu1 %vm454_vm4, %v10860_v62  ;;  %3189 = vmatpush1.bf16.msra.mxu0 %v3095_v15  ;;  %v3059_v34 = vpop.permute.xlu0 %3058 }
 0x33f   :  { %v2731_v12 = vpop.permute.xlu1 %2730  ;;  %2851 = vmatprep.mubr.bf16.mxu1 %v10063_v3  ;;  %v3074_v52 = vsel %vm3070_vm12, %v3059_v34, %v3061_v18 }
 0x340   :  { %v2745_v25 = vsel %vm2742_vm11, %v10811_v0, %v2731_v12  ;;  %5970 = vrot.lane.b32.xlu0 %v10891_v33, %s10081_s15  ;;  %v2746_v37 = vsel %vm2742_vm11, %v2731_v12, %v10836_v46  ;;  %v11047_v0 = vcombine.high %v10294_v20, %v10294_v20 }
 0x341   :  { %5642 = vrot.lane.b32.xlu1 %v10891_v33, %s10080_s12  ;;  %9765 = vmatprep.subr.msk.bf16.mxu1 %vm458_vm3, %v2746_v37  ;;  %v2761_v62 = vsel %vm458_vm3, %v2745_v25, 0 }
 0x342   :  { %9780 = vmatmul.mubr.msk.bf16.vlgmr.msra.gmra.mrb[76].mxu0 %vm454_vm4, %v11000_v2  ;;  %2820 = vmatpush1.bf16.msra.mxu1 %v2761_v62  ;;  %v11043_v6 = vpop.permute.xlu0 %3396 }
 0x343   :  { %v3069_v47 = vpop.permute.xlu1 %3068  ;;  %3466 = vmatprep.mubr.bf16.mxu0 %v10063_v3 }
 0x344   :  { %5326 = vrot.lane.b32.xlu0 %v11047_v0, %s10079_s28 }
 0x345   :  { %4998 = vrot.lane.b32.xlu1 %v11047_v0, %s10078_s23 }
 0x346   :  { %9766 = vmatmul.mubr.msk.bf16.vlgmr.msra.gmra.mrb[64].mxu1 %vm454_vm4, %v10927_v23  ;;  %v3067_v46 = vpop.permute.xlu0 %3066 }
 0x347   :  { %v2739_v48 = vpop.permute.xlu1 %2738  ;;  %2933 = vmatprep.mubr.bf16.mxu1 %v10063_v3  ;;  %v3078_v5 = vsel %vm3070_vm12, %v3067_v46, %v3069_v47  ;;  %v3077_v60 = vsel %vm3070_vm12, %v11016_v40, %v3067_v46 }
 0x348   :  { %v2749_v49 = vsel %vm2742_vm11, %v10853_v9, %v2739_v48  ;;  %5978 = vrot.lane.b32.xlu0 %v10909_v11, %s10081_s15  ;;  %v2750_v45 = vsel %vm2742_vm11, %v2739_v48, %v10876_v21  ;;  %v3073_v9 = vsel %vm3070_vm12, %v10981_v22, %v3059_v34  ;;  %v3101_v42 = vsel %vm458_vm3, %v3077_v60, 0 }
 0x349   :  { %5650 = vrot.lane.b32.xlu1 %v10909_v11, %s10080_s12  ;;  %9769 = vmatprep.subr.msk.bf16.mxu1 %vm458_vm3, %v2750_v45  ;;  %v2773_v10 = vsel %vm458_vm3, %v2749_v49, 0  ;;  %v3089_v57 = vsel %vm458_vm3, %v3073_v9, 0  ;;  %v11213_v9 = vld [vmem:[%s13437_s2 + $0x16] sm:$0x3] }
 0x34a   :  { %2902 = vmatpush1.bf16.msra.mxu1 %v2773_v10  ;;  %v3711_v32 = vpop.permute.xlu0 %3710 }
 0x34b   :  { %9777 = vmatprep.subr.msk.bf16.mxu1 %vm458_vm3, %v3074_v52  ;;  %v3383_v13 = vpop.permute.xlu1 %3382 }
 0x34c   :  { %v3399_v21 = vsel %vm3398_vm13, %v10964_v8, %v3383_v13  ;;  %6296 = vrot.lane.b32.xlu0 %v10882_v35, %s10066_s6  ;;  %v3400_v53 = vsel %vm3398_vm13, %v3383_v13, %v10977_v63 }
 0x34d   :  { %5968 = vrot.lane.b32.xlu1 %v10882_v35, %s10081_s15  ;;  %9787 = vmatprep.subr.msk.bf16.mxu0 %vm458_vm3, %v3400_v53  ;;  %v3411_v54 = vsel %vm458_vm3, %v3399_v21, 0 }
 0x34e   :  { %9770 = vmatmul.mubr.msk.bf16.vlgmr.msra.gmra.mrb[68].mxu1 %vm454_vm4, %v10927_v23  ;;  %3435 = vmatpush1.bf16.msra.mxu0 %v3411_v54  ;;  %v3719_v58 = vpop.permute.xlu0 %3718 }
 0x34f   :  { %3148 = vmatpush1.bf16.msra.mxu1 %v3089_v57  ;;  %v3391_v44 = vpop.permute.xlu1 %3390  ;;  %3179 = vmatprep.mubr.bf16.mxu1 %v10063_v3 }
 0x350   :  { %9781 = vmatprep.subr.msk.bf16.mxu1 %vm458_vm3, %v3078_v5  ;;  %v3403_v23 = vsel %vm3398_vm13, %v10995_v1, %v3391_v44  ;;  %6300 = vrot.lane.b32.xlu0 %v10945_v27, %s10066_s6  ;;  %v3404_v59 = vsel %vm3398_vm13, %v3391_v44, %v11010_v16 }
 0x351   :  { %5972 = vrot.lane.b32.xlu1 %v10945_v27, %s10081_s15  ;;  %9788 = vmatmul.mubr.msk.bf16.vlgmr.msra.gmra.mrb[80].mxu0 %vm454_vm4, %v11087_v30  ;;  %v3423_v55 = vsel %vm458_vm3, %v3403_v23, 0 }
 0x352   :  { %9791 = vmatprep.subr.msk.bf16.mxu0 %vm458_vm3, %v3404_v59  ;;  %v11104_v38 = vpop.permute.xlu0 %4036  ;;  %3548 = vmatprep.mubr.bf16.mxu0 %v10063_v3 }
 0x353   :  { %3517 = vmatpush1.bf16.msra.mxu0 %v3423_v55  ;;  %v3709_v61 = vpop.permute.xlu1 %3708 }
 0x354   :  { %6304 = vrot.lane.b32.xlu0 %v10817_v51, %s10066_s6  ;;  %v3727_v17 = vsel %vm3726_vm14, %v3709_v61, %v3711_v32 }
 0x355   :  { %5976 = vrot.lane.b32.xlu1 %v10817_v51, %s10081_s15  ;;  %v3739_v26 = vsel %vm458_vm3, %v3727_v17, 0 }
 0x356   :  { %9778 = vmatmul.mubr.msk.bf16.vlgmr.msra.gmra.mrb[72].mxu1 %vm454_vm4, %v11000_v2  ;;  %v11116_v50 = vpop.permute.xlu0 %4040 }
 0x357   :  { %3230 = vmatpush1.bf16.msra.mxu1 %v3101_v42  ;;  %v3713_v8 = vpop.permute.xlu1 %3712  ;;  %3261 = vmatprep.mubr.bf16.mxu1 %v10063_v3 }
 0x358   :  { %6308 = vrot.lane.b32.xlu0 %v10294_v20, %s10066_s6  ;;  %v3728_v24 = vsel %vm3726_vm14, %v3711_v32, %v3713_v8 }
 0x359   :  { %5980 = vrot.lane.b32.xlu1 %v10294_v20, %s10081_s15  ;;  %9792 = vmatmul.mubr.msk.bf16.vlgmr.msra.gmra.mrb[84].mxu0 %vm454_vm4, %v11087_v30 }
 0x35a   :  { %9799 = vmatprep.subr.msk.bf16.mxu0 %vm458_vm3, %v3728_v24  ;;  %v11129_v43 = vpop.permute.xlu0 %4044  ;;  %3794 = vmatprep.mubr.bf16.mxu0 %v10063_v3 }
 0x35b   :  { %3763 = vmatpush1.bf16.msra.mxu0 %v3739_v26  ;;  %v3717_v29 = vpop.permute.xlu1 %3716 }
 0x35c   :  { %5974 = vrot.lane.b32.xlu0 %v11014_v7, %s10081_s15  ;;  %v3731_v4 = vsel %vm3726_vm14, %v3717_v29, %v3719_v58 }
 0x35d   :  { %5646 = vrot.lane.b32.xlu1 %v11014_v7, %s10080_s12  ;;  %v3751_v28 = vsel %vm458_vm3, %v3731_v4, 0 }
 0x35e   :  { %9782 = vmatmul.mubr.msk.bf16.vlgmr.msra.gmra.mrb[76].mxu1 %vm454_vm4, %v11000_v2  ;;  %v3715_v22 = vpop.permute.xlu0 %3714 }
 0x35f   :  { %v3387_v36 = vpop.permute.xlu1 %3386  ;;  %3507 = vmatprep.mubr.bf16.mxu1 %v10063_v3  ;;  %v3729_v62 = vsel %vm3726_vm14, %v3713_v8, %v3715_v22 }
 0x360   :  { %v3401_v31 = vsel %vm3398_vm13, %v10977_v63, %v3387_v36  ;;  %6312 = vrot.lane.b32.xlu0 %v10874_v19, %s10066_s6  ;;  %v3402_v18 = vsel %vm3398_vm13, %v3387_v36, %v10995_v1  ;;  %v3745_v47 = vsel %vm458_vm3, %v3729_v62, 0 }
 0x361   :  { %5984 = vrot.lane.b32.xlu1 %v10874_v19, %s10081_s15  ;;  %9789 = vmatprep.subr.msk.bf16.mxu1 %vm458_vm3, %v3402_v18  ;;  %v3417_v2 = vsel %vm458_vm3, %v3401_v31, 0 }
 0x362   :  { %9800 = vmatmul.mubr.msk.bf16.vlgmr.msra.gmra.mrb[88].mxu0 %vm454_vm4, %v11141_v56  ;;  %3476 = vmatpush1.bf16.msra.mxu1 %v3417_v2  ;;  %v11157_v63 = vpop.permute.xlu0 %4048 }
 0x363   :  { %v3721_v40 = vpop.permute.xlu1 %3720  ;;  %3876 = vmatprep.mubr.bf16.mxu0 %v10063_v3 }
 0x364   :  { %5982 = vrot.lane.b32.xlu0 %v11047_v0, %s10081_s15  ;;  %v3732_v1 = vsel %vm3726_vm14, %v3719_v58, %v3721_v40 }
 0x365   :  { %5654 = vrot.lane.b32.xlu1 %v11047_v0, %s10080_s12  ;;  %9803 = vmatprep.subr.msk.bf16.mxu0 %vm458_vm3, %v3732_v1 }
 0x366   :  { %9790 = vmatmul.mubr.msk.bf16.vlgmr.msra.gmra.mrb[80].mxu1 %vm454_vm4, %v11087_v30  ;;  %3845 = vmatpush1.bf16.msra.mxu0 %v3751_v28  ;;  %v3723_v14 = vpop.permute.xlu0 %3722 }
 0x367   :  { %v3395_v15 = vpop.permute.xlu1 %3394  ;;  %3589 = vmatprep.mubr.bf16.mxu1 %v10063_v3  ;;  %v3733_v13 = vsel %vm3726_vm14, %v3721_v40, %v3723_v14 }
 0x368   :  { %v3405_v34 = vsel %vm3398_vm13, %v11010_v16, %v3395_v15  ;;  %6625 = vrot.lane.b32.xlu0 %v10891_v33, %s10065_s5  ;;  %v3406_v12 = vsel %vm3398_vm13, %v3395_v15, %v11043_v6  ;;  %v3730_v16 = vsel %vm3726_vm14, %v3715_v22, %v3717_v29  ;;  %v3757_v58 = vsel %vm458_vm3, %v3733_v13, 0 }
 0x369   :  { %6298 = vrot.lane.b32.xlu1 %v10891_v33, %s10066_s6  ;;  %9793 = vmatprep.subr.msk.bf16.mxu1 %vm458_vm3, %v3406_v12  ;;  %v3429_v25 = vsel %vm458_vm3, %v3405_v34, 0  ;;  %vm5002_vm13 = vcmask 1039360  }
 0x36a   :  { %9804 = vmatmul.mubr.msk.bf16.vlgmr.msra.gmra.mrb[92].mxu0 %vm454_vm4, %v11141_v56  ;;  %3558 = vmatpush1.bf16.msra.mxu1 %v3429_v25  ;;  %v11182_v37 = vpop.permute.xlu0 %4052 }
 0x36b   :  { %9801 = vmatprep.subr.msk.bf16.mxu1 %vm458_vm3, %v3730_v16  ;;  %v3725_v6 = vpop.permute.xlu1 %3724  ;;  %4122 = vmatprep.mubr.bf16.mxu0 %v10063_v3  ;;  %v648_v16 = vld [vmem:[%s13438_s4] ss:$8 sm:$0xf0] }
 0x36c   :  { %6633 = vrot.lane.b32.xlu0 %v10909_v11, %s10065_s5  ;;  %v3734_v48 = vsel %vm3726_vm14, %v3723_v14, %v3725_v6  ;;  %v4687_v6 = vsel %vm458_vm3, %v10882_v35, 0  ;;  %vm5330_vm14 = vcmask 990208  }
 0x36d   :  { %6306 = vrot.lane.b32.xlu1 %v10909_v11, %s10066_s6 }
 0x36e   :  { %9794 = vmatmul.mubr.msk.bf16.vlgmr.msra.gmra.mrb[84].mxu1 %vm454_vm4, %v11087_v30  ;;  %v4367_v46 = vpop.permute.xlu0 %4366 }
 0x36f   :  { %3804 = vmatpush1.bf16.msra.mxu1 %v3745_v47  ;;  %v4039_v49 = vpop.permute.xlu1 %4038  ;;  %3835 = vmatprep.mubr.bf16.mxu1 %v10063_v3  ;;  %v9699_v47 = vld [vmem:[%s13438_s4 + $0x1] ss:$8 sm:$0xf] }
 0x370   :  { %9805 = vmatprep.subr.msk.bf16.mxu1 %vm458_vm3, %v3734_v48  ;;  %v4055_v45 = vsel %vm4054_vm15, %v11104_v38, %v4039_v49  ;;  %6950 = vrot.lane.b32.xlu0 %v10882_v35, %s10067_s16  ;;  %v4056_v10 = vsel %vm4054_vm15, %v4039_v49, %v11116_v50 }
 0x371   :  { %6623 = vrot.lane.b32.xlu1 %v10882_v35, %s10065_s5  ;;  %9811 = vmatprep.subr.msk.bf16.mxu0 %vm458_vm3, %v4056_v10  ;;  %v4067_v32 = vsel %vm458_vm3, %v4055_v45, 0  ;;  %v11346_v45 = vsub.s32 0, %v10250_v39 }
 0x372   :  { %4091 = vmatpush1.bf16.msra.mxu0 %v4067_v32  ;;  %v11208_v52 = vpop.permute.xlu0 %4374 }
 0x373   :  { %v4047_v21 = vpop.permute.xlu1 %4046 }
 0x374   :  { %v4059_v53 = vsel %vm4054_vm15, %v11129_v43, %v4047_v21  ;;  %6954 = vrot.lane.b32.xlu0 %v10945_v27, %s10067_s16  ;;  %v4060_v54 = vsel %vm4054_vm15, %v4047_v21, %v11157_v63 }
 0x375   :  { %6627 = vrot.lane.b32.xlu1 %v10945_v27, %s10065_s5  ;;  %9812 = vmatmul.mubr.msk.bf16.vlgmr.msra.gmra.mrb[96].mxu0 %vm454_vm4, %v11213_v9  ;;  %v4079_v57 = vsel %vm458_vm3, %v4059_v53, 0 }
 0x376   :  { %9802 = vmatmul.mubr.msk.bf16.vlgmr.msra.gmra.mrb[88].mxu1 %vm454_vm4, %v11141_v56  ;;  %9815 = vmatprep.subr.msk.bf16.mxu0 %vm458_vm3, %v4060_v54  ;;  %v11231_v30 = vpop.permute.xlu0 %4984 }
 0x377   :  { %3886 = vmatpush1.bf16.msra.mxu1 %v3757_v58  ;;  %4173 = vmatpush1.bf16.msra.mxu0 %v4079_v57  ;;  %v4365_v5 = vpop.permute.xlu1 %4364  ;;  %v11373_v57 = vld [vmem:[%s13437_s2 + $0x1a] sm:$0x3] }
 0x378   :  { %6958 = vrot.lane.b32.xlu0 %v10817_v51, %s10067_s16  ;;  %3917 = vmatprep.mubr.bf16.mxu1 %v10063_v3  ;;  %v4383_v23 = vsel %vm4382_vm0, %v4365_v5, %v4367_v46 }
 0x379   :  { %6631 = vrot.lane.b32.xlu1 %v10817_v51, %s10065_s5  ;;  %4204 = vmatprep.mubr.bf16.mxu0 %v10063_v3  ;;  %v4395_v38 = vsel %vm458_vm3, %v4383_v23, 0 }
 0x37a   :  { %v11239_v44 = vpop.permute.xlu0 %4988 }
 0x37b   :  { %v4369_v59 = vpop.permute.xlu1 %4368 }
 0x37c   :  { %6629 = vrot.lane.b32.xlu0 %v11014_v7, %s10065_s5  ;;  %v4384_v55 = vsel %vm4382_vm0, %v4367_v46, %v4369_v59  ;;  %v9700_v46 = vld [vmem:[%s13438_s4 + $0x1] ss:$8 sm:$0xf0] }
 0x37d   :  { %6302 = vrot.lane.b32.xlu1 %v11014_v7, %s10066_s6  ;;  %9816 = vmatmul.mubr.msk.bf16.vlgmr.msra.gmra.mrb[100].mxu0 %vm454_vm4, %v11213_v9  ;;  %v11361_v21 = vor.u32 %v9700_v46, %v9699_v47  ;;  %v9712_v47 = vld [vmem:[%s13438_s4 + $0x2] ss:$8 sm:$0xf0] }
 0x37e   :  { %9806 = vmatmul.mubr.msk.bf16.vlgmr.msra.gmra.mrb[92].mxu1 %vm454_vm4, %v11141_v56  ;;  %9823 = vmatprep.subr.msk.bf16.mxu0 %vm458_vm3, %v4384_v55  ;;  %v4371_v60 = vpop.permute.xlu0 %4370  ;;  %v4699_v55 = vsel %vm458_vm3, %v10817_v51, 0 }
 0x37f   :  { %4419 = vmatpush1.bf16.msra.mxu0 %v4395_v38  ;;  %v4043_v61 = vpop.permute.xlu1 %4042  ;;  %4163 = vmatprep.mubr.bf16.mxu1 %v10063_v3  ;;  %v4385_v4 = vsel %vm4382_vm0, %v4369_v59, %v4371_v60  ;;  %v982_v59 = vrot.slane %v11361_v21, %v11346_v45 }
 0x380   :  { %v4057_v42 = vsel %vm4054_vm15, %v11116_v50, %v4043_v61  ;;  %6962 = vrot.lane.b32.xlu0 %v10294_v20, %s10067_s16  ;;  %v4058_v17 = vsel %vm4054_vm15, %v4043_v61, %v11129_v43  ;;  %4450 = vmatprep.mubr.bf16.mxu0 %v10063_v3  ;;  %v11270_v50 = vld [vmem:[%s13437_s2 + $0x18] sm:$0x3]  ;;  %v4401_v15 = vsel %vm458_vm3, %v4385_v4, 0 }
 0x381   :  { %6635 = vrot.lane.b32.xlu1 %v10294_v20, %s10065_s5  ;;  %9813 = vmatprep.subr.msk.bf16.mxu1 %vm458_vm3, %v4058_v17  ;;  %v4073_v8 = vsel %vm458_vm3, %v4057_v42, 0  ;;  %v11402_v17 = vsub.s32 4, %v10250_v39 }
 0x382   :  { %4132 = vmatpush1.bf16.msra.mxu1 %v4073_v8  ;;  %v11265_v24 = vpop.permute.xlu0 %4992  ;;  %v7556_v8 = vld [vmem:[#allocation2 + $0xa] sm:$0xff] }
 0x383   :  { %v4373_v26 = vpop.permute.xlu1 %4372 }
 0x384   :  { %6637 = vrot.lane.b32.xlu0 %v11047_v0, %s10065_s5  ;;  %v4387_v31 = vsel %vm4382_vm0, %v4373_v26, %v11208_v52  ;;  %v4386_v2 = vsel %vm4382_vm0, %v4371_v60, %v4373_v26 }
 0x385   :  { %6310 = vrot.lane.b32.xlu1 %v11047_v0, %s10066_s6  ;;  %9824 = vmatmul.mubr.msk.bf16.vlgmr.msra.gmra.mrb[104].mxu0 %vm454_vm4, %v11270_v50  ;;  %v4407_v28 = vsel %vm458_vm3, %v4387_v31, 0  ;;  %v11417_v31 = vrot.slane %v7556_v8, %v10253_v41 }
 0x386   :  { %9814 = vmatmul.mubr.msk.bf16.vlgmr.msra.gmra.mrb[96].mxu1 %vm454_vm4, %v11213_v9  ;;  %v4379_v43 = vpop.permute.xlu0 %4378  ;;  %4532 = vmatprep.mubr.bf16.mxu0 %v10063_v3 }
 0x387   :  { %v4051_v29 = vpop.permute.xlu1 %4050  ;;  %4245 = vmatprep.mubr.bf16.mxu1 %v10063_v3 }
 0x388   :  { %v4061_v22 = vsel %vm4054_vm15, %v11157_v63, %v4051_v29  ;;  %6966 = vrot.lane.b32.xlu0 %v10874_v19, %s10067_s16  ;;  %v4062_v36 = vsel %vm4054_vm15, %v4051_v29, %v11182_v37  ;;  %v647_v37 = vld [vmem:[%s13438_s4] ss:$8 sm:$0xf]  ;;  %v11410_v29 = vsub.s32 5, %v10250_v39  ;;  %vm5658_vm15 = vcmask 982016  }
 0x389   :  { %6639 = vrot.lane.b32.xlu1 %v10874_v19, %s10065_s5  ;;  %9817 = vmatprep.subr.msk.bf16.mxu1 %vm458_vm3, %v4062_v36  ;;  %v4085_v56 = vsel %vm458_vm3, %v4061_v22, 0  ;;  %v11343_v49 = vor.u32 %v648_v16, %v647_v37 }
 0x38a   :  { %4214 = vmatpush1.bf16.msra.mxu1 %v4085_v56  ;;  %v11294_v18 = vpop.permute.xlu0 %4996  ;;  %v1002_v37 = vrot.slane %v11361_v21, %v11410_v29 }
 0x38b   :  { %9825 = vmatprep.subr.msk.bf16.mxu1 %vm458_vm3, %v4386_v2  ;;  %v4377_v63 = vpop.permute.xlu1 %4376  ;;  %v11299_v40 = vpop.f32.mrb[8].mxu0  ;;  %v654_v58 = vrot.slane %v11343_v49, %v11346_v45 }
 0x38c   :  { %7279 = vrot.lane.b32.xlu0 %v10891_v33, %s10068_s17  ;;  %v4388_v19 = vsel %vm4382_vm0, %v11208_v52, %v4377_v63  ;;  %v11305_v1 = vpop.f32.mrb[9].mxu0  ;;  %v4389_v10 = vsel %vm4382_vm0, %v4377_v63, %v4379_v43  ;;  %v11353_v52 = vsub.s32 1, %v10250_v39 }
 0x38d   :  { %6952 = vrot.lane.b32.xlu1 %v10891_v33, %s10067_s16  ;;  %9827 = vmatprep.subr.msk.bf16.mxu0 %vm458_vm3, %v4388_v19  ;;  %v521_v14 = vpop.f32.mrb[10].mxu0  ;;  %v691_v42 = vmul.f32 %v654_v58, %v11299_v40  ;;  %v4693_v40 = vsel %vm458_vm3, %v10945_v27, 0 }
 0x38e   :  { %9818 = vmatmul.mubr.msk.bf16.vlgmr.msra.gmra.mrb[100].mxu1 %vm454_vm4, %v11213_v9  ;;  %4501 = vmatpush1.bf16.msra.mxu0 %v4407_v28  ;;  %v11314_v34 = vpop.permute.xlu0 %5000  ;;  %v522_v12 = vpop.f32.mrb[11].mxu0  ;;  %v658_v23 = vrot.slane %v11343_v49, %v11353_v52  ;;  %v986_v38 = vrot.slane %v11361_v21, %v11353_v52 }
 0x38f   :  { %4460 = vmatpush1.bf16.msra.mxu1 %v4401_v15  ;;  %9834 = vmatprep.subr.msk.bf16.mxu0 %vm458_vm3, %v10891_v33  ;;  %v4381_v25 = vpop.permute.xlu1 %4380 }
 0x390   :  { %v4390_v62 = vsel %vm4382_vm0, %v4379_v43, %v4381_v25  ;;  %7287 = vrot.lane.b32.xlu0 %v10909_v11, %s10068_s17  ;;  %4491 = vmatprep.mubr.bf16.mxu1 %v10063_v3  ;;  %v692_v43 = vmul.f32 %v658_v23, %v11305_v1  ;;  %v670_v1 = vrot.slane %v11343_v49, %v11402_v17  ;;  %v4705_v23 = vsel %vm458_vm3, %v10294_v20, 0 }
 0x391   :  { %6960 = vrot.lane.b32.xlu1 %v10909_v11, %s10067_s16  ;;  %9828 = vmatmul.mubr.msk.bf16.vlgmr.msra.gmra.mrb[108].mxu0 %vm454_vm4, %v11270_v50  ;;  %v7580_v25 = vcombine.high %v7556_v8, %v7556_v8  ;;  %v7882_v8 = vld [vmem:[#allocation2 + $0x2] sm:$0xff]  ;;  %vm5986_vm0 = vcmask 973824  }
 0x392   :  { %9829 = vmatprep.subr.msk.bf16.mxu1 %vm458_vm3, %v4390_v62  ;;  %4711 = vmatpush1.bf16.msra.mxu0 %v4687_v6  ;;  %v11341_v48 = vpop.permute.xlu0 %5314 }
 0x393   :  { %9838 = vmatprep.subr.msk.bf16.mxu0 %vm458_vm3, %v10909_v11  ;;  %v4987_v32 = vpop.permute.xlu1 %4986  ;;  %4742 = vmatprep.mubr.bf16.mxu0 %v10063_v3  ;;  %v11355_v9 = vpop.f32.mrb[12].mxu0  ;;  %v4413_v11 = vsel %vm458_vm3, %v4389_v10, 0 }
 0x394   :  { %7604 = vrot.lane.b32.xlu0 %v10882_v35, %s10069_s18  ;;  %v11359_v13 = vpop.f32.mrb[13].mxu0  ;;  %v5004_v60 = vsel %vm5002_vm13, %v4987_v32, %v11239_v44  ;;  %v5003_v63 = vsel %vm5002_vm13, %v11231_v30, %v4987_v32  ;;  %v674_v30 = vrot.slane %v11343_v49, %v11410_v29  ;;  %v695_v16 = vmul.f32 %v670_v1, %v11355_v9 }
 0x395   :  { %7277 = vrot.lane.b32.xlu1 %v10882_v35, %s10068_s17  ;;  %v603_v53 = vpop.f32.mrb[14].mxu0 }
 0x396   :  { %9826 = vmatmul.mubr.msk.bf16.vlgmr.msra.gmra.mrb[104].mxu1 %vm454_vm4, %v11270_v50  ;;  %v11368_v54 = vpop.permute.xlu0 %5322  ;;  %v604_v5 = vpop.f32.mrb[15].mxu0  ;;  %v696_v46 = vmul.f32 %v674_v30, %v11359_v13 }
 0x397   :  { %4542 = vmatpush1.bf16.msra.mxu1 %v4413_v11  ;;  %v11377_v35 = vpop.permute.xlu1 %4994  ;;  %4573 = vmatprep.mubr.bf16.mxu1 %v10063_v3 }
 0x398   :  { %9836 = vmatprep.subr.msk.bf16.mxu1 %vm458_vm3, %v11014_v7  ;;  %7608 = vrot.lane.b32.xlu0 %v10945_v27, %s10069_s18  ;;  %v5008_v62 = vsel %vm5002_vm13, %v11377_v35, %v11294_v18  ;;  %v5007_v13 = vsel %vm5002_vm13, %v11265_v24, %v11377_v35 }
 0x399   :  { %7281 = vrot.lane.b32.xlu1 %v10945_v27, %s10068_s17  ;;  %9835 = vmatmul.mubr.msk.bf16.vlgmr.msra.gmra.mrb[112].mxu0 %vm454_vm4, %v11373_v57  ;;  %v998_v27 = vrot.slane %v11361_v21, %v11402_v17 }
 0x39a   :  { %4793 = vmatpush1.bf16.msra.mxu0 %v4699_v55  ;;  %v11398_v61 = vpop.permute.xlu0 %5640  ;;  %4824 = vmatprep.mubr.bf16.mxu0 %v10063_v3 }
 0x39b   :  { %9846 = vmatprep.subr.msk.bf16.mxu0 %vm458_vm3, %v5004_v60  ;;  %v11406_v26 = vpop.permute.xlu1 %5312  ;;  %v844_v22 = vpop.f32.mrb[16].mxu0 }
 0x39c   :  { %7283 = vrot.lane.b32.xlu0 %v11014_v7, %s10068_s17  ;;  %v1019_v36 = vmul.f32 %v982_v59, %v844_v22  ;;  %v846_v56 = vpop.f32.mrb[17].mxu0  ;;  %v5027_v22 = vsel %vm458_vm3, %v5007_v13, 0 }
 0x39d   :  { %6956 = vrot.lane.b32.xlu1 %v11014_v7, %s10067_s16  ;;  %v1020_v2 = vmul.f32 %v986_v38, %v846_v56  ;;  %v848_v4 = vpop.f32.mrb[18].mxu0  ;;  %v11491_v38 = vld [vmem:[%s13437_s2 + $0x1c] sm:$0x3] }
 0x39e   :  { %9830 = vmatmul.mubr.msk.bf16.vlgmr.msra.gmra.mrb[108].mxu1 %vm454_vm4, %v11270_v50  ;;  %v11425_v19 = vpop.permute.xlu0 %5644  ;;  %v11429_v28 = vadd.f32 %v1019_v36, %v691_v42  ;;  %v849_v14 = vpop.f32.mrb[19].mxu0  ;;  %v5015_v50 = vsel %vm458_vm3, %v5003_v63, 0  ;;  %v11509_v56 = vld.sshfl [vmem:[#allocation2 + $0x12] sm:$0x3 pattern:$0x76325410] }
 0x39f   :  { %4752 = vmatpush1.bf16.msra.mxu1 %v4693_v40  ;;  %v11431_v15 = vpop.permute.xlu1 %5316  ;;  %v11435_v12 = vadd.f32 %v1020_v2, %v692_v43  ;;  %4783 = vmatprep.mubr.bf16.mxu1 %v10063_v3  ;;  %v11522_v40 = vrot.slane %v7882_v8, %v10253_v41 }
 0x3a0   :  { %9840 = vmatprep.subr.msk.bf16.mxu1 %vm458_vm3, %v11047_v0  ;;  %7612 = vrot.lane.b32.xlu0 %v11417_v31, %s10069_s18  ;;  %v5332_v4 = vsel %vm5330_vm14, %v11341_v48, %v11431_v15 }
 0x3a1   :  { %7285 = vrot.lane.b32.xlu1 %v10817_v51, %s10068_s17  ;;  %9839 = vmatmul.mubr.msk.bf16.vlgmr.msra.gmra.mrb[116].mxu0 %vm454_vm4, %v11373_v57  ;;  %v9711_v51 = vld [vmem:[%s13438_s4 + $0x2] ss:$8 sm:$0xf] }
 0x3a2   :  { %5039 = vmatpush1.bf16.msra.mxu0 %v5015_v50  ;;  %v11455_v6 = vpop.permute.xlu0 %5648  ;;  %5070 = vmatprep.mubr.bf16.mxu0 %v10063_v3  ;;  %v11472_v5 = vor.u32 %v9712_v47, %v9711_v51  ;;  %v11537_v51 = vcombine.high %v11522_v40, %v11522_v40 }
 0x3a3   :  { %9850 = vmatprep.subr.msk.bf16.mxu0 %vm458_vm3, %v5008_v62  ;;  %v11466_v10 = vpop.permute.xlu1 %5320  ;;  %v926_v32 = vpop.f32.mrb[20].mxu0 }
 0x3a4   :  { %7291 = vrot.lane.b32.xlu0 %v11047_v0, %s10068_s17  ;;  %v1023_v9 = vmul.f32 %v998_v27, %v926_v32  ;;  %v928_v53 = vpop.f32.mrb[21].mxu0  ;;  %v1310_v36 = vrot.slane %v11472_v5, %v11346_v45 }
 0x3a5   :  { %6964 = vrot.lane.b32.xlu1 %v11047_v0, %s10067_s16  ;;  %v1024_v11 = vmul.f32 %v1002_v37, %v928_v53  ;;  %v930_v58 = vpop.f32.mrb[22].mxu0  ;;  %v11486_v0 = vrot.slane %v7580_v25, %v10253_v41  ;;  %v7890_v37 = vcombine.high %v7882_v8, %v7882_v8  ;;  %v11584_v8 = vcombine.high %v11417_v31, %v11417_v31 }
 0x3a6   :  { %9837 = vmatmul.mubr.msk.bf16.vlgmr.msra.gmra.mrb[112].mxu1 %vm454_vm4, %v11373_v57  ;;  %v11481_v59 = vpop.permute.xlu0 %5652  ;;  %v11483_v55 = vadd.f32 %v1023_v9, %v695_v16  ;;  %v931_v60 = vpop.f32.mrb[23].mxu0 }
 0x3a7   :  { %4834 = vmatpush1.bf16.msra.mxu1 %v4705_v23  ;;  %v11493_v35 = vpop.permute.xlu1 %5324  ;;  %v11495_v42 = vadd.f32 %v1024_v11, %v696_v46  ;;  %4865 = vmatprep.mubr.bf16.mxu1 %v10063_v3  ;;  %v5331_v46 = vsel %vm5330_vm14, %v11406_v26, %v11341_v48  ;;  %v11556_v48 = vsub.s32 2, %v10250_v39  ;;  %v11574_v23 = vsub.s32 3, %v10250_v39 }
 0x3a8   :  { %7616 = vrot.lane.b32.xlu0 %v11486_v0, %s10069_s18  ;;  %v5343_v13 = vsel %vm458_vm3, %v5331_v46, 0  ;;  %v11613_v46 = vsub.s32 6, %v10250_v39 }
 0x3a9   :  { %v11500_v43 = vpop.f32.mrb[8].mxu1  ;;  %7289 = vrot.lane.b32.xlu1 %v10294_v20, %s10068_s17  ;;  %9847 = vmatmul.mubr.msk.bf16.vlgmr.msra.gmra.mrb[120].mxu0 %vm454_vm4, %v11491_v38  ;;  %v1314_v20 = vrot.slane %v11472_v5, %v11353_v52 }
 0x3aa   :  { %v11511_v2 = vpop.f32.mrb[9].mxu1  ;;  %5121 = vmatpush1.bf16.msra.mxu0 %v5027_v22  ;;  %v11516_v63 = vpop.permute.xlu0 %5656  ;;  %5152 = vmatprep.mubr.bf16.mxu0 %v10063_v3  ;;  %v9724_v22 = vld [vmem:[%s13438_s4 + $0x3] ss:$8 sm:$0xf0] }
 0x3ab   :  { %v562_v1 = vpop.f32.mrb[10].mxu1  ;;  %9858 = vmatprep.subr.msk.bf16.mxu0 %vm458_vm3, %v5332_v4  ;;  %v11525_v14 = vpop.permute.xlu1 %5328  ;;  %v5336_v4 = vsel %vm5330_vm14, %v11368_v54, %v11493_v35 }
 0x3ac   :  { %v563_v30 = vpop.f32.mrb[11].mxu1  ;;  %v1172_v27 = vpop.f32.mrb[24].mxu0  ;;  %7620 = vrot.lane.b32.xlu0 %v11509_v56, %s10069_s18 }
 0x3ad   :  { %v1347_v50 = vmul.f32 %v1310_v36, %v1172_v27  ;;  %7293 = vrot.lane.b32.xlu1 %v11509_v56, %s10068_s17  ;;  %v1174_v25 = vpop.f32.mrb[25].mxu0  ;;  %v662_v27 = vrot.slane %v11343_v49, %v11556_v48 }
 0x3ae   :  { %v1348_v16 = vmul.f32 %v1314_v20, %v1174_v25  ;;  %9841 = vmatmul.mubr.msk.bf16.vlgmr.msra.gmra.mrb[116].mxu1 %vm454_vm4, %v11373_v57  ;;  %v11533_v62 = vpop.permute.xlu0 %5318  ;;  %v1176_v47 = vpop.f32.mrb[26].mxu0 }
 0x3af   :  { %v11543_v32 = vadd.f32 %v1347_v50, %v11429_v28  ;;  %v4991_v9 = vpop.permute.xlu1 %4990  ;;  %v1177_v53 = vpop.f32.mrb[27].mxu0  ;;  %5111 = vmatprep.mubr.bf16.mxu1 %v10063_v3  ;;  %v666_v47 = vrot.slane %v11343_v49, %v11574_v23 }
 0x3b0   :  { %v11547_v57 = vadd.f32 %v1348_v16, %v11435_v12  ;;  %v5005_v11 = vsel %vm5002_vm13, %v11239_v44, %v4991_v9  ;;  %7933 = vrot.lane.b32.xlu0 %v11537_v51, %s10070_s19  ;;  %v5006_v58 = vsel %vm5002_vm13, %v4991_v9, %v11265_v24  ;;  %v1326_v44 = vrot.slane %v11472_v5, %v11402_v17  ;;  %v9723_v12 = vld [vmem:[%s13438_s4 + $0x3] ss:$8 sm:$0xf] }
 0x3b1   :  { %v11558_v26 = vpop.f32.mrb[12].mxu1  ;;  %7606 = vrot.lane.b32.xlu1 %v10891_v33, %s10069_s18  ;;  %9848 = vmatprep.subr.msk.bf16.mxu1 %vm458_vm3, %v5006_v58  ;;  %v5021_v28 = vsel %vm458_vm3, %v5005_v11, 0  ;;  %v11570_v24 = vrot.slane %v7890_v37, %v10253_v41  ;;  %v1330_v41 = vrot.slane %v11472_v5, %v11410_v29  ;;  %v11604_v37 = vor.u32 %v9724_v22, %v9723_v12  ;;  %v11635_v22 = vld [vmem:[%s13437_s2 + $0x1e] sm:$0x3] }
 0x3b2   :  { %v11576_v33 = vpop.f32.mrb[13].mxu1  ;;  %9851 = vmatmul.mubr.msk.bf16.vlgmr.msra.gmra.mrb[124].mxu0 %vm454_vm4, %v11491_v38  ;;  %5080 = vmatpush1.bf16.msra.mxu1 %v5021_v28  ;;  %v11580_v60 = vpop.permute.xlu0 %5970  ;;  %v990_v11 = vrot.slane %v11361_v21, %v11556_v48  ;;  %v5335_v28 = vsel %vm5330_vm14, %v11466_v10, %v11368_v54 }
 0x3b3   :  { %5367 = vmatpush1.bf16.msra.mxu0 %v5343_v13  ;;  %v644_v36 = vpop.f32.mrb[14].mxu1  ;;  %v11594_v20 = vpop.permute.xlu1 %5642  ;;  %5398 = vmatprep.mubr.bf16.mxu0 %v10063_v3  ;;  %v11608_v16 = vcombine.high %v11570_v24, %v11570_v24 }
 0x3b4   :  { %9862 = vmatprep.subr.msk.bf16.mxu0 %vm458_vm3, %v5336_v4  ;;  %v645_v1 = vpop.f32.mrb[15].mxu1  ;;  %v1254_v30 = vpop.f32.mrb[28].mxu0  ;;  %7941 = vrot.lane.b32.xlu0 %v11584_v8, %s10070_s19  ;;  %v693_v4 = vmul.f32 %v662_v27, %v11500_v43  ;;  %v5355_v43 = vsel %vm458_vm3, %v5335_v28, 0  ;;  %v678_v28 = vrot.slane %v11343_v49, %v11613_v46 }
 0x3b5   :  { %v1351_v50 = vmul.f32 %v1326_v44, %v1254_v30  ;;  %7614 = vrot.lane.b32.xlu1 %v11584_v8, %s10069_s18  ;;  %v1256_v25 = vpop.f32.mrb[29].mxu0  ;;  %v11625_v44 = vsub.s32 7, %v10250_v39  ;;  %v1638_v30 = vrot.slane %v11604_v37, %v11346_v45 }
 0x3b6   :  { %v1352_v9 = vmul.f32 %v1330_v41, %v1256_v25  ;;  %9849 = vmatmul.mubr.msk.bf16.vlgmr.msra.gmra.mrb[120].mxu1 %vm454_vm4, %v11491_v38  ;;  %v11617_v53 = vpop.permute.xlu0 %5326  ;;  %v1258_v58 = vpop.f32.mrb[30].mxu0  ;;  %v994_v41 = vrot.slane %v11361_v21, %v11574_v23 }
 0x3b7   :  { %v11628_v12 = vadd.f32 %v1351_v50, %v11483_v55  ;;  %v4999_v13 = vpop.permute.xlu1 %4998  ;;  %v1259_v36 = vpop.f32.mrb[31].mxu0  ;;  %5193 = vmatprep.mubr.bf16.mxu1 %v10063_v3  ;;  %v694_v50 = vmul.f32 %v666_v47, %v11511_v2  ;;  %v5333_v58 = vsel %vm5330_vm14, %v11431_v15, %v11533_v62  ;;  %v5660_v47 = vsel %vm5658_vm15, %v11594_v20, %v11425_v19 }
 0x3b8   :  { %v11639_v54 = vadd.f32 %v1352_v9, %v11495_v42  ;;  %v5009_v39 = vsel %vm5002_vm13, %v11294_v18, %v4999_v13  ;;  %8258 = vrot.lane.b32.xlu0 %v11522_v40, %s10071_s20  ;;  %v5010_v55 = vsel %vm5002_vm13, %v4999_v13, %v11314_v34  ;;  %v1642_v18 = vrot.slane %v11604_v37, %v11353_v52 }
 0x3b9   :  { %v885_v1 = vpop.f32.mrb[16].mxu1  ;;  %7931 = vrot.lane.b32.xlu1 %v11522_v40, %s10070_s19  ;;  %9852 = vmatprep.subr.msk.bf16.mxu1 %vm458_vm3, %v5010_v55  ;;  %v5033_v42 = vsel %vm458_vm3, %v5009_v39, 0  ;;  %v5334_v9 = vsel %vm5330_vm14, %v11533_v62, %v11466_v10  ;;  %v682_v62 = vrot.slane %v11343_v49, %v11625_v44  ;;  %v1006_v49 = vrot.slane %v11361_v21, %v11613_v46 }
 0x3ba   :  { %v1021_v25 = vmul.f32 %v990_v11, %v885_v1  ;;  %v887_v34 = vpop.f32.mrb[17].mxu1  ;;  %9859 = vmatmul.mubr.msk.bf16.vlgmr.msra.gmra.mrb[128].mxu0 %vm454_vm4, %v11635_v22  ;;  %5162 = vmatpush1.bf16.msra.mxu1 %v5033_v42  ;;  %v11660_v27 = vpop.permute.xlu0 %5978  ;;  %v5349_v1 = vsel %vm458_vm3, %v5333_v58, 0 }
 0x3bb   :  { %v1022_v13 = vmul.f32 %v994_v41, %v887_v34  ;;  %5449 = vmatpush1.bf16.msra.mxu0 %v5355_v43  ;;  %v889_v2 = vpop.f32.mrb[18].mxu1  ;;  %9860 = vmatprep.subr.msk.bf16.mxu1 %vm458_vm3, %v5334_v9  ;;  %v11672_v11 = vpop.permute.xlu1 %5650  ;;  %v697_v43 = vmul.f32 %v678_v28, %v11558_v26  ;;  %v698_v9 = vmul.f32 %v682_v62, %v11576_v33 }
 0x3bc   :  { %v11676_v36 = vadd.f32 %v1021_v25, %v693_v4  ;;  %9870 = vmatprep.subr.msk.bf16.mxu0 %vm458_vm3, %v5660_v47  ;;  %v890_v10 = vpop.f32.mrb[19].mxu1  ;;  %v1500_v15 = vpop.f32.mrb[32].mxu0  ;;  %7937 = vrot.lane.b32.xlu0 %v11608_v16, %s10070_s19  ;;  %v5664_v28 = vsel %vm5658_vm15, %v11672_v11, %v11481_v59 }
 0x3bd   :  { %v11683_v41 = vadd.f32 %v1022_v13, %v694_v50  ;;  %v1675_v39 = vmul.f32 %v1638_v30, %v1500_v15  ;;  %7610 = vrot.lane.b32.xlu1 %v11014_v7, %s10069_s18  ;;  %v1502_v55 = vpop.f32.mrb[33].mxu0  ;;  %5480 = vmatprep.mubr.bf16.mxu0 %v10063_v3  ;;  %v1010_v30 = vrot.slane %v11361_v21, %v11625_v44  ;;  %v9736_v10 = vld [vmem:[%s13438_s4 + $0x4] ss:$8 sm:$0xf0] }
 0x3be   :  { %v1676_v4 = vmul.f32 %v1642_v18, %v1502_v55  ;;  %9853 = vmatmul.mubr.msk.bf16.vlgmr.msra.gmra.mrb[124].mxu1 %vm454_vm4, %v11491_v38  ;;  %v11691_v42 = vpop.permute.xlu0 %6296  ;;  %v1504_v50 = vpop.f32.mrb[34].mxu0  ;;  %v5659_v7 = vsel %vm5658_vm15, %v11398_v61, %v11594_v20  ;;  %v5338_v18 = vsel %vm5330_vm14, %v11617_v53, %v11525_v14  ;;  %v1654_v14 = vrot.slane %v11604_v37, %v11402_v17  ;;  %v9735_v20 = vld [vmem:[%s13438_s4 + $0x4] ss:$8 sm:$0xf] }
 0x3bf   :  { %v11704_v38 = vadd.f32 %v1675_v39, %v11543_v32  ;;  %5408 = vmatpush1.bf16.msra.mxu1 %v5349_v1  ;;  %v11706_v25 = vpop.permute.xlu1 %5968  ;;  %v1505_v34 = vpop.f32.mrb[35].mxu0  ;;  %5439 = vmatprep.mubr.bf16.mxu1 %v10063_v3  ;;  %v11721_v32 = vcombine.high %v11486_v0, %v11486_v0  ;;  %v5671_v2 = vsel %vm458_vm3, %v5659_v7, 0  ;;  %v5337_v15 = vsel %vm5330_vm14, %v11493_v35, %v11617_v53 }
 0x3c0   :  { %v11710_v21 = vadd.f32 %v1676_v4, %v11547_v57  ;;  %9864 = vmatprep.subr.msk.bf16.mxu1 %vm458_vm3, %v5338_v18  ;;  %8262 = vrot.lane.b32.xlu0 %v11570_v24, %s10071_s20  ;;  %v1658_v57 = vrot.slane %v11604_v37, %v11410_v29  ;;  %v1318_v18 = vrot.slane %v11472_v5, %v11556_v48 }
 0x3c1   :  { %v967_v61 = vpop.f32.mrb[20].mxu1  ;;  %7935 = vrot.lane.b32.xlu1 %v11570_v24, %s10070_s19 }
 0x3c2   :  { %v1025_v58 = vmul.f32 %v1006_v49, %v967_v61  ;;  %v969_v13 = vpop.f32.mrb[21].mxu1  ;;  %9863 = vmatmul.mubr.msk.bf16.vlgmr.msra.gmra.mrb[132].mxu0 %vm454_vm4, %v11635_v22  ;;  %v11733_v47 = vpop.permute.xlu0 %6300  ;;  %v11756_v49 = vor.u32 %v9736_v10, %v9735_v20  ;;  %v5663_v61 = vsel %vm5658_vm15, %v11455_v6, %v11672_v11 }
 0x3c3   :  { %v1026_v26 = vmul.f32 %v1010_v30, %v969_v13  ;;  %5695 = vmatpush1.bf16.msra.mxu0 %v5671_v2  ;;  %v971_v33 = vpop.f32.mrb[22].mxu1  ;;  %v11744_v62 = vpop.permute.xlu1 %5972  ;;  %5726 = vmatprep.mubr.bf16.mxu0 %v10063_v3  ;;  %v5361_v30 = vsel %vm458_vm3, %v5337_v15, 0  ;;  %v5683_v10 = vsel %vm458_vm3, %v5663_v61, 0  ;;  %v1334_v61 = vrot.slane %v11472_v5, %v11613_v46 }
 0x3c4   :  { %v11747_v39 = vadd.f32 %v1025_v58, %v697_v43  ;;  %9874 = vmatprep.subr.msk.bf16.mxu0 %vm458_vm3, %v5664_v28  ;;  %v972_v55 = vpop.f32.mrb[23].mxu1  ;;  %v1582_v4 = vpop.f32.mrb[36].mxu0  ;;  %7945 = vrot.lane.b32.xlu0 %v11721_v32, %s10070_s19  ;;  %v11778_v43 = vld [vmem:[%s13437_s2 + $0x20] sm:$0x3]  ;;  %v1966_v11 = vrot.slane %v11756_v49, %v11346_v45  ;;  %v1970_v15 = vrot.slane %v11756_v49, %v11353_v52 }
 0x3c5   :  { %v11752_v35 = vadd.f32 %v1026_v26, %v698_v9  ;;  %v1679_v53 = vmul.f32 %v1654_v14, %v1582_v4  ;;  %7618 = vrot.lane.b32.xlu1 %v11721_v32, %s10069_s18  ;;  %v1584_v1 = vpop.f32.mrb[37].mxu0  ;;  %v5988_v28 = vsel %vm5986_vm0, %v11580_v60, %v11744_v62 }
 0x3c6   :  { %v1680_v50 = vmul.f32 %v1658_v57, %v1584_v1  ;;  %9861 = vmatmul.mubr.msk.bf16.vlgmr.msra.gmra.mrb[128].mxu1 %vm454_vm4, %v11635_v22  ;;  %v11761_v7 = vpop.permute.xlu0 %6304  ;;  %v1586_v34 = vpop.f32.mrb[38].mxu0  ;;  %v1322_v57 = vrot.slane %v11472_v5, %v11574_v23 }
 0x3c7   :  { %v11769_v14 = vadd.f32 %v1679_v53, %v11628_v12  ;;  %5490 = vmatpush1.bf16.msra.mxu1 %v5361_v30  ;;  %v11771_v20 = vpop.permute.xlu1 %5976  ;;  %v1587_v9 = vpop.f32.mrb[39].mxu0  ;;  %5521 = vmatprep.mubr.bf16.mxu1 %v10063_v3 }
 0x3c8   :  { %v11782_v58 = vadd.f32 %v1680_v50, %v11639_v54  ;;  %8266 = vrot.lane.b32.xlu0 %v11417_v31, %s10071_s20 }
 0x3c9   :  { %v1213_v12 = vpop.f32.mrb[24].mxu1  ;;  %7939 = vrot.lane.b32.xlu1 %v11417_v31, %s10070_s19 }
 0x3ca   :  { %v1349_v13 = vmul.f32 %v1318_v18, %v1213_v12  ;;  %v1215_v2 = vpop.f32.mrb[25].mxu1  ;;  %9871 = vmatmul.mubr.msk.bf16.vlgmr.msra.gmra.mrb[136].mxu0 %vm454_vm4, %v11778_v43  ;;  %v11793_v54 = vpop.permute.xlu0 %6308 }
 0x3cb   :  { %v1350_v26 = vmul.f32 %v1322_v57, %v1215_v2  ;;  %5777 = vmatpush1.bf16.msra.mxu0 %v5683_v10  ;;  %v1217_v33 = vpop.f32.mrb[26].mxu1  ;;  %v11800_v55 = vpop.permute.xlu1 %5980  ;;  %5808 = vmatprep.mubr.bf16.mxu0 %v10063_v3 }
 0x3cc   :  { %v11804_v4 = vadd.f32 %v1349_v13, %v11676_v36  ;;  %9882 = vmatprep.subr.msk.bf16.mxu0 %vm458_vm3, %v5988_v28  ;;  %v1218_v53 = vpop.f32.mrb[27].mxu1  ;;  %v1828_v1 = vpop.f32.mrb[40].mxu0  ;;  %8270 = vrot.lane.b32.xlu0 %v11486_v0, %s10071_s20  ;;  %v9748_v33 = vld [vmem:[%s13438_s4 + $0x5] ss:$8 sm:$0xf0] }
 0x3cd   :  { %v11810_v30 = vadd.f32 %v1350_v26, %v11683_v41  ;;  %v2003_v50 = vmul.f32 %v1966_v11, %v1828_v1  ;;  %7943 = vrot.lane.b32.xlu1 %v11486_v0, %s10070_s19  ;;  %v1830_v18 = vpop.f32.mrb[41].mxu0  ;;  %v5987_v41 = vsel %vm5986_vm0, %v11706_v25, %v11580_v60  ;;  %v1338_v11 = vrot.slane %v11472_v5, %v11625_v44 }
 0x3ce   :  { %v2004_v34 = vmul.f32 %v1970_v15, %v1830_v18  ;;  %9865 = vmatmul.mubr.msk.bf16.vlgmr.msra.gmra.mrb[132].mxu1 %vm454_vm4, %v11635_v22  ;;  %v11816_v36 = vpop.permute.xlu0 %5974  ;;  %v1832_v57 = vpop.f32.mrb[42].mxu0  ;;  %v1982_v25 = vrot.slane %v11756_v49, %v11402_v17  ;;  %v1986_v26 = vrot.slane %v11756_v49, %v11410_v29  ;;  %v5992_v1 = vsel %vm5986_vm0, %v11660_v27, %v11800_v55 }
 0x3cf   :  { %v11824_v9 = vadd.f32 %v2003_v50, %v11704_v38  ;;  %v5647_v12 = vpop.permute.xlu1 %5646  ;;  %v1833_v13 = vpop.f32.mrb[43].mxu0  ;;  %5767 = vmatprep.mubr.bf16.mxu1 %v10063_v3 }
 0x3d0   :  { %v11830_v22 = vadd.f32 %v2004_v34, %v11710_v21  ;;  %v5661_v2 = vsel %vm5658_vm15, %v11425_v19, %v5647_v12  ;;  %8274 = vrot.lane.b32.xlu0 %v11509_v56, %s10071_s20  ;;  %v5662_v60 = vsel %vm5658_vm15, %v5647_v12, %v11455_v6  ;;  %v9747_v19 = vld [vmem:[%s13438_s4 + $0x5] ss:$8 sm:$0xf]  ;;  %v5999_v21 = vsel %vm458_vm3, %v5987_v41, 0 }
 0x3d1   :  { %v1295_v38 = vpop.f32.mrb[28].mxu1  ;;  %7947 = vrot.lane.b32.xlu1 %v11509_v56, %s10070_s19  ;;  %9872 = vmatprep.subr.msk.bf16.mxu1 %vm458_vm3, %v5662_v60  ;;  %v5677_v5 = vsel %vm458_vm3, %v5661_v2, 0  ;;  %v1646_v2 = vrot.slane %v11604_v37, %v11556_v48 }
 0x3d2   :  { %v1353_v10 = vmul.f32 %v1334_v61, %v1295_v38  ;;  %v1297_v15 = vpop.f32.mrb[29].mxu1  ;;  %9875 = vmatmul.mubr.msk.bf16.vlgmr.msra.gmra.mrb[140].mxu0 %vm454_vm4, %v11778_v43  ;;  %5736 = vmatpush1.bf16.msra.mxu1 %v5677_v5  ;;  %v11850_v6 = vpop.permute.xlu0 %6312 }
 0x3d3   :  { %v1354_v28 = vmul.f32 %v1338_v11, %v1297_v15  ;;  %6023 = vmatpush1.bf16.msra.mxu0 %v5999_v21  ;;  %v1299_v53 = vpop.f32.mrb[30].mxu1  ;;  %v11860_v50 = vpop.permute.xlu1 %5984  ;;  %6054 = vmatprep.mubr.bf16.mxu0 %v10063_v3  ;;  %v11874_v11 = vor.u32 %v9748_v33, %v9747_v19  ;;  %v11893_v19 = vld [vmem:[%s13437_s2 + $0x22] sm:$0x3] }
 0x3d4   :  { %v11864_v18 = vadd.f32 %v1353_v10, %v11747_v39  ;;  %9886 = vmatprep.subr.msk.bf16.mxu0 %vm458_vm3, %v5992_v1  ;;  %v1300_v34 = vpop.f32.mrb[31].mxu1  ;;  %v1910_v61 = vpop.f32.mrb[44].mxu0  ;;  %8587 = vrot.lane.b32.xlu0 %v11537_v51, %s10072_s21 }
 0x3d5   :  { %v11870_v57 = vadd.f32 %v1354_v28, %v11752_v35  ;;  %v2007_v41 = vmul.f32 %v1982_v25, %v1910_v61  ;;  %8260 = vrot.lane.b32.xlu1 %v11537_v51, %s10071_s20  ;;  %v1912_v12 = vpop.f32.mrb[45].mxu0  ;;  %v5991_v35 = vsel %vm5986_vm0, %v11771_v20, %v11660_v27  ;;  %v1650_v25 = vrot.slane %v11604_v37, %v11574_v23 }
 0x3d6   :  { %v2008_v13 = vmul.f32 %v1986_v26, %v1912_v12  ;;  %9873 = vmatmul.mubr.msk.bf16.vlgmr.msra.gmra.mrb[136].mxu1 %vm454_vm4, %v11778_v43  ;;  %v11878_v39 = vpop.permute.xlu0 %5982  ;;  %v1914_v60 = vpop.f32.mrb[46].mxu0  ;;  %v6011_v28 = vsel %vm458_vm3, %v5991_v35, 0  ;;  %v2298_v1 = vrot.slane %v11874_v11, %v11353_v52  ;;  %v5989_v34 = vsel %vm5986_vm0, %v11744_v62, %v11816_v36 }
 0x3d7   :  { %v11886_v38 = vadd.f32 %v2007_v41, %v11769_v14  ;;  %v5655_v5 = vpop.permute.xlu1 %5654  ;;  %v1915_v21 = vpop.f32.mrb[47].mxu0  ;;  %5849 = vmatprep.mubr.bf16.mxu1 %v10063_v3 }
 0x3d8   :  { %v11897_v10 = vadd.f32 %v2008_v13, %v11782_v58  ;;  %v5665_v27 = vsel %vm5658_vm15, %v11481_v59, %v5655_v5  ;;  %v5666_v14 = vsel %vm5658_vm15, %v5655_v5, %v11516_v63  ;;  %8595 = vrot.lane.b32.xlu0 %v11584_v8, %s10072_s21  ;;  %v2294_v58 = vrot.slane %v11874_v11, %v11346_v45 }
 0x3d9   :  { %v5689_v15 = vsel %vm458_vm3, %v5665_v27, 0  ;;  %v1541_v26 = vpop.f32.mrb[32].mxu1  ;;  %8268 = vrot.lane.b32.xlu1 %v11584_v8, %s10071_s20  ;;  %9876 = vmatprep.subr.msk.bf16.mxu1 %vm458_vm3, %v5666_v14  ;;  %v5990_v59 = vsel %vm5986_vm0, %v11816_v36, %v11771_v20  ;;  %v1662_v21 = vrot.slane %v11604_v37, %v11613_v46  ;;  %v5994_v14 = vsel %vm5986_vm0, %v11878_v39, %v11860_v50 }
 0x3da   :  { %v1677_v33 = vmul.f32 %v1646_v2, %v1541_v26  ;;  %v1543_v63 = vpop.f32.mrb[33].mxu1  ;;  %9883 = vmatmul.mubr.msk.bf16.vlgmr.msra.gmra.mrb[144].mxu0 %vm454_vm4, %v11893_v19  ;;  %5818 = vmatpush1.bf16.msra.mxu1 %v5689_v15  ;;  %v11917_v53 = vpop.permute.xlu0 %6625 }
 0x3db   :  { %v1678_v61 = vmul.f32 %v1650_v25, %v1543_v63  ;;  %6105 = vmatpush1.bf16.msra.mxu0 %v6011_v28  ;;  %v1545_v20 = vpop.f32.mrb[34].mxu1  ;;  %9884 = vmatprep.subr.msk.bf16.mxu1 %vm458_vm3, %v5990_v59  ;;  %v6299_v41 = vpop.permute.xlu1 %6298 }
 0x3dc   :  { %v11926_v12 = vadd.f32 %v1677_v33, %v11804_v4  ;;  %v1546_v13 = vpop.f32.mrb[35].mxu1  ;;  %v6315_v2 = vsel %vm445_vm2, %v6299_v41, %v11733_v47  ;;  %v2156_v60 = vpop.f32.mrb[48].mxu0  ;;  %8591 = vrot.lane.b32.xlu0 %v11608_v16, %s10072_s21  ;;  %6136 = vmatprep.mubr.bf16.mxu0 %v10063_v3  ;;  %v6005_v4 = vsel %vm458_vm3, %v5989_v34, 0  ;;  %v6314_v15 = vsel %vm445_vm2, %v11691_v42, %v6299_v41 }
 0x3dd   :  { %v11934_v62 = vadd.f32 %v1678_v61, %v11810_v30  ;;  %v2331_v36 = vmul.f32 %v2294_v58, %v2156_v60  ;;  %8264 = vrot.lane.b32.xlu1 %v11608_v16, %s10071_s20  ;;  %v2158_v35 = vpop.f32.mrb[49].mxu0  ;;  %9894 = vmatprep.subr.msk.bf16.mxu0 %vm458_vm3, %v6315_v2  ;;  %v1666_v30 = vrot.slane %v11604_v37, %v11625_v44  ;;  %v6326_v50 = vsel %vm458_vm3, %v6314_v15, 0 }
 0x3de   :  { %v2332_v5 = vmul.f32 %v2298_v1, %v2158_v35  ;;  %9877 = vmatmul.mubr.msk.bf16.vlgmr.msra.gmra.mrb[140].mxu1 %vm454_vm4, %v11778_v43  ;;  %v11942_v25 = vpop.permute.xlu0 %6633  ;;  %v2160_v27 = vpop.f32.mrb[50].mxu0  ;;  %v2314_v1 = vrot.slane %v11874_v11, %v11410_v29  ;;  %v5993_v34 = vsel %vm5986_vm0, %v11800_v55, %v11878_v39  ;;  %v1978_v15 = vrot.slane %v11756_v49, %v11574_v23 }
 0x3df   :  { %v11954_v26 = vadd.f32 %v2331_v36, %v11824_v9  ;;  %6064 = vmatpush1.bf16.msra.mxu1 %v6005_v4  ;;  %v6307_v43 = vpop.permute.xlu1 %6306  ;;  %v2161_v58 = vpop.f32.mrb[51].mxu0  ;;  %6095 = vmatprep.mubr.bf16.mxu1 %v10063_v3  ;;  %v2310_v9 = vrot.slane %v11874_v11, %v11402_v17 }
 0x3e0   :  { %v11958_v59 = vadd.f32 %v2332_v5, %v11830_v22  ;;  %9888 = vmatprep.subr.msk.bf16.mxu1 %vm458_vm3, %v5994_v14  ;;  %8912 = vrot.lane.b32.xlu0 %v11522_v40, %s10073_s22  ;;  %v6319_v37 = vsel %vm445_vm2, %v6307_v43, %v11793_v54  ;;  %v9759_v22 = vld [vmem:[%s13438_s4 + $0x6] ss:$8 sm:$0xf]  ;;  %v12018_v58 = vld [vmem:[%s13437_s2 + $0x24] sm:$0x3] }
 0x3e1   :  { %v1623_v42 = vpop.f32.mrb[36].mxu1  ;;  %8585 = vrot.lane.b32.xlu1 %v11522_v40, %s10072_s21  ;;  %v9760_v40 = vld [vmem:[%s13438_s4 + $0x6] ss:$8 sm:$0xf0] }
 0x3e2   :  { %v1681_v33 = vmul.f32 %v1662_v21, %v1623_v42  ;;  %v1625_v63 = vpop.f32.mrb[37].mxu1  ;;  %9887 = vmatmul.mubr.msk.bf16.vlgmr.msra.gmra.mrb[148].mxu0 %vm454_vm4, %v11893_v19  ;;  %v11975_v28 = vpop.permute.xlu0 %6950  ;;  %v11997_v35 = vor.u32 %v9760_v40, %v9759_v22  ;;  %v1974_v21 = vrot.slane %v11756_v49, %v11556_v48 }
 0x3e3   :  { %v1682_v61 = vmul.f32 %v1666_v30, %v1625_v63  ;;  %6350 = vmatpush1.bf16.msra.mxu0 %v6326_v50  ;;  %v1627_v20 = vpop.f32.mrb[38].mxu1  ;;  %v6624_v41 = vpop.permute.xlu1 %6623  ;;  %6381 = vmatprep.mubr.bf16.mxu0 %v10063_v3  ;;  %v6318_v30 = vsel %vm445_vm2, %v11761_v7, %v6307_v43 }
 0x3e4   :  { %v11987_v13 = vadd.f32 %v1681_v33, %v11864_v18  ;;  %9898 = vmatprep.subr.msk.bf16.mxu0 %vm458_vm3, %v6319_v37  ;;  %v1628_v2 = vpop.f32.mrb[39].mxu1  ;;  %v2238_v60 = vpop.f32.mrb[52].mxu0  ;;  %8599 = vrot.lane.b32.xlu0 %v11721_v32, %s10072_s21  ;;  %v6017_v18 = vsel %vm458_vm3, %v5993_v34, 0  ;;  %v6338_v22 = vsel %vm458_vm3, %v6318_v30, 0  ;;  %v2626_v63 = vrot.slane %v11997_v35, %v11353_v52 }
 0x3e5   :  { %v11993_v36 = vadd.f32 %v1682_v61, %v11870_v57  ;;  %v2335_v55 = vmul.f32 %v2310_v9, %v2238_v60  ;;  %8272 = vrot.lane.b32.xlu1 %v11721_v32, %s10071_s20  ;;  %v2240_v39 = vpop.f32.mrb[53].mxu0  ;;  %v2622_v9 = vrot.slane %v11997_v35, %v11346_v45 }
 0x3e6   :  { %v2336_v4 = vmul.f32 %v2314_v1, %v2240_v39  ;;  %9885 = vmatmul.mubr.msk.bf16.vlgmr.msra.gmra.mrb[144].mxu1 %vm454_vm4, %v11893_v19  ;;  %v12002_v5 = vpop.permute.xlu0 %6954  ;;  %v2242_v57 = vpop.f32.mrb[54].mxu0 }
 0x3e7   :  { %v12009_v27 = vadd.f32 %v2335_v55, %v11886_v38  ;;  %6146 = vmatpush1.bf16.msra.mxu1 %v6017_v18  ;;  %v12011_v14 = vpop.permute.xlu1 %6627  ;;  %v2243_v37 = vpop.f32.mrb[55].mxu0  ;;  %6177 = vmatprep.mubr.bf16.mxu1 %v10063_v3  ;;  %v1990_v18 = vrot.slane %v11756_v49, %v11613_v46 }
 0x3e8   :  { %v12022_v42 = vadd.f32 %v2336_v4, %v11897_v10  ;;  %8916 = vrot.lane.b32.xlu0 %v11570_v24, %s10073_s22  ;;  %v6642_v38 = vsel %vm774_vm5, %v11917_v53, %v12011_v14 }
 0x3e9   :  { %v1869_v43 = vpop.f32.mrb[40].mxu1  ;;  %8589 = vrot.lane.b32.xlu1 %v11570_v24, %s10072_s21 }
 0x3ea   :  { %v2005_v50 = vmul.f32 %v1974_v21, %v1869_v43  ;;  %v1871_v33 = vpop.f32.mrb[41].mxu1  ;;  %9895 = vmatmul.mubr.msk.bf16.vlgmr.msra.gmra.mrb[152].mxu0 %vm454_vm4, %v12018_v58  ;;  %v12036_v10 = vpop.permute.xlu0 %6958  ;;  %v6641_v21 = vsel %vm774_vm5, %v6624_v41, %v11917_v53  ;;  %v2642_v43 = vrot.slane %v11997_v35, %v11410_v29 }
 0x3eb   :  { %v2006_v1 = vmul.f32 %v1978_v15, %v1871_v33  ;;  %6432 = vmatpush1.bf16.msra.mxu0 %v6338_v22  ;;  %v1873_v40 = vpop.f32.mrb[42].mxu1  ;;  %v12040_v34 = vpop.permute.xlu1 %6631  ;;  %6463 = vmatprep.mubr.bf16.mxu0 %v10063_v3  ;;  %v9772_v33 = vld [vmem:[%s13438_s4 + $0x7] ss:$8 sm:$0xf0] }
 0x3ec   :  { %v12044_v24 = vadd.f32 %v2005_v50, %v11926_v12  ;;  %9906 = vmatprep.subr.msk.bf16.mxu0 %vm458_vm3, %v6642_v38  ;;  %v1874_v61 = vpop.f32.mrb[43].mxu1  ;;  %v2484_v20 = vpop.f32.mrb[56].mxu0  ;;  %8920 = vrot.lane.b32.xlu0 %v11417_v31, %s10073_s22 }
 0x3ed   :  { %v12050_v2 = vadd.f32 %v2006_v1, %v11934_v62  ;;  %v2659_v60 = vmul.f32 %v2622_v9, %v2484_v20  ;;  %8593 = vrot.lane.b32.xlu1 %v11417_v31, %s10072_s21  ;;  %v2486_v55 = vpop.f32.mrb[57].mxu0  ;;  %v1994_v31 = vrot.slane %v11756_v49, %v11625_v44  ;;  %v2638_v49 = vrot.slane %v11997_v35, %v11402_v17 }
 0x3ee   :  { %v2660_v39 = vmul.f32 %v2626_v63, %v2486_v55  ;;  %9889 = vmatmul.mubr.msk.bf16.vlgmr.msra.gmra.mrb[148].mxu1 %vm454_vm4, %v11893_v19  ;;  %v12056_v12 = vpop.permute.xlu0 %6629  ;;  %v2488_v4 = vpop.f32.mrb[58].mxu0 }
 0x3ef   :  { %v12063_v62 = vadd.f32 %v2659_v60, %v11954_v26  ;;  %v6303_v57 = vpop.permute.xlu1 %6302  ;;  %v2489_v30 = vpop.f32.mrb[59].mxu0  ;;  %6422 = vmatprep.mubr.bf16.mxu1 %v10063_v3 }
 0x3f0   :  { %v12069_v19 = vadd.f32 %v2660_v39, %v11958_v59  ;;  %v6316_v15 = vsel %vm445_vm2, %v11733_v47, %v6303_v57  ;;  %v6317_v37 = vsel %vm445_vm2, %v6303_v57, %v11761_v7  ;;  %8924 = vrot.lane.b32.xlu0 %v11486_v0, %s10073_s22  ;;  %v9989_v59 = vld.sshfl [vmem:[#allocation2 + $0x12] sm:$0x3 pattern:$0x76325410]  ;;  %v6653_v47 = vsel %vm458_vm3, %v6641_v21, 0 }
 0x3f1   :  { %v6332_v53 = vsel %vm458_vm3, %v6316_v15, 0  ;;  %v1951_v26 = vpop.f32.mrb[44].mxu1  ;;  %8597 = vrot.lane.b32.xlu1 %v11486_v0, %s10072_s21  ;;  %9896 = vmatprep.subr.msk.bf16.mxu1 %vm458_vm3, %v6317_v37  ;;  %v9771_v0 = vld [vmem:[%s13438_s4 + $0x7] ss:$8 sm:$0xf] }
 0x3f2   :  { %v2009_v41 = vmul.f32 %v1990_v18, %v1951_v26  ;;  %v1953_v38 = vpop.f32.mrb[45].mxu1  ;;  %9899 = vmatmul.mubr.msk.bf16.vlgmr.msra.gmra.mrb[156].mxu0 %vm454_vm4, %v12018_v58  ;;  %6391 = vmatpush1.bf16.msra.mxu1 %v6332_v53  ;;  %v12086_v7 = vpop.permute.xlu0 %6962  ;;  %v2302_v18 = vrot.slane %v11874_v11, %v11556_v48  ;;  %v12118_v21 = vor.u32 %v9772_v33, %v9771_v0  ;;  %v12131_v30 = vld [vmem:[%s13437_s2 + $0x26] sm:$0x3] }
 0x3f3   :  { %v2010_v9 = vmul.f32 %v1994_v31, %v1953_v38  ;;  %6677 = vmatpush1.bf16.msra.mxu0 %v6653_v47  ;;  %v1955_v22 = vpop.f32.mrb[46].mxu1  ;;  %v12093_v50 = vpop.permute.xlu1 %6635  ;;  %6708 = vmatprep.mubr.bf16.mxu0 %v10063_v3  ;;  %v2306_v31 = vrot.slane %v11874_v11, %v11574_v23 }
 0x3f4   :  { %v12100_v63 = vadd.f32 %v2009_v41, %v11987_v13  ;;  %v1956_v1 = vpop.f32.mrb[47].mxu1  ;;  %v6646_v40 = vsel %vm774_vm5, %v11942_v25, %v12093_v50  ;;  %v2566_v61 = vpop.f32.mrb[60].mxu0  ;;  %8928 = vrot.lane.b32.xlu0 %v9989_v59, %s10073_s22 }
 0x3f5   :  { %v12107_v20 = vadd.f32 %v2010_v9, %v11993_v36  ;;  %v2663_v60 = vmul.f32 %v2638_v49, %v2566_v61  ;;  %8601 = vrot.lane.b32.xlu1 %v11509_v56, %s10072_s21  ;;  %v2568_v55 = vpop.f32.mrb[61].mxu0  ;;  %9910 = vmatprep.subr.msk.bf16.mxu0 %vm458_vm3, %v6646_v40  ;;  %v6645_v36 = vsel %vm774_vm5, %v12040_v34, %v11942_v25 }
 0x3f6   :  { %v2664_v13 = vmul.f32 %v2642_v43, %v2568_v55  ;;  %9897 = vmatmul.mubr.msk.bf16.vlgmr.msra.gmra.mrb[152].mxu1 %vm454_vm4, %v12018_v58  ;;  %v12114_v39 = vpop.permute.xlu0 %6637  ;;  %v2570_v4 = vpop.f32.mrb[62].mxu0  ;;  %v6665_v49 = vsel %vm458_vm3, %v6645_v36, 0  ;;  %v2954_v43 = vrot.slane %v12118_v21, %v11353_v52 }
 0x3f7   :  { %v12124_v56 = vadd.f32 %v2663_v60, %v12009_v27  ;;  %v6311_v57 = vpop.permute.xlu1 %6310  ;;  %v2571_v15 = vpop.f32.mrb[63].mxu0  ;;  %6504 = vmatprep.mubr.bf16.mxu1 %v10063_v3 }
 0x3f8   :  { %v12135_v37 = vadd.f32 %v2664_v13, %v12022_v42  ;;  %v6320_v25 = vsel %vm445_vm2, %v11793_v54, %v6311_v57  ;;  %v6321_v27 = vsel %vm445_vm2, %v6311_v57, %v11850_v6  ;;  %v6644_v42 = vsel %vm774_vm5, %v12056_v12, %v12040_v34 }
 0x3f9   :  { %v6344_v53 = vsel %vm458_vm3, %v6320_v25, 0  ;;  %v2197_v26 = vpop.f32.mrb[48].mxu1  ;;  %8914 = vrot.lane.b32.xlu1 %v11537_v51, %s10073_s22  ;;  %9900 = vmatprep.subr.msk.bf16.mxu1 %vm458_vm3, %v6321_v27  ;;  %v2950_v6 = vrot.slane %v12118_v21, %v11346_v45  ;;  %v6643_v51 = vsel %vm774_vm5, %v12011_v14, %v12056_v12  ;;  %v2966_v15 = vrot.slane %v12118_v21, %v11402_v17 }
 0x3fa   :  { %v2333_v59 = vmul.f32 %v2302_v18, %v2197_v26  ;;  %v2199_v47 = vpop.f32.mrb[49].mxu1  ;;  %9907 = vmatmul.mubr.msk.bf16.vlgmr.msra.gmra.mrb[160].mxu0 %vm454_vm4, %v12131_v30  ;;  %6473 = vmatpush1.bf16.msra.mxu1 %v6344_v53  ;;  %v12151_v54 = vpop.permute.xlu0 %6966  ;;  %v6659_v14 = vsel %vm458_vm3, %v6643_v51, 0  ;;  %v2970_v26 = vrot.slane %v12118_v21, %v11410_v29 }
 0x3fb   :  { %v2334_v41 = vmul.f32 %v2306_v31, %v2199_v47  ;;  %6759 = vmatpush1.bf16.msra.mxu0 %v6665_v49  ;;  %v2201_v38 = vpop.f32.mrb[50].mxu1  ;;  %9908 = vmatprep.subr.msk.bf16.mxu1 %vm458_vm3, %v6644_v42  ;;  %v6640_v34 = vpop.permute.xlu1 %6639  ;;  %v9784_v49 = vld [vmem:[%s13438_s4 + $0x40] ss:$8 sm:$0xf0] }
 0x3fc   :  { %v12162_v0 = vadd.f32 %v2333_v59, %v12044_v24  ;;  %v2202_v9 = vpop.f32.mrb[51].mxu1  ;;  %6790 = vmatprep.mubr.bf16.mxu0 %v10063_v3  ;;  %v2318_v24 = vrot.slane %v11874_v11, %v11613_v46  ;;  %v2630_v38 = vrot.slane %v11997_v35, %v11556_v48 }
 0x3fd   :  { %v12166_v22 = vadd.f32 %v2334_v41, %v12050_v2  ;;  %v2812_v33 = vpop.f32.mrb[64].mxu0  ;;  %8918 = vrot.lane.b32.xlu1 %v11608_v16, %s10073_s22  ;;  %v6648_v2 = vsel %vm774_vm5, %v12114_v39, %v6640_v34  ;;  %v2322_v16 = vrot.slane %v11874_v11, %v11625_v44  ;;  %v2634_v9 = vrot.slane %v11997_v35, %v11574_v23 }
 0x3fe   :  { %v2987_v12 = vmul.f32 %v2950_v6, %v2812_v33  ;;  %v2814_v1 = vpop.f32.mrb[65].mxu0  ;;  %9901 = vmatmul.mubr.msk.bf16.vlgmr.msra.gmra.mrb[156].mxu1 %vm454_vm4, %v12018_v58  ;;  %v12173_v40 = vpop.permute.xlu0 %7279  ;;  %v12242_v33 = vld [vmem:[%s13437_s2 + $0x28] sm:$0x3] }
 0x3ff   :  { %v2988_v61 = vmul.f32 %v2954_v43, %v2814_v1  ;;  %6718 = vmatpush1.bf16.msra.mxu1 %v6659_v14  ;;  %v6953_v60 = vpop.permute.xlu1 %6952  ;;  %v2816_v55 = vpop.f32.mrb[66].mxu0  ;;  %6749 = vmatprep.mubr.bf16.mxu1 %v10063_v3 }
 0x400   :  { %v12183_v13 = vadd.f32 %v2987_v12, %v12063_v62  ;;  %9912 = vmatprep.subr.msk.bf16.mxu1 %vm458_vm3, %v6648_v2  ;;  %v6968_v58 = vsel %vm1102_vm6, %v11975_v28, %v6953_v60  ;;  %v6969_v18 = vsel %vm1102_vm6, %v6953_v60, %v12002_v5  ;;  %v2817_v4 = vpop.f32.mrb[67].mxu0 }
 0x401   :  { %v12191_v36 = vadd.f32 %v2988_v61, %v12069_v19  ;;  %v6980_v11 = vsel %vm458_vm3, %v6968_v58, 0  ;;  %v2279_v57 = vpop.f32.mrb[52].mxu1  ;;  %8922 = vrot.lane.b32.xlu1 %v11584_v8, %s10073_s22  ;;  %9918 = vmatprep.subr.msk.bf16.mxu0 %vm458_vm3, %v6969_v18  ;;  %v9783_v19 = vld [vmem:[%s13438_s4 + $0x40] ss:$8 sm:$0xf]  ;;  %v6647_v8 = vsel %vm774_vm5, %v12093_v50, %v12114_v39 }
 0x402   :  { %v2337_v62 = vmul.f32 %v2318_v24, %v2279_v57  ;;  %v2281_v31 = vpop.f32.mrb[53].mxu1  ;;  %9911 = vmatmul.mubr.msk.bf16.vlgmr.msra.gmra.mrb[164].mxu0 %vm454_vm4, %v12131_v30  ;;  %v12199_v28 = vpop.permute.xlu0 %7287  ;;  %v6671_v6 = vsel %vm458_vm3, %v6647_v8, 0 }
 0x403   :  { %v2338_v25 = vmul.f32 %v2322_v16, %v2281_v31  ;;  %v2283_v27 = vpop.f32.mrb[54].mxu1  ;;  %7004 = vmatpush1.bf16.msra.mxu0 %v6980_v11  ;;  %v6961_v53 = vpop.permute.xlu1 %6960  ;;  %7035 = vmatprep.mubr.bf16.mxu0 %v10063_v3 }
 0x404   :  { %v12216_v42 = vadd.f32 %v2337_v62, %v12100_v63  ;;  %v2284_v59 = vpop.f32.mrb[55].mxu1  ;;  %v6973_v50 = vsel %vm1102_vm6, %v6961_v53, %v12086_v7  ;;  %v6972_v34 = vsel %vm1102_vm6, %v12036_v10, %v6961_v53 }
 0x405   :  { %v12221_v39 = vadd.f32 %v2338_v25, %v12107_v20  ;;  %v2894_v47 = vpop.f32.mrb[68].mxu0  ;;  %8926 = vrot.lane.b32.xlu1 %v11721_v32, %s10073_s22  ;;  %9922 = vmatprep.subr.msk.bf16.mxu0 %vm458_vm3, %v6973_v50  ;;  %v12233_v20 = vor.u32 %v9784_v49, %v9783_v19  ;;  %v6992_v61 = vsel %vm458_vm3, %v6972_v34, 0 }
 0x406   :  { %v2991_v51 = vmul.f32 %v2966_v15, %v2894_v47  ;;  %v2896_v41 = vpop.f32.mrb[69].mxu0  ;;  %9909 = vmatmul.mubr.msk.bf16.vlgmr.msra.gmra.mrb[160].mxu1 %vm454_vm4, %v12131_v30  ;;  %v12229_v63 = vpop.permute.xlu0 %7604 }
 0x407   :  { %v2992_v32 = vmul.f32 %v2970_v26, %v2896_v41  ;;  %6800 = vmatpush1.bf16.msra.mxu1 %v6671_v6  ;;  %v7278_v43 = vpop.permute.xlu1 %7277  ;;  %v2898_v14 = vpop.f32.mrb[70].mxu0  ;;  %6831 = vmatprep.mubr.bf16.mxu1 %v10063_v3  ;;  %v3278_v58 = vrot.slane %v12233_v20, %v11346_v45 }
 0x408   :  { %v12246_v12 = vadd.f32 %v2991_v51, %v12124_v56  ;;  %v2899_v1 = vpop.f32.mrb[71].mxu0  ;;  %v7295_v27 = vsel %vm1430_vm7, %v7278_v43, %v12173_v40 }
 0x409   :  { %v12249_v24 = vadd.f32 %v2992_v32, %v12135_v37  ;;  %v2525_v2 = vpop.f32.mrb[56].mxu1  ;;  %v3282_v37 = vrot.slane %v12233_v20, %v11353_v52  ;;  %v3298_v32 = vrot.slane %v12233_v20, %v11410_v29 }
 0x40a   :  { %v2661_v60 = vmul.f32 %v2630_v38, %v2525_v2  ;;  %v2527_v16 = vpop.f32.mrb[57].mxu1  ;;  %9919 = vmatmul.mubr.msk.bf16.vlgmr.msra.gmra.mrb[168].mxu0 %vm454_vm4, %v12242_v33  ;;  %v12254_v55 = vpop.permute.xlu0 %7608 }
 0x40b   :  { %v2662_v18 = vmul.f32 %v2634_v9, %v2527_v16  ;;  %7086 = vmatpush1.bf16.msra.mxu0 %v6992_v61  ;;  %v2529_v56 = vpop.f32.mrb[58].mxu1  ;;  %v12258_v4 = vpop.permute.xlu1 %7281  ;;  %7117 = vmatprep.mubr.bf16.mxu0 %v10063_v3  ;;  %v2958_v16 = vrot.slane %v12118_v21, %v11556_v48 }
 0x40c   :  { %v12264_v11 = vadd.f32 %v2661_v60, %v12162_v0  ;;  %v2530_v57 = vpop.f32.mrb[59].mxu1  ;;  %v7296_v62 = vsel %vm1430_vm7, %v12173_v40, %v12258_v4  ;;  %v2646_v0 = vrot.slane %v11997_v35, %v11613_v46 }
 0x40d   :  { %v12270_v31 = vadd.f32 %v2662_v18, %v12166_v22  ;;  %v3140_v15 = vpop.f32.mrb[72].mxu0  ;;  %9930 = vmatprep.subr.msk.bf16.mxu0 %vm458_vm3, %v7296_v62  ;;  %v2650_v22 = vrot.slane %v11997_v35, %v11625_v44  ;;  %v7307_v35 = vsel %vm458_vm3, %v7295_v27, 0 }
 0x40e   :  { %v3315_v19 = vmul.f32 %v3278_v58, %v3140_v15  ;;  %v3142_v8 = vpop.f32.mrb[73].mxu0  ;;  %9913 = vmatmul.mubr.msk.bf16.vlgmr.msra.gmra.mrb[164].mxu1 %vm454_vm4, %v12131_v30  ;;  %v7284_v25 = vpop.permute.xlu0 %7283 }
 0x40f   :  { %v3316_v53 = vmul.f32 %v3282_v37, %v3142_v8  ;;  %v6957_v26 = vpop.permute.xlu1 %6956  ;;  %v3144_v49 = vpop.f32.mrb[74].mxu0  ;;  %7076 = vmatprep.mubr.bf16.mxu1 %v10063_v3 }
 0x410   :  { %v12283_v59 = vadd.f32 %v3315_v19, %v12183_v13  ;;  %v6970_v30 = vsel %vm1102_vm6, %v12002_v5, %v6957_v26  ;;  %v6971_v50 = vsel %vm1102_vm6, %v6957_v26, %v12036_v10  ;;  %v3145_v47 = vpop.f32.mrb[75].mxu0  ;;  %v3294_v10 = vrot.slane %v12233_v20, %v11402_v17  ;;  %v9796_v26 = vld [vmem:[%s13438_s4 + $0x41] ss:$8 sm:$0xf0] }
 0x411   :  { %v12290_v40 = vadd.f32 %v3316_v53, %v12191_v36  ;;  %v6986_v6 = vsel %vm458_vm3, %v6970_v30, 0  ;;  %v2607_v51 = vpop.f32.mrb[60].mxu1  ;;  %9920 = vmatprep.subr.msk.bf16.mxu1 %vm458_vm3, %v6971_v50 }
 0x412   :  { %v2665_v41 = vmul.f32 %v2646_v0, %v2607_v51  ;;  %v2609_v13 = vpop.f32.mrb[61].mxu1  ;;  %9923 = vmatmul.mubr.msk.bf16.vlgmr.msra.gmra.mrb[172].mxu0 %vm454_vm4, %v12242_v33  ;;  %7045 = vmatpush1.bf16.msra.mxu1 %v6986_v6  ;;  %v12297_v5 = vpop.permute.xlu0 %7612 }
 0x413   :  { %v2666_v36 = vmul.f32 %v2650_v22, %v2609_v13  ;;  %7331 = vmatpush1.bf16.msra.mxu0 %v7307_v35  ;;  %v2611_v38 = vpop.f32.mrb[62].mxu1  ;;  %v7286_v34 = vpop.permute.xlu1 %7285  ;;  %7362 = vmatprep.mubr.bf16.mxu0 %v10063_v3  ;;  %v7297_v22 = vsel %vm1430_vm7, %v12258_v4, %v7284_v25 }
 0x414   :  { %v12305_v43 = vadd.f32 %v2665_v41, %v12216_v42  ;;  %v2612_v9 = vpop.f32.mrb[63].mxu1  ;;  %v2962_v42 = vrot.slane %v12118_v21, %v11574_v23  ;;  %v7298_v27 = vsel %vm1430_vm7, %v7284_v25, %v7286_v34  ;;  %v7313_v25 = vsel %vm458_vm3, %v7297_v22, 0 }
 0x415   :  { %v12308_v14 = vadd.f32 %v2666_v36, %v12221_v39  ;;  %v3222_v1 = vpop.f32.mrb[76].mxu0  ;;  %v12319_v39 = vld [vmem:[%s13437_s2 + $0x2a] sm:$0x3] }
 0x416   :  { %v3319_v2 = vmul.f32 %v3294_v10, %v3222_v1  ;;  %v3224_v61 = vpop.f32.mrb[77].mxu0  ;;  %9921 = vmatmul.mubr.msk.bf16.vlgmr.msra.gmra.mrb[168].mxu1 %vm454_vm4, %v12242_v33  ;;  %v7292_v60 = vpop.permute.xlu0 %7291 }
 0x417   :  { %v3320_v58 = vmul.f32 %v3298_v32, %v3224_v61  ;;  %v6965_v18 = vpop.permute.xlu1 %6964  ;;  %7158 = vmatprep.mubr.bf16.mxu1 %v10063_v3  ;;  %v3226_v56 = vpop.f32.mrb[78].mxu0 }
 0x418   :  { %v12323_v37 = vadd.f32 %v3319_v2, %v12246_v12  ;;  %v6974_v57 = vsel %vm1102_vm6, %v12086_v7, %v6965_v18  ;;  %v6975_v62 = vsel %vm1102_vm6, %v6965_v18, %v12151_v54  ;;  %v3227_v15 = vpop.f32.mrb[79].mxu0  ;;  %v9795_v12 = vld [vmem:[%s13438_s4 + $0x41] ss:$8 sm:$0xf]  ;;  %v7299_v7 = vsel %vm1430_vm7, %v7286_v34, %v12199_v28 }
 0x419   :  { %v12330_v19 = vadd.f32 %v3320_v58, %v12249_v24  ;;  %v6998_v8 = vsel %vm458_vm3, %v6974_v57, 0  ;;  %v2853_v0 = vpop.f32.mrb[64].mxu1  ;;  %9924 = vmatprep.subr.msk.bf16.mxu1 %vm458_vm3, %v6975_v62  ;;  %v7319_v35 = vsel %vm458_vm3, %v7299_v7, 0  ;;  %v12361_v4 = vor.u32 %v9796_v26, %v9795_v12 }
 0x41a   :  { %v2989_v53 = vmul.f32 %v2958_v16, %v2853_v0  ;;  %v2855_v54 = vpop.f32.mrb[65].mxu1  ;;  %9931 = vmatmul.mubr.msk.bf16.vlgmr.msra.gmra.mrb[176].mxu0 %vm454_vm4, %v12319_v39  ;;  %7127 = vmatpush1.bf16.msra.mxu1 %v6998_v8  ;;  %v12342_v24 = vpop.permute.xlu0 %7616  ;;  %v3286_v0 = vrot.slane %v12233_v20, %v11556_v48  ;;  %v3290_v7 = vrot.slane %v12233_v20, %v11574_v23 }
 0x41b   :  { %v2990_v49 = vmul.f32 %v2962_v42, %v2855_v54  ;;  %v2857_v30 = vpop.f32.mrb[66].mxu1  ;;  %9932 = vmatprep.subr.msk.bf16.mxu1 %vm458_vm3, %v7298_v27  ;;  %v7290_v50 = vpop.permute.xlu1 %7289  ;;  %7444 = vmatprep.mubr.bf16.mxu0 %v10063_v3 }
 0x41c   :  { %v12352_v47 = vadd.f32 %v2989_v53, %v12264_v11  ;;  %v2858_v6 = vpop.f32.mrb[67].mxu1  ;;  %v7300_v51 = vsel %vm1430_vm7, %v12199_v28, %v7290_v50  ;;  %v2974_v28 = vrot.slane %v12118_v21, %v11613_v46  ;;  %v7301_v9 = vsel %vm1430_vm7, %v7290_v50, %v7292_v60  ;;  %v12412_v53 = vld [vmem:[%s13437_s2 + $0x2c] sm:$0x3] }
 0x41d   :  { %v12358_v41 = vadd.f32 %v2990_v49, %v12270_v31  ;;  %9934 = vmatprep.subr.msk.bf16.mxu0 %vm458_vm3, %v7300_v51  ;;  %v2978_v31 = vrot.slane %v12118_v21, %v11625_v44  ;;  %v3610_v21 = vrot.slane %v12361_v4, %v11353_v52  ;;  %v3622_v50 = vrot.slane %v12361_v4, %v11402_v17 }
 0x41e   :  { %9925 = vmatmul.mubr.msk.bf16.vlgmr.msra.gmra.mrb[172].mxu1 %vm454_vm4, %v12242_v33  ;;  %7413 = vmatpush1.bf16.msra.mxu0 %v7319_v35  ;;  %v12366_v11 = vpop.permute.xlu0 %7620  ;;  %v3606_v33 = vrot.slane %v12361_v4, %v11346_v45  ;;  %v3626_v35 = vrot.slane %v12361_v4, %v11410_v29 }
 0x41f   :  { %7372 = vmatpush1.bf16.msra.mxu1 %v7313_v25  ;;  %v7294_v13 = vpop.permute.xlu1 %7293  ;;  %7403 = vmatprep.mubr.bf16.mxu1 %v10063_v3  ;;  %v9807_v25 = vld [vmem:[%s13438_s4 + $0x42] ss:$8 sm:$0xf] }
 0x420   :  { %v7302_v10 = vsel %vm1430_vm7, %v7292_v60, %v7294_v13 }
 0x421   :  { %v2935_v36 = vpop.f32.mrb[68].mxu1  ;;  %9936 = vmatprep.subr.msk.bf16.mxu1 %vm458_vm3, %v7302_v10  ;;  %v9808_v10 = vld [vmem:[%s13438_s4 + $0x42] ss:$8 sm:$0xf0] }
 0x422   :  { %v2993_v38 = vmul.f32 %v2974_v28, %v2935_v36  ;;  %v2937_v34 = vpop.f32.mrb[69].mxu1  ;;  %9935 = vmatmul.mubr.msk.bf16.vlgmr.msra.gmra.mrb[180].mxu0 %vm454_vm4, %v12319_v39  ;;  %v12379_v32 = vpop.permute.xlu0 %7933 }
 0x423   :  { %v2994_v1 = vmul.f32 %v2978_v31, %v2937_v34  ;;  %v2939_v2 = vpop.f32.mrb[70].mxu1  ;;  %v7607_v61 = vpop.permute.xlu1 %7606  ;;  %7689 = vmatprep.mubr.bf16.mxu0 %v10063_v3 }
 0x424   :  { %v12386_v16 = vadd.f32 %v2993_v38, %v12305_v43  ;;  %v2940_v58 = vpop.f32.mrb[71].mxu1  ;;  %v7622_v18 = vsel %vm1758_vm8, %v12229_v63, %v7607_v61  ;;  %v7623_v42 = vsel %vm1758_vm8, %v7607_v61, %v12254_v55  ;;  %v3468_v56 = vpop.f32.mrb[80].mxu0  ;;  %v7325_v43 = vsel %vm458_vm3, %v7301_v9, 0 }
 0x425   :  { %v12393_v57 = vadd.f32 %v2994_v1, %v12308_v14  ;;  %v7634_v60 = vsel %vm458_vm3, %v7622_v18, 0  ;;  %v3643_v62 = vmul.f32 %v3606_v33, %v3468_v56  ;;  %v3470_v15 = vpop.f32.mrb[81].mxu0  ;;  %9942 = vmatprep.subr.msk.bf16.mxu0 %vm458_vm3, %v7623_v42  ;;  %v3302_v61 = vrot.slane %v12233_v20, %v11613_v46 }
 0x426   :  { %v3644_v8 = vmul.f32 %v3610_v21, %v3470_v15  ;;  %9933 = vmatmul.mubr.msk.bf16.vlgmr.msra.gmra.mrb[176].mxu1 %vm454_vm4, %v12319_v39  ;;  %7658 = vmatpush1.bf16.msra.mxu0 %v7634_v60  ;;  %v12400_v63 = vpop.permute.xlu0 %7941  ;;  %v3472_v14 = vpop.f32.mrb[82].mxu0  ;;  %v12451_v18 = vor.u32 %v9808_v10, %v9807_v25  ;;  %v12500_v25 = vld [vmem:[%s13437_s2 + $0x2e] sm:$0x3] }
 0x427   :  { %v12405_v12 = vadd.f32 %v3643_v62, %v12283_v59  ;;  %7454 = vmatpush1.bf16.msra.mxu1 %v7325_v43  ;;  %v7615_v27 = vpop.permute.xlu1 %7614  ;;  %v3473_v54 = vpop.f32.mrb[83].mxu0  ;;  %7485 = vmatprep.mubr.bf16.mxu1 %v10063_v3 }
 0x428   :  { %v12416_v26 = vadd.f32 %v3644_v8, %v12290_v40  ;;  %v7626_v59 = vsel %vm1758_vm8, %v12297_v5, %v7615_v27  ;;  %v7627_v22 = vsel %vm1758_vm8, %v7615_v27, %v12342_v24  ;;  %v3938_v27 = vrot.slane %v12451_v18, %v11353_v52 }
 0x429   :  { %v7646_v49 = vsel %vm458_vm3, %v7626_v59, 0  ;;  %v3181_v30 = vpop.f32.mrb[72].mxu1  ;;  %9946 = vmatprep.subr.msk.bf16.mxu0 %vm458_vm3, %v7627_v22 }
 0x42a   :  { %v3317_v6 = vmul.f32 %v3286_v0, %v3181_v30  ;;  %v3183_v51 = vpop.f32.mrb[73].mxu1  ;;  %9943 = vmatmul.mubr.msk.bf16.vlgmr.msra.gmra.mrb[184].mxu0 %vm454_vm4, %v12412_v53  ;;  %v12428_v40 = vpop.permute.xlu0 %8258 }
 0x42b   :  { %v3318_v28 = vmul.f32 %v3290_v7, %v3183_v51  ;;  %v3185_v13 = vpop.f32.mrb[74].mxu1  ;;  %7740 = vmatpush1.bf16.msra.mxu0 %v7646_v49  ;;  %v7932_v31 = vpop.permute.xlu1 %7931  ;;  %7771 = vmatprep.mubr.bf16.mxu0 %v10063_v3  ;;  %v3614_v51 = vrot.slane %v12361_v4, %v11556_v48 }
 0x42c   :  { %v12440_v36 = vadd.f32 %v3317_v6, %v12352_v47  ;;  %v3186_v33 = vpop.f32.mrb[75].mxu1  ;;  %v3550_v38 = vpop.f32.mrb[84].mxu0 }
 0x42d   :  { %v12443_v34 = vadd.f32 %v3318_v28, %v12358_v41  ;;  %v3647_v21 = vmul.f32 %v3622_v50, %v3550_v38  ;;  %v3552_v9 = vpop.f32.mrb[85].mxu0  ;;  %v3306_v41 = vrot.slane %v12233_v20, %v11625_v44  ;;  %v7949_v20 = vsel %vm2086_vm9, %v7932_v31, %v12379_v32 }
 0x42e   :  { %v3648_v1 = vmul.f32 %v3626_v35, %v3552_v9  ;;  %9937 = vmatmul.mubr.msk.bf16.vlgmr.msra.gmra.mrb[180].mxu1 %vm454_vm4, %v12319_v39  ;;  %v12447_v2 = vpop.permute.xlu0 %7937  ;;  %v3554_v58 = vpop.f32.mrb[86].mxu0  ;;  %v7961_v22 = vsel %vm458_vm3, %v7949_v20, 0  ;;  %v9819_v20 = vld [vmem:[%s13438_s4 + $0x43] ss:$8 sm:$0xf] }
 0x42f   :  { %v12454_v47 = vadd.f32 %v3647_v21, %v12323_v37  ;;  %v7611_v42 = vpop.permute.xlu1 %7610  ;;  %v3555_v56 = vpop.f32.mrb[87].mxu0  ;;  %7730 = vmatprep.mubr.bf16.mxu1 %v10063_v3 }
 0x430   :  { %v12460_v39 = vadd.f32 %v3648_v1, %v12330_v19  ;;  %v7624_v60 = vsel %vm1758_vm8, %v12254_v55, %v7611_v42  ;;  %v7625_v62 = vsel %vm1758_vm8, %v7611_v42, %v12297_v5  ;;  %v3934_v55 = vrot.slane %v12451_v18, %v11346_v45 }
 0x431   :  { %v7640_v15 = vsel %vm458_vm3, %v7624_v60, 0  ;;  %v3263_v37 = vpop.f32.mrb[76].mxu1  ;;  %9944 = vmatprep.subr.msk.bf16.mxu1 %vm458_vm3, %v7625_v62 }
 0x432   :  { %v3321_v43 = vmul.f32 %v3302_v61, %v3263_v37  ;;  %v3265_v8 = vpop.f32.mrb[77].mxu1  ;;  %9947 = vmatmul.mubr.msk.bf16.vlgmr.msra.gmra.mrb[188].mxu0 %vm454_vm4, %v12412_v53  ;;  %7699 = vmatpush1.bf16.msra.mxu1 %v7640_v15  ;;  %v12472_v19 = vpop.permute.xlu0 %8262 }
 0x433   :  { %v3322_v5 = vmul.f32 %v3306_v41, %v3265_v8  ;;  %v3267_v0 = vpop.f32.mrb[78].mxu1  ;;  %v7936_v14 = vpop.permute.xlu1 %7935  ;;  %8016 = vmatprep.mubr.bf16.mxu0 %v10063_v3  ;;  %v3954_v41 = vrot.slane %v12451_v18, %v11410_v29 }
 0x434   :  { %v12480_v7 = vadd.f32 %v3321_v43, %v12386_v16  ;;  %v3268_v54 = vpop.f32.mrb[79].mxu1  ;;  %v7950_v59 = vsel %vm2086_vm9, %v12379_v32, %v7936_v14 }
 0x435   :  { %v12486_v49 = vadd.f32 %v3322_v5, %v12393_v57  ;;  %v3796_v30 = vpop.f32.mrb[88].mxu0  ;;  %9954 = vmatprep.subr.msk.bf16.mxu0 %vm458_vm3, %v7950_v59  ;;  %v3618_v57 = vrot.slane %v12361_v4, %v11574_v23  ;;  %v9820_v5 = vld [vmem:[%s13438_s4 + $0x43] ss:$8 sm:$0xf0] }
 0x436   :  { %v3971_v50 = vmul.f32 %v3934_v55, %v3796_v30  ;;  %v3798_v6 = vpop.f32.mrb[89].mxu0  ;;  %9945 = vmatmul.mubr.msk.bf16.vlgmr.msra.gmra.mrb[184].mxu1 %vm454_vm4, %v12412_v53  ;;  %7985 = vmatpush1.bf16.msra.mxu0 %v7961_v22  ;;  %v12491_v16 = vpop.permute.xlu0 %7945 }
 0x437   :  { %v3972_v32 = vmul.f32 %v3938_v27, %v3798_v6  ;;  %v7619_v35 = vpop.permute.xlu1 %7618  ;;  %v3800_v28 = vpop.f32.mrb[90].mxu0  ;;  %7812 = vmatprep.mubr.bf16.mxu1 %v10063_v3  ;;  %v3634_v27 = vrot.slane %v12361_v4, %v11625_v44 }
 0x438   :  { %v12504_v13 = vadd.f32 %v3971_v50, %v12405_v12  ;;  %v7628_v31 = vsel %vm1758_vm8, %v12342_v24, %v7619_v35  ;;  %v7629_v10 = vsel %vm1758_vm8, %v7619_v35, %v12366_v11  ;;  %v3801_v33 = vpop.f32.mrb[91].mxu0  ;;  %v3950_v24 = vrot.slane %v12451_v18, %v11402_v17 }
 0x439   :  { %v12511_v38 = vadd.f32 %v3972_v32, %v12416_v26  ;;  %v7652_v21 = vsel %vm458_vm3, %v7628_v31, 0  ;;  %v3509_v9 = vpop.f32.mrb[80].mxu1  ;;  %9948 = vmatprep.subr.msk.bf16.mxu1 %vm458_vm3, %v7629_v10  ;;  %v7951_v11 = vsel %vm2086_vm9, %v7936_v14, %v12447_v2 }
 0x43a   :  { %v3645_v1 = vmul.f32 %v3614_v51, %v3509_v9  ;;  %v3511_v61 = vpop.f32.mrb[81].mxu1  ;;  %9955 = vmatmul.mubr.msk.bf16.vlgmr.msra.gmra.mrb[192].mxu0 %vm454_vm4, %v12500_v25  ;;  %7781 = vmatpush1.bf16.msra.mxu1 %v7652_v21  ;;  %v12517_v12 = vpop.permute.xlu0 %8266  ;;  %v7967_v43 = vsel %vm458_vm3, %v7951_v11, 0  ;;  %v12563_v51 = vor.u32 %v9820_v5, %v9819_v20 }
 0x43b   :  { %v3646_v26 = vmul.f32 %v3618_v57, %v3511_v61  ;;  %v3513_v58 = vpop.f32.mrb[82].mxu1  ;;  %v7940_v42 = vpop.permute.xlu1 %7939  ;;  %8098 = vmatprep.mubr.bf16.mxu0 %v10063_v3  ;;  %v3946_v61 = vrot.slane %v12451_v18, %v11574_v23 }
 0x43c   :  { %v12527_v56 = vadd.f32 %v3645_v1, %v12440_v36  ;;  %v3514_v60 = vpop.f32.mrb[83].mxu1  ;;  %v7952_v62 = vsel %vm2086_vm9, %v12447_v2, %v7940_v42  ;;  %v7953_v36 = vsel %vm2086_vm9, %v7940_v42, %v12400_v63  ;;  %v4262_v21 = vrot.slane %v12563_v51, %v11346_v45 }
 0x43d   :  { %v12532_v15 = vadd.f32 %v3646_v26, %v12443_v34  ;;  %v3878_v37 = vpop.f32.mrb[92].mxu0  ;;  %9956 = vmatprep.subr.msk.bf16.mxu1 %vm458_vm3, %v7952_v62  ;;  %v3630_v34 = vrot.slane %v12361_v4, %v11613_v46  ;;  %v7973_v30 = vsel %vm458_vm3, %v7953_v36, 0 }
 0x43e   :  { %v3975_v8 = vmul.f32 %v3950_v24, %v3878_v37  ;;  %v3880_v55 = vpop.f32.mrb[93].mxu0  ;;  %9949 = vmatmul.mubr.msk.bf16.vlgmr.msra.gmra.mrb[188].mxu1 %vm454_vm4, %v12412_v53  ;;  %v12543_v2 = vpop.permute.xlu0 %8270 }
 0x43f   :  { %v3976_v0 = vmul.f32 %v3954_v41, %v3880_v55  ;;  %8026 = vmatpush1.bf16.msra.mxu1 %v7967_v43  ;;  %v7944_v14 = vpop.permute.xlu1 %7943  ;;  %8057 = vmatprep.mubr.bf16.mxu1 %v10063_v3  ;;  %v3882_v54 = vpop.f32.mrb[94].mxu0 }
 0x440   :  { %v12554_v53 = vadd.f32 %v3975_v8, %v12454_v47  ;;  %v7954_v59 = vsel %vm2086_vm9, %v12400_v63, %v7944_v14  ;;  %v3883_v22 = vpop.f32.mrb[95].mxu0  ;;  %v7955_v47 = vsel %vm2086_vm9, %v7944_v14, %v12491_v16 }
 0x441   :  { %v12560_v50 = vadd.f32 %v3976_v0, %v12460_v39  ;;  %v3591_v6 = vpop.f32.mrb[84].mxu1  ;;  %9958 = vmatprep.subr.msk.bf16.mxu0 %vm458_vm3, %v7954_v59  ;;  %v7979_v9 = vsel %vm458_vm3, %v7955_v47, 0 }
 0x442   :  { %v3649_v4 = vmul.f32 %v3630_v34, %v3591_v6  ;;  %v3593_v32 = vpop.f32.mrb[85].mxu1  ;;  %8067 = vmatpush1.bf16.msra.mxu0 %v7973_v30  ;;  %v12565_v35 = vpop.permute.xlu0 %8274  ;;  %v4282_v6 = vrot.slane %v12563_v51, %v11410_v29 }
 0x443   :  { %v3650_v63 = vmul.f32 %v3634_v27, %v3593_v32  ;;  %v3595_v57 = vpop.f32.mrb[86].mxu1  ;;  %v7948_v28 = vpop.permute.xlu1 %7947  ;;  %v9832_v32 = vld [vmem:[%s13438_s4 + $0x44] ss:$8 sm:$0xf0] }
 0x444   :  { %v12570_v31 = vadd.f32 %v3649_v4, %v12480_v7  ;;  %v3596_v39 = vpop.f32.mrb[87].mxu1  ;;  %v7956_v10 = vsel %vm2086_vm9, %v12491_v16, %v7948_v28  ;;  %v3942_v16 = vrot.slane %v12451_v18, %v11556_v48  ;;  %v9831_v4 = vld [vmem:[%s13438_s4 + $0x44] ss:$8 sm:$0xf] }
 0x445   :  { %v12575_v33 = vadd.f32 %v3650_v63, %v12486_v49  ;;  %9959 = vmatmul.mubr.msk.bf16.vlgmr.msra.gmra.mrb[196].mxu0 %vm454_vm4, %v12500_v25  ;;  %9960 = vmatprep.subr.msk.bf16.mxu1 %vm458_vm3, %v7956_v10  ;;  %v4266_v49 = vrot.slane %v12563_v51, %v11353_v52 }
 0x446   :  { %9957 = vmatmul.mubr.msk.bf16.vlgmr.msra.gmra.mrb[192].mxu1 %vm454_vm4, %v12500_v25  ;;  %v12585_v7 = vpop.permute.xlu0 %8587  ;;  %8343 = vmatprep.mubr.bf16.mxu0 %v10063_v3 }
 0x447   :  { %8108 = vmatpush1.bf16.msra.mxu1 %v7979_v9  ;;  %v8261_v1 = vpop.permute.xlu1 %8260  ;;  %8139 = vmatprep.mubr.bf16.mxu1 %v10063_v3 }
 0x448   :  { %v8276_v24 = vsel %vm2414_vm10, %v12428_v40, %v8261_v1  ;;  %v8277_v11 = vsel %vm2414_vm10, %v8261_v1, %v12472_v19  ;;  %v4124_v26 = vpop.f32.mrb[96].mxu0  ;;  %v12606_v40 = vld [vmem:[%s13437_s2 + $0x30] sm:$0x3] }
 0x449   :  { %v8288_v58 = vsel %vm458_vm3, %v8276_v24, 0  ;;  %v3837_v42 = vpop.f32.mrb[88].mxu1  ;;  %v4299_v41 = vmul.f32 %v4262_v21, %v4124_v26  ;;  %v4126_v60 = vpop.f32.mrb[97].mxu0  ;;  %9966 = vmatprep.subr.msk.bf16.mxu0 %vm458_vm3, %v8277_v11 }
 0x44a   :  { %v3973_v62 = vmul.f32 %v3942_v16, %v3837_v42  ;;  %v3839_v37 = vpop.f32.mrb[89].mxu1  ;;  %v4300_v20 = vmul.f32 %v4266_v49, %v4126_v60  ;;  %8312 = vmatpush1.bf16.msra.mxu0 %v8288_v58  ;;  %v12601_v43 = vpop.permute.xlu0 %8595  ;;  %v12654_v16 = vor.u32 %v9832_v32, %v9831_v4 }
 0x44b   :  { %v12609_v36 = vadd.f32 %v4299_v41, %v12504_v13  ;;  %v3974_v8 = vmul.f32 %v3946_v61, %v3839_v37  ;;  %v3841_v55 = vpop.f32.mrb[90].mxu1  ;;  %v8269_v34 = vpop.permute.xlu1 %8268  ;;  %v4274_v37 = vrot.slane %v12563_v51, %v11574_v23 }
 0x44c   :  { %v12612_v5 = vadd.f32 %v3973_v62, %v12527_v56  ;;  %v12615_v0 = vadd.f32 %v4300_v20, %v12511_v38  ;;  %v3842_v14 = vpop.f32.mrb[91].mxu1  ;;  %v8280_v27 = vsel %vm2414_vm10, %v12517_v12, %v8269_v34  ;;  %v8281_v54 = vsel %vm2414_vm10, %v8269_v34, %v12543_v2  ;;  %v4128_v59 = vpop.f32.mrb[98].mxu0 }
 0x44d   :  { %v12622_v13 = vadd.f32 %v3974_v8, %v12532_v15  ;;  %v8300_v22 = vsel %vm458_vm3, %v8280_v27, 0  ;;  %9967 = vmatmul.mubr.msk.bf16.vlgmr.msra.gmra.mrb[200].mxu0 %vm454_vm4, %v12606_v40  ;;  %9970 = vmatprep.subr.msk.bf16.mxu0 %vm458_vm3, %v8281_v54  ;;  %v4129_v38 = vpop.f32.mrb[99].mxu0  ;;  %v4278_v56 = vrot.slane %v12563_v51, %v11402_v17  ;;  %v3958_v15 = vrot.slane %v12451_v18, %v11613_v46 }
 0x44e   :  { %9961 = vmatmul.mubr.msk.bf16.vlgmr.msra.gmra.mrb[196].mxu1 %vm454_vm4, %v12500_v25  ;;  %8394 = vmatpush1.bf16.msra.mxu0 %v8300_v22  ;;  %v12632_v30 = vpop.permute.xlu0 %8591  ;;  %v3962_v25 = vrot.slane %v12451_v18, %v11625_v44 }
 0x44f   :  { %v8265_v47 = vpop.permute.xlu1 %8264  ;;  %8384 = vmatprep.mubr.bf16.mxu1 %v10063_v3  ;;  %8425 = vmatprep.mubr.bf16.mxu0 %v10063_v3 }
 0x450   :  { %v8278_v63 = vsel %vm2414_vm10, %v12472_v19, %v8265_v47  ;;  %v8279_v57 = vsel %vm2414_vm10, %v8265_v47, %v12517_v12  ;;  %v4206_v28 = vpop.f32.mrb[100].mxu0 }
 0x451   :  { %v8294_v39 = vsel %vm458_vm3, %v8278_v63, 0  ;;  %v3919_v10 = vpop.f32.mrb[92].mxu1  ;;  %v4303_v21 = vmul.f32 %v4278_v56, %v4206_v28  ;;  %v4208_v9 = vpop.f32.mrb[101].mxu0  ;;  %9968 = vmatprep.subr.msk.bf16.mxu1 %vm458_vm3, %v8279_v57 }
 0x452   :  { %v3977_v18 = vmul.f32 %v3958_v15, %v3919_v10  ;;  %v3921_v49 = vpop.f32.mrb[93].mxu1  ;;  %v4304_v1 = vmul.f32 %v4282_v6, %v4208_v9  ;;  %8353 = vmatpush1.bf16.msra.mxu1 %v8294_v39  ;;  %v12656_v61 = vpop.permute.xlu0 %8912  ;;  %v4290_v10 = vrot.slane %v12563_v51, %v11625_v44 }
 0x453   :  { %v12659_v19 = vadd.f32 %v4303_v21, %v12554_v53  ;;  %v3978_v12 = vmul.f32 %v3962_v25, %v3921_v49  ;;  %v3923_v24 = vpop.f32.mrb[94].mxu1  ;;  %v8586_v11 = vpop.permute.xlu1 %8585  ;;  %v4590_v53 = vrot.slane %v12654_v16, %v11346_v45 }
 0x454   :  { %v12662_v26 = vadd.f32 %v3977_v18, %v12570_v31  ;;  %v12665_v58 = vadd.f32 %v4304_v1, %v12560_v50  ;;  %v3924_v42 = vpop.f32.mrb[95].mxu1  ;;  %v4210_v41 = vpop.f32.mrb[102].mxu0  ;;  %v4270_v31 = vrot.slane %v12563_v51, %v11556_v48  ;;  %v4594_v50 = vrot.slane %v12654_v16, %v11353_v52 }
 0x455   :  { %v12668_v60 = vadd.f32 %v3978_v12, %v12575_v33  ;;  %9971 = vmatmul.mubr.msk.bf16.vlgmr.msra.gmra.mrb[204].mxu0 %vm454_vm4, %v12606_v40  ;;  %v4211_v62 = vpop.f32.mrb[103].mxu0  ;;  %v8603_v59 = vsel %vm2742_vm11, %v8586_v11, %v12585_v7  ;;  %v4606_v18 = vrot.slane %v12654_v16, %v11402_v17  ;;  %v4610_v24 = vrot.slane %v12654_v16, %v11410_v29  ;;  %v9843_v11 = vld [vmem:[%s13438_s4 + $0x45] ss:$8 sm:$0xf0] }
 0x456   :  { %9969 = vmatmul.mubr.msk.bf16.vlgmr.msra.gmra.mrb[200].mxu1 %vm454_vm4, %v12606_v40  ;;  %8670 = vmatprep.mubr.bf16.mxu0 %v10063_v3  ;;  %v12692_v22 = vpop.permute.xlu0 %8599  ;;  %v8615_v28 = vsel %vm458_vm3, %v8603_v59, 0  ;;  %v4602_v59 = vrot.slane %v12654_v16, %v11574_v23 }
 0x457   :  { %v8273_v33 = vpop.permute.xlu1 %8272  ;;  %8466 = vmatprep.mubr.bf16.mxu1 %v10063_v3 }
 0x458   :  { %v8282_v20 = vsel %vm2414_vm10, %v12543_v2, %v8273_v33  ;;  %v8283_v8 = vsel %vm2414_vm10, %v8273_v33, %v12565_v35  ;;  %v4452_v55 = vpop.f32.mrb[104].mxu0 }
 0x459   :  { %v8306_v34 = vsel %vm458_vm3, %v8282_v20, 0  ;;  %v4165_v14 = vpop.f32.mrb[96].mxu1  ;;  %v4627_v27 = vmul.f32 %v4590_v53, %v4452_v55  ;;  %v4454_v54 = vpop.f32.mrb[105].mxu0  ;;  %9972 = vmatprep.subr.msk.bf16.mxu1 %vm458_vm3, %v8283_v8 }
 0x45a   :  { %v4301_v38 = vmul.f32 %v4270_v31, %v4165_v14  ;;  %v4167_v56 = vpop.f32.mrb[97].mxu1  ;;  %v4628_v15 = vmul.f32 %v4594_v50, %v4454_v54  ;;  %8435 = vmatpush1.bf16.msra.mxu1 %v8306_v34  ;;  %v4456_v57 = vpop.f32.mrb[106].mxu0 }
 0x45b   :  { %v12695_v2 = vadd.f32 %v4627_v27, %v12609_v36  ;;  %v4302_v35 = vmul.f32 %v4274_v37, %v4167_v56  ;;  %v4169_v6 = vpop.f32.mrb[98].mxu1  ;;  %v8590_v4 = vpop.permute.xlu1 %8589 }
 0x45c   :  { %v12698_v32 = vadd.f32 %v4301_v38, %v12612_v5  ;;  %v12701_v47 = vadd.f32 %v4628_v15, %v12615_v0  ;;  %v4170_v25 = vpop.f32.mrb[99].mxu1  ;;  %v8604_v63 = vsel %vm2742_vm11, %v12585_v7, %v8590_v4  ;;  %v4457_v36 = vpop.f32.mrb[107].mxu0  ;;  %v8605_v5 = vsel %vm2742_vm11, %v8590_v4, %v12632_v30  ;;  %v12719_v7 = vld [vmem:[%s13437_s2 + $0x32] sm:$0x3] }
 0x45d   :  { %v12707_v39 = vadd.f32 %v4302_v35, %v12622_v13  ;;  %9978 = vmatprep.subr.msk.bf16.mxu0 %vm458_vm3, %v8604_v63  ;;  %v4286_v0 = vrot.slane %v12563_v51, %v11613_v46  ;;  %v9842_v51 = vld [vmem:[%s13438_s4 + $0x45] ss:$8 sm:$0xf]  ;;  %v12735_v49 = vpop.permute.xlu0 %8916 }
 0x45e   :  { %9973 = vmatmul.mubr.msk.bf16.vlgmr.msra.gmra.mrb[204].mxu1 %vm454_vm4, %v12606_v40  ;;  %8639 = vmatpush1.bf16.msra.mxu0 %v8615_v28  ;;  %v8621_v40 = vsel %vm458_vm3, %v8605_v5, 0  ;;  %v12755_v34 = vor.u32 %v9843_v11, %v9842_v51 }
 0x45f   :  { %v8594_v13 = vpop.permute.xlu1 %8593  ;;  %8711 = vmatprep.mubr.bf16.mxu1 %v10063_v3 }
 0x460   :  { %v8606_v21 = vsel %vm2742_vm11, %v12632_v30, %v8594_v13  ;;  %v8607_v30 = vsel %vm2742_vm11, %v8594_v13, %v12601_v43 }
 0x461   :  { %v4247_v9 = vpop.f32.mrb[100].mxu1  ;;  %9979 = vmatmul.mubr.msk.bf16.vlgmr.msra.gmra.mrb[208].mxu0 %vm454_vm4, %v12719_v7  ;;  %9980 = vmatprep.subr.msk.bf16.mxu1 %vm458_vm3, %v8606_v21  ;;  %v8627_v37 = vsel %vm458_vm3, %v8607_v30, 0  ;;  %v8921_v4 = vpop.permute.xlu0 %8920 }
 0x462   :  { %v4305_v1 = vmul.f32 %v4286_v0, %v4247_v9  ;;  %v4249_v12 = vpop.f32.mrb[101].mxu1  ;;  %8680 = vmatpush1.bf16.msra.mxu1 %v8621_v40  ;;  %8752 = vmatprep.mubr.bf16.mxu0 %v10063_v3 }
 0x463   :  { %v4306_v42 = vmul.f32 %v4290_v10, %v4249_v12  ;;  %v4251_v41 = vpop.f32.mrb[102].mxu1  ;;  %v8598_v62 = vpop.permute.xlu1 %8597  ;;  %v4618_v12 = vrot.slane %v12654_v16, %v11625_v44 }
 0x464   :  { %v12746_v53 = vadd.f32 %v4305_v1, %v12662_v26  ;;  %v4252_v31 = vpop.f32.mrb[103].mxu1  ;;  %v8608_v50 = vsel %vm2742_vm11, %v12601_v43, %v8598_v62  ;;  %v4534_v33 = vpop.f32.mrb[108].mxu0  ;;  %v8609_v26 = vsel %vm2742_vm11, %v8598_v62, %v12692_v22  ;;  %v4598_v43 = vrot.slane %v12654_v16, %v11556_v48 }
 0x465   :  { %v12752_v20 = vadd.f32 %v4306_v42, %v12668_v60  ;;  %v4631_v8 = vmul.f32 %v4606_v18, %v4534_v33  ;;  %v4536_v55 = vpop.f32.mrb[109].mxu0  ;;  %9982 = vmatprep.subr.msk.bf16.mxu0 %vm458_vm3, %v8608_v50  ;;  %v8633_v35 = vsel %vm458_vm3, %v8609_v26, 0  ;;  %v8925_v41 = vpop.permute.xlu0 %8924  ;;  %v4902_v50 = vrot.slane %v12755_v34, %v11410_v29  ;;  %v9855_v33 = vld [vmem:[%s13438_s4 + $0x46] ss:$8 sm:$0xf0] }
 0x466   :  { %v4632_v14 = vmul.f32 %v4610_v24, %v4536_v55  ;;  %9981 = vmatmul.mubr.msk.bf16.vlgmr.msra.gmra.mrb[208].mxu1 %vm454_vm4, %v12719_v7  ;;  %8721 = vmatpush1.bf16.msra.mxu0 %v8627_v37  ;;  %v4538_v27 = vpop.f32.mrb[110].mxu0 }
 0x467   :  { %v12764_v60 = vadd.f32 %v4631_v8, %v12659_v19  ;;  %v8602_v54 = vpop.permute.xlu1 %8601  ;;  %v4539_v38 = vpop.f32.mrb[111].mxu0  ;;  %8793 = vmatprep.mubr.bf16.mxu1 %v10063_v3  ;;  %v4882_v19 = vrot.slane %v12755_v34, %v11346_v45 }
 0x468   :  { %v12770_v56 = vadd.f32 %v4632_v14, %v12665_v58  ;;  %v8610_v15 = vsel %vm2742_vm11, %v12692_v22, %v8602_v54  ;;  %v4886_v58 = vrot.slane %v12755_v34, %v11353_v52 }
 0x469   :  { %v4493_v6 = vpop.f32.mrb[104].mxu1  ;;  %9983 = vmatmul.mubr.msk.bf16.vlgmr.msra.gmra.mrb[212].mxu0 %vm454_vm4, %v12719_v7  ;;  %9984 = vmatprep.subr.msk.bf16.mxu1 %vm458_vm3, %v8610_v15 }
 0x46a   :  { %v4629_v25 = vmul.f32 %v4598_v43, %v4493_v6  ;;  %v4495_v63 = vpop.f32.mrb[105].mxu1  ;;  %8762 = vmatpush1.bf16.msra.mxu1 %v8633_v35  ;;  %8997 = vmatprep.mubr.bf16.mxu0 %v10063_v3  ;;  %v8929_v6 = vpop.permute.xlu0 %8928 }
 0x46b   :  { %v4630_v22 = vmul.f32 %v4602_v59, %v4495_v63  ;;  %v4497_v57 = vpop.f32.mrb[106].mxu1  ;;  %v8915_v28 = vpop.permute.xlu1 %8914 }
 0x46c   :  { %v12784_v36 = vadd.f32 %v4629_v25, %v12698_v32  ;;  %v4498_v5 = vpop.f32.mrb[107].mxu1  ;;  %v8930_v0 = vsel %vm3070_vm12, %v12656_v61, %v8915_v28  ;;  %v8931_v13 = vsel %vm3070_vm12, %v8915_v28, %v12735_v49  ;;  %v4744_v10 = vpop.f32.mrb[112].mxu0  ;;  %v4614_v61 = vrot.slane %v12654_v16, %v11613_v46  ;;  %v12802_v32 = vld [vmem:[%s13437_s2 + $0x34] sm:$0x3] }
 0x46d   :  { %v12791_v21 = vadd.f32 %v4630_v22, %v12707_v39  ;;  %v8942_v40 = vsel %vm458_vm3, %v8930_v0, 0  ;;  %v4919_v9 = vmul.f32 %v4882_v19, %v4744_v10  ;;  %v4746_v18 = vpop.f32.mrb[113].mxu0  ;;  %9990 = vmatprep.subr.msk.bf16.mxu0 %vm458_vm3, %v8931_v13  ;;  %v4898_v16 = vrot.slane %v12755_v34, %v11402_v17 }
 0x46e   :  { %v4920_v51 = vmul.f32 %v4886_v58, %v4746_v18  ;;  %9985 = vmatmul.mubr.msk.bf16.vlgmr.msra.gmra.mrb[212].mxu1 %vm454_vm4, %v12719_v7  ;;  %8966 = vmatpush1.bf16.msra.mxu0 %v8942_v40  ;;  %v4748_v39 = vpop.f32.mrb[114].mxu0  ;;  %v4894_v58 = vrot.slane %v12755_v34, %v11574_v23 }
 0x46f   :  { %v12805_v30 = vadd.f32 %v4919_v9, %v12695_v2  ;;  %v8919_v1 = vpop.permute.xlu1 %8918  ;;  %v4749_v24 = vpop.f32.mrb[115].mxu0  ;;  %9038 = vmatprep.mubr.bf16.mxu1 %v10063_v3 }
 0x470   :  { %v12811_v7 = vadd.f32 %v4920_v51, %v12701_v47  ;;  %v8932_v11 = vsel %vm3070_vm12, %v12735_v49, %v8919_v1  ;;  %v8933_v42 = vsel %vm3070_vm12, %v8919_v1, %v8921_v4  ;;  %v9854_v47 = vld [vmem:[%s13438_s4 + $0x46] ss:$8 sm:$0xf] }
 0x471   :  { %v8948_v62 = vsel %vm458_vm3, %v8932_v11, 0  ;;  %v4575_v2 = vpop.f32.mrb[108].mxu1  ;;  %9991 = vmatmul.mubr.msk.bf16.vlgmr.msra.gmra.mrb[216].mxu0 %vm454_vm4, %v12802_v32  ;;  %9992 = vmatprep.subr.msk.bf16.mxu1 %vm458_vm3, %v8933_v42  ;;  %v12837_v19 = vor.u32 %v9855_v33, %v9854_v47  ;;  %v4906_v42 = vrot.slane %v12755_v34, %v11613_v46  ;;  %v9867_v33 = vld [vmem:[%s13438_s4 + $0x47] ss:$8 sm:$0xf0] }
 0x472   :  { %v4633_v31 = vmul.f32 %v4614_v61, %v4575_v2  ;;  %v4577_v49 = vpop.f32.mrb[109].mxu1  ;;  %9007 = vmatpush1.bf16.msra.mxu1 %v8948_v62  ;;  %9079 = vmatprep.mubr.bf16.mxu0 %v10063_v3  ;;  %v4910_v2 = vrot.slane %v12755_v34, %v11625_v44 }
 0x473   :  { %v4634_v37 = vmul.f32 %v4618_v12, %v4577_v49  ;;  %v4579_v8 = vpop.f32.mrb[110].mxu1  ;;  %v8923_v55 = vpop.permute.xlu1 %8922  ;;  %v9866_v49 = vld [vmem:[%s13438_s4 + $0x47] ss:$8 sm:$0xf] }
 0x474   :  { %v4641_v26 = vadd.f32 %v4633_v31, %v12746_v53  ;;  %v4580_v14 = vpop.f32.mrb[111].mxu1  ;;  %v8934_v43 = vsel %vm3070_vm12, %v8921_v4, %v8923_v55  ;;  %v8935_v27 = vsel %vm3070_vm12, %v8923_v55, %v8925_v41  ;;  %v4826_v54 = vpop.f32.mrb[116].mxu0  ;;  %v4890_v53 = vrot.slane %v12755_v34, %v11556_v48 }
 0x475   :  { %v4642_v59 = vadd.f32 %v4634_v37, %v12752_v20  ;;  %v8954_v38 = vsel %vm458_vm3, %v8934_v43, 0  ;;  %v4923_v15 = vmul.f32 %v4898_v16, %v4826_v54  ;;  %v4828_v35 = vpop.f32.mrb[117].mxu0  ;;  %9994 = vmatprep.subr.msk.bf16.mxu0 %vm458_vm3, %v8935_v27  ;;  %v5230_v34 = vrot.slane %v12837_v19, %v11410_v29 }
 0x476   :  { %v4924_v25 = vmul.f32 %v4902_v50, %v4828_v35  ;;  %9993 = vmatmul.mubr.msk.bf16.vlgmr.msra.gmra.mrb[216].mxu1 %vm454_vm4, %v12802_v32  ;;  %9048 = vmatpush1.bf16.msra.mxu0 %v8954_v38  ;;  %v4830_v4 = vpop.f32.mrb[118].mxu0  ;;  %v5218_v27 = vrot.slane %v12837_v19, %v11556_v48  ;;  %v12882_v54 = vor.u32 %v9867_v33, %v9866_v49 }
 0x477   :  { %v4931_v20 = vadd.f32 %v4923_v15, %v12764_v60  ;;  %v8927_v63 = vpop.permute.xlu1 %8926  ;;  %v4831_v22 = vpop.f32.mrb[119].mxu0  ;;  %9120 = vmatprep.mubr.bf16.mxu1 %v10063_v3  ;;  %v5210_v60 = vrot.slane %v12837_v19, %v11346_v45  ;;  %v5222_v15 = vrot.slane %v12837_v19, %v11574_v23 }
 0x478   :  { %v4932_v57 = vadd.f32 %v4924_v25, %v12770_v56  ;;  %v8936_v28 = vsel %vm3070_vm12, %v8925_v41, %v8927_v63  ;;  %v8937_v5 = vsel %vm3070_vm12, %v8927_v63, %v8929_v6  ;;  %v5214_v56 = vrot.slane %v12837_v19, %v11353_v52 }
 0x479   :  { %v8960_v0 = vsel %vm458_vm3, %v8936_v28, 0  ;;  %v4785_v13 = vpop.f32.mrb[112].mxu1  ;;  %9995 = vmatmul.mubr.msk.bf16.vlgmr.msra.gmra.mrb[220].mxu0 %vm454_vm4, %v12802_v32  ;;  %9996 = vmatprep.subr.msk.bf16.mxu1 %vm458_vm3, %v8937_v5  ;;  %v5542_v28 = vrot.slane %v12882_v54, %v11353_v52 }
 0x47a   :  { %v4921_v10 = vmul.f32 %v4890_v53, %v4785_v13  ;;  %v4787_v40 = vpop.f32.mrb[113].mxu1  ;;  %9089 = vmatpush1.bf16.msra.mxu1 %v8960_v0  ;;  %9352 = vmatprep.mubr.bf16.mxu0 %v10063_v3 }
 0x47b   :  { %v4922_v9 = vmul.f32 %v4894_v58, %v4787_v40  ;;  %v4789_v18 = vpop.f32.mrb[114].mxu1 }
 0x47c   :  { %v4929_v51 = vadd.f32 %v4921_v10, %v12784_v36  ;;  %v4790_v61 = vpop.f32.mrb[115].mxu1  ;;  %v5072_v39 = vpop.f32.mrb[120].mxu0 }
 0x47d   :  { %v4930_v1 = vadd.f32 %v4922_v9, %v12791_v21  ;;  %v5247_v12 = vmul.f32 %v5210_v60, %v5072_v39  ;;  %v5074_v24 = vpop.f32.mrb[121].mxu0 }
 0x47e   :  { %v5248_v11 = vmul.f32 %v5214_v56, %v5074_v24  ;;  %9997 = vmatmul.mubr.msk.bf16.vlgmr.msra.gmra.mrb[220].mxu1 %vm454_vm4, %v12802_v32  ;;  %v5076_v41 = vpop.f32.mrb[122].mxu0  ;;  %v5226_v32 = vrot.slane %v12837_v19, %v11402_v17  ;;  %v5238_v56 = vrot.slane %v12837_v19, %v11625_v44 }
 0x47f   :  { %v5255_v62 = vadd.f32 %v5247_v12, %v12805_v30  ;;  %v5077_v36 = vpop.f32.mrb[123].mxu0  ;;  %9395 = vmatprep.mubr.bf16.mxu1 %v10063_v3 }
 0x480   :  { %v5256_v21 = vadd.f32 %v5248_v11, %v12811_v7 }
 0x481   :  { %v4867_v16 = vpop.f32.mrb[116].mxu1 }
 0x482   :  { %v4925_v47 = vmul.f32 %v4906_v42, %v4867_v16  ;;  %v4869_v31 = vpop.f32.mrb[117].mxu1 }
 0x483   :  { %v4926_v50 = vmul.f32 %v4910_v2, %v4869_v31  ;;  %v4871_v30 = vpop.f32.mrb[118].mxu1  ;;  %v5558_v2 = vrot.slane %v12882_v54, %v11410_v29 }
 0x484   :  { %v4933_v7 = vadd.f32 %v4925_v47, %v4641_v26  ;;  %v4872_v37 = vpop.f32.mrb[119].mxu1  ;;  %v5550_v30 = vrot.slane %v12882_v54, %v11574_v23 }
 0x485   :  { %v4934_v8 = vadd.f32 %v4926_v50, %v4642_v59  ;;  %v5154_v55 = vpop.f32.mrb[124].mxu0  ;;  %v5538_v59 = vrot.slane %v12882_v54, %v11346_v45 }
 0x486   :  { %v5251_v14 = vmul.f32 %v5226_v32, %v5154_v55  ;;  %v5156_v43 = vpop.f32.mrb[125].mxu0  ;;  %v5546_v32 = vrot.slane %v12882_v54, %v11556_v48 }
 0x487   :  { %v5252_v38 = vmul.f32 %v5230_v34, %v5156_v43  ;;  %v5158_v35 = vpop.f32.mrb[126].mxu0 }
 0x488   :  { %v5259_v6 = vadd.f32 %v5251_v14, %v4931_v20  ;;  %v5159_v25 = vpop.f32.mrb[127].mxu0  ;;  %v5234_v20 = vrot.slane %v12837_v19, %v11613_v46  ;;  %v9879_v19 = vld [vmem:[%s13438_s4 + $0x80] ss:$8 sm:$0xf0] }
 0x489   :  { %v5260_v53 = vadd.f32 %v5252_v38, %v4932_v57  ;;  %v5113_v4 = vpop.f32.mrb[120].mxu1 }
 0x48a   :  { %v5249_v26 = vmul.f32 %v5218_v27, %v5113_v4  ;;  %v5115_v63 = vpop.f32.mrb[121].mxu1 }
 0x48b   :  { %v5250_v58 = vmul.f32 %v5222_v15, %v5115_v63  ;;  %v5117_v22 = vpop.f32.mrb[122].mxu1 }
 0x48c   :  { %v5257_v5 = vadd.f32 %v5249_v26, %v4929_v51  ;;  %v5118_v0 = vpop.f32.mrb[123].mxu1  ;;  %v5554_v51 = vrot.slane %v12882_v54, %v11402_v17 }
 0x48d   :  { %v5258_v13 = vadd.f32 %v5250_v58, %v4930_v1  ;;  %v5400_v60 = vpop.f32.mrb[128].mxu0  ;;  %v9878_v1 = vld [vmem:[%s13438_s4 + $0x80] ss:$8 sm:$0xf]  ;;  %v5566_v58 = vrot.slane %v12882_v54, %v11625_v44 }
 0x48e   :  { %v5575_v10 = vmul.f32 %v5538_v59, %v5400_v60  ;;  %v5402_v40 = vpop.f32.mrb[129].mxu0  ;;  %v12906_v49 = vor.u32 %v9879_v19, %v9878_v1 }
 0x48f   :  { %v5576_v57 = vmul.f32 %v5542_v28, %v5402_v40  ;;  %v5404_v9 = vpop.f32.mrb[130].mxu0 }
 0x490   :  { %v5583_v18 = vadd.f32 %v5575_v10, %v5255_v62  ;;  %v5405_v61 = vpop.f32.mrb[131].mxu0  ;;  %v5870_v15 = vrot.slane %v12906_v49, %v11353_v52  ;;  %v5886_v9 = vrot.slane %v12906_v49, %v11410_v29 }
 0x491   :  { %v5584_v39 = vadd.f32 %v5576_v57, %v5256_v21  ;;  %v5195_v12 = vpop.f32.mrb[124].mxu1 }
 0x492   :  { %v5253_v24 = vmul.f32 %v5234_v20, %v5195_v12  ;;  %v5197_v11 = vpop.f32.mrb[125].mxu1 }
 0x493   :  { %v5254_v42 = vmul.f32 %v5238_v56, %v5197_v11  ;;  %v5199_v41 = vpop.f32.mrb[126].mxu1 }
 0x494   :  { %v5261_v62 = vadd.f32 %v5253_v24, %v4933_v7  ;;  %v5200_v36 = vpop.f32.mrb[127].mxu1  ;;  %v5878_v41 = vrot.slane %v12906_v49, %v11574_v23 }
 0x495   :  { %v5262_v21 = vadd.f32 %v5254_v42, %v4934_v8  ;;  %v5482_v16 = vpop.f32.mrb[132].mxu0  ;;  %v5866_v8 = vrot.slane %v12906_v49, %v11346_v45 }
 0x496   :  { %v5579_v47 = vmul.f32 %v5554_v51, %v5482_v16  ;;  %v5484_v31 = vpop.f32.mrb[133].mxu0  ;;  %v5874_v51 = vrot.slane %v12906_v49, %v11556_v48 }
 0x497   :  { %v5580_v50 = vmul.f32 %v5558_v2, %v5484_v31  ;;  %v5486_v34 = vpop.f32.mrb[134].mxu0 }
 0x498   :  { %v5587_v33 = vadd.f32 %v5579_v47, %v5259_v6  ;;  %v5487_v37 = vpop.f32.mrb[135].mxu0  ;;  %v5562_v6 = vrot.slane %v12882_v54, %v11613_v46  ;;  %v9891_v54 = vld [vmem:[%s13438_s4 + $0x81] ss:$8 sm:$0xf0] }
 0x499   :  { %v5588_v55 = vadd.f32 %v5580_v50, %v5260_v53  ;;  %v5441_v14 = vpop.f32.mrb[128].mxu1 }
 0x49a   :  { %v5577_v7 = vmul.f32 %v5546_v32, %v5441_v14  ;;  %v5443_v43 = vpop.f32.mrb[129].mxu1 }
 0x49b   :  { %v5578_v27 = vmul.f32 %v5550_v30, %v5443_v43  ;;  %v5445_v38 = vpop.f32.mrb[130].mxu1 }
 0x49c   :  { %v5585_v35 = vadd.f32 %v5577_v7, %v5257_v5  ;;  %v5446_v25 = vpop.f32.mrb[131].mxu1  ;;  %v5882_v5 = vrot.slane %v12906_v49, %v11402_v17 }
 0x49d   :  { %v5586_v4 = vadd.f32 %v5578_v27, %v5258_v13  ;;  %v5728_v26 = vpop.f32.mrb[136].mxu0  ;;  %v9890_v13 = vld [vmem:[%s13438_s4 + $0x81] ss:$8 sm:$0xf]  ;;  %v5894_v27 = vrot.slane %v12906_v49, %v11625_v44 }
 0x49e   :  { %v5903_v63 = vmul.f32 %v5866_v8, %v5728_v26  ;;  %v5730_v59 = vpop.f32.mrb[137].mxu0  ;;  %v12930_v1 = vor.u32 %v9891_v54, %v9890_v13 }
 0x49f   :  { %v5904_v53 = vmul.f32 %v5870_v15, %v5730_v59  ;;  %v5732_v22 = vpop.f32.mrb[138].mxu0 }
 0x4a0   :  { %v5911_v28 = vadd.f32 %v5903_v63, %v5583_v18  ;;  %v5733_v0 = vpop.f32.mrb[139].mxu0  ;;  %v6198_v30 = vrot.slane %v12930_v1, %v11353_v52  ;;  %v6214_v22 = vrot.slane %v12930_v1, %v11410_v29 }
 0x4a1   :  { %v5912_v60 = vadd.f32 %v5904_v53, %v5584_v39  ;;  %v5523_v10 = vpop.f32.mrb[132].mxu1 }
 0x4a2   :  { %v5581_v40 = vmul.f32 %v5562_v6, %v5523_v10  ;;  %v5525_v20 = vpop.f32.mrb[133].mxu1 }
 0x4a3   :  { %v5582_v57 = vmul.f32 %v5566_v58, %v5525_v20  ;;  %v5527_v56 = vpop.f32.mrb[134].mxu1 }
 0x4a4   :  { %v5589_v18 = vadd.f32 %v5581_v40, %v5261_v62  ;;  %v5528_v61 = vpop.f32.mrb[135].mxu1  ;;  %v6206_v56 = vrot.slane %v12930_v1, %v11574_v23 }
 0x4a5   :  { %v5590_v39 = vadd.f32 %v5582_v57, %v5262_v21  ;;  %v5810_v12 = vpop.f32.mrb[140].mxu0  ;;  %v6194_v21 = vrot.slane %v12930_v1, %v11346_v45 }
 0x4a6   :  { %v5907_v24 = vmul.f32 %v5882_v5, %v5810_v12  ;;  %v5812_v11 = vpop.f32.mrb[141].mxu0  ;;  %v6202_v5 = vrot.slane %v12930_v1, %v11556_v48 }
 0x4a7   :  { %v5908_v42 = vmul.f32 %v5886_v9, %v5812_v11  ;;  %v5814_v2 = vpop.f32.mrb[142].mxu0 }
 0x4a8   :  { %v5915_v19 = vadd.f32 %v5907_v24, %v5587_v33  ;;  %v5815_v36 = vpop.f32.mrb[143].mxu0  ;;  %v5890_v33 = vrot.slane %v12906_v49, %v11613_v46  ;;  %v9903_v49 = vld [vmem:[%s13438_s4 + $0x82] ss:$8 sm:$0xf0] }
 0x4a9   :  { %v5916_v16 = vadd.f32 %v5908_v42, %v5588_v55  ;;  %v5769_v47 = vpop.f32.mrb[136].mxu1 }
 0x4aa   :  { %v5905_v62 = vmul.f32 %v5874_v51, %v5769_v47  ;;  %v5771_v31 = vpop.f32.mrb[137].mxu1 }
 0x4ab   :  { %v5906_v32 = vmul.f32 %v5878_v41, %v5771_v31  ;;  %v5773_v50 = vpop.f32.mrb[138].mxu1 }
 0x4ac   :  { %v5913_v34 = vadd.f32 %v5905_v62, %v5585_v35  ;;  %v5774_v37 = vpop.f32.mrb[139].mxu1  ;;  %v6210_v35 = vrot.slane %v12930_v1, %v11402_v17 }
 0x4ad   :  { %v5914_v14 = vadd.f32 %v5906_v32, %v5586_v4  ;;  %v6056_v7 = vpop.f32.mrb[144].mxu0  ;;  %v9902_v4 = vld [vmem:[%s13438_s4 + $0x82] ss:$8 sm:$0xf]  ;;  %v6222_v32 = vrot.slane %v12930_v1, %v11625_v44 }
 0x4ae   :  { %v6231_v43 = vmul.f32 %v6194_v21, %v6056_v7  ;;  %v6058_v8 = vpop.f32.mrb[145].mxu0  ;;  %v12954_v13 = vor.u32 %v9903_v49, %v9902_v4 }
 0x4af   :  { %v6232_v55 = vmul.f32 %v6198_v30, %v6058_v8  ;;  %v6060_v38 = vpop.f32.mrb[146].mxu0 }
 0x4b0   :  { %v6239_v15 = vadd.f32 %v6231_v43, %v5911_v28  ;;  %v6061_v25 = vpop.f32.mrb[147].mxu0  ;;  %v6525_v41 = vrot.slane %v12954_v13, %v11353_v52  ;;  %v6541_v38 = vrot.slane %v12954_v13, %v11410_v29 }
 0x4b1   :  { %v6240_v26 = vadd.f32 %v6232_v55, %v5912_v60  ;;  %v5851_v63 = vpop.f32.mrb[140].mxu1 }
 0x4b2   :  { %v5909_v59 = vmul.f32 %v5890_v33, %v5851_v63  ;;  %v5853_v6 = vpop.f32.mrb[141].mxu1 }
 0x4b3   :  { %v5910_v53 = vmul.f32 %v5894_v27, %v5853_v6  ;;  %v5855_v58 = vpop.f32.mrb[142].mxu1 }
 0x4b4   :  { %v5917_v28 = vadd.f32 %v5909_v59, %v5589_v18  ;;  %v5856_v0 = vpop.f32.mrb[143].mxu1  ;;  %v6533_v58 = vrot.slane %v12954_v13, %v11574_v23 }
 0x4b5   :  { %v5918_v60 = vadd.f32 %v5910_v53, %v5590_v39  ;;  %v6138_v10 = vpop.f32.mrb[148].mxu0  ;;  %v6521_v39 = vrot.slane %v12954_v13, %v11346_v45 }
 0x4b6   :  { %v6235_v40 = vmul.f32 %v6210_v35, %v6138_v10  ;;  %v6140_v20 = vpop.f32.mrb[149].mxu0  ;;  %v6529_v35 = vrot.slane %v12954_v13, %v11556_v48 }
 0x4b7   :  { %v6236_v57 = vmul.f32 %v6214_v22, %v6140_v20  ;;  %v6142_v9 = vpop.f32.mrb[150].mxu0 }
 0x4b8   :  { %v6243_v54 = vadd.f32 %v6235_v40, %v5915_v19  ;;  %v6143_v61 = vpop.f32.mrb[151].mxu0  ;;  %v6218_v19 = vrot.slane %v12930_v1, %v11613_v46  ;;  %v9915_v1 = vld [vmem:[%s13438_s4 + $0x83] ss:$8 sm:$0xf0] }
 0x4b9   :  { %v6244_v12 = vadd.f32 %v6236_v57, %v5916_v16  ;;  %v6097_v24 = vpop.f32.mrb[144].mxu1 }
 0x4ba   :  { %v6233_v18 = vmul.f32 %v6202_v5, %v6097_v24  ;;  %v6099_v11 = vpop.f32.mrb[145].mxu1 }
 0x4bb   :  { %v6234_v51 = vmul.f32 %v6206_v56, %v6099_v11  ;;  %v6101_v42 = vpop.f32.mrb[146].mxu1 }
 0x4bc   :  { %v6241_v2 = vadd.f32 %v6233_v18, %v5913_v34  ;;  %v6102_v36 = vpop.f32.mrb[147].mxu1  ;;  %v6537_v34 = vrot.slane %v12954_v13, %v11402_v17 }
 0x4bd   :  { %v6242_v47 = vadd.f32 %v6234_v51, %v5914_v14  ;;  %v6383_v62 = vpop.f32.mrb[152].mxu0  ;;  %v9914_v14 = vld [vmem:[%s13438_s4 + $0x83] ss:$8 sm:$0xf]  ;;  %v6549_v51 = vrot.slane %v12954_v13, %v11625_v44 }
 0x4be   :  { %v6558_v31 = vmul.f32 %v6521_v39, %v6383_v62  ;;  %v6385_v21 = vpop.f32.mrb[153].mxu0  ;;  %v12978_v4 = vor.u32 %v9915_v1, %v9914_v14 }
 0x4bf   :  { %v6559_v16 = vmul.f32 %v6525_v41, %v6385_v21  ;;  %v6387_v50 = vpop.f32.mrb[154].mxu0 }
 0x4c0   :  { %v6566_v30 = vadd.f32 %v6558_v31, %v6239_v15  ;;  %v6388_v37 = vpop.f32.mrb[155].mxu0  ;;  %v6852_v56 = vrot.slane %v12978_v4, %v11353_v52  ;;  %v6868_v50 = vrot.slane %v12978_v4, %v11410_v29 }
 0x4c1   :  { %v6567_v7 = vadd.f32 %v6559_v16, %v6240_v26  ;;  %v6179_v43 = vpop.f32.mrb[148].mxu1 }
 0x4c2   :  { %v6237_v8 = vmul.f32 %v6218_v19, %v6179_v43  ;;  %v6181_v33 = vpop.f32.mrb[149].mxu1 }
 0x4c3   :  { %v6238_v55 = vmul.f32 %v6222_v32, %v6181_v33  ;;  %v6183_v27 = vpop.f32.mrb[150].mxu1 }
 0x4c4   :  { %v6245_v15 = vadd.f32 %v6237_v8, %v5917_v28  ;;  %v6184_v25 = vpop.f32.mrb[151].mxu1  ;;  %v6860_v27 = vrot.slane %v12978_v4, %v11574_v23 }
 0x4c5   :  { %v6246_v26 = vadd.f32 %v6238_v55, %v5918_v60  ;;  %v6465_v63 = vpop.f32.mrb[156].mxu0  ;;  %v6848_v60 = vrot.slane %v12978_v4, %v11346_v45 }
 0x4c6   :  { %v6562_v59 = vmul.f32 %v6537_v34, %v6465_v63  ;;  %v6467_v6 = vpop.f32.mrb[157].mxu0  ;;  %v6856_v34 = vrot.slane %v12978_v4, %v11556_v48 }
 0x4c7   :  { %v6563_v53 = vmul.f32 %v6541_v38, %v6467_v6  ;;  %v6469_v22 = vpop.f32.mrb[158].mxu0 }
 0x4c8   :  { %v6570_v49 = vadd.f32 %v6562_v59, %v6243_v54  ;;  %v6470_v0 = vpop.f32.mrb[159].mxu0  ;;  %v6545_v54 = vrot.slane %v12954_v13, %v11613_v46  ;;  %v9927_v13 = vld [vmem:[%s13438_s4 + $0x84] ss:$8 sm:$0xf0] }
 0x4c9   :  { %v6571_v10 = vadd.f32 %v6563_v53, %v6244_v12  ;;  %v6424_v40 = vpop.f32.mrb[152].mxu1 }
 0x4ca   :  { %v6560_v28 = vmul.f32 %v6529_v35, %v6424_v40  ;;  %v6426_v20 = vpop.f32.mrb[153].mxu1 }
 0x4cb   :  { %v6561_v5 = vmul.f32 %v6533_v58, %v6426_v20  ;;  %v6428_v57 = vpop.f32.mrb[154].mxu1 }
 0x4cc   :  { %v6568_v9 = vadd.f32 %v6560_v28, %v6241_v2  ;;  %v6429_v61 = vpop.f32.mrb[155].mxu1  ;;  %v6864_v2 = vrot.slane %v12978_v4, %v11402_v17 }
 0x4cd   :  { %v6569_v24 = vadd.f32 %v6561_v5, %v6242_v47  ;;  %v6710_v18 = vpop.f32.mrb[160].mxu0  ;;  %v9926_v47 = vld [vmem:[%s13438_s4 + $0x84] ss:$8 sm:$0xf]  ;;  %v6876_v5 = vrot.slane %v12978_v4, %v11625_v44 }
 0x4ce   :  { %v6885_v11 = vmul.f32 %v6848_v60, %v6710_v18  ;;  %v6712_v39 = vpop.f32.mrb[161].mxu0  ;;  %v13002_v14 = vor.u32 %v9927_v13, %v9926_v47 }
 0x4cf   :  { %v6886_v12 = vmul.f32 %v6852_v56, %v6712_v39  ;;  %v6714_v42 = vpop.f32.mrb[162].mxu0 }
 0x4d0   :  { %v6893_v41 = vadd.f32 %v6885_v11, %v6566_v30  ;;  %v6715_v36 = vpop.f32.mrb[163].mxu0  ;;  %v7179_v58 = vrot.slane %v13002_v14, %v11353_v52  ;;  %v7195_v42 = vrot.slane %v13002_v14, %v11410_v29 }
 0x4d1   :  { %v6894_v62 = vadd.f32 %v6886_v12, %v6567_v7  ;;  %v6506_v31 = vpop.f32.mrb[156].mxu1 }
 0x4d2   :  { %v6564_v21 = vmul.f32 %v6545_v54, %v6506_v31  ;;  %v6508_v19 = vpop.f32.mrb[157].mxu1 }
 0x4d3   :  { %v6565_v16 = vmul.f32 %v6549_v51, %v6508_v19  ;;  %v6510_v32 = vpop.f32.mrb[158].mxu1 }
 0x4d4   :  { %v6572_v30 = vadd.f32 %v6564_v21, %v6245_v15  ;;  %v6511_v37 = vpop.f32.mrb[159].mxu1  ;;  %v7187_v32 = vrot.slane %v13002_v14, %v11574_v23 }
 0x4d5   :  { %v6573_v7 = vadd.f32 %v6565_v16, %v6246_v26  ;;  %v6792_v43 = vpop.f32.mrb[164].mxu0  ;;  %v7175_v26 = vrot.slane %v13002_v14, %v11346_v45 }
 0x4d6   :  { %v6889_v8 = vmul.f32 %v6864_v2, %v6792_v43  ;;  %v6794_v33 = vpop.f32.mrb[165].mxu0  ;;  %v7183_v2 = vrot.slane %v13002_v14, %v11556_v48 }
 0x4d7   :  { %v6890_v55 = vmul.f32 %v6868_v50, %v6794_v33  ;;  %v6796_v38 = vpop.f32.mrb[166].mxu0 }
 0x4d8   :  { %v6897_v1 = vadd.f32 %v6889_v8, %v6570_v49  ;;  %v6797_v25 = vpop.f32.mrb[167].mxu0  ;;  %v6872_v49 = vrot.slane %v12978_v4, %v11613_v46  ;;  %v9939_v4 = vld [vmem:[%s13438_s4 + $0x85] ss:$8 sm:$0xf0] }
 0x4d9   :  { %v6898_v63 = vadd.f32 %v6890_v55, %v6571_v10  ;;  %v6751_v59 = vpop.f32.mrb[160].mxu1 }
 0x4da   :  { %v6887_v15 = vmul.f32 %v6856_v34, %v6751_v59  ;;  %v6753_v6 = vpop.f32.mrb[161].mxu1 }
 0x4db   :  { %v6888_v35 = vmul.f32 %v6860_v27, %v6753_v6  ;;  %v6755_v53 = vpop.f32.mrb[162].mxu1 }
 0x4dc   :  { %v6895_v22 = vadd.f32 %v6887_v15, %v6568_v9  ;;  %v6756_v0 = vpop.f32.mrb[163].mxu1  ;;  %v7191_v9 = vrot.slane %v13002_v14, %v11402_v17 }
 0x4dd   :  { %v6896_v40 = vadd.f32 %v6888_v35, %v6569_v24  ;;  %v7037_v28 = vpop.f32.mrb[168].mxu0  ;;  %v9938_v24 = vld [vmem:[%s13438_s4 + $0x85] ss:$8 sm:$0xf]  ;;  %v7203_v35 = vrot.slane %v13002_v14, %v11625_v44 }
 0x4de   :  { %v7212_v20 = vmul.f32 %v7175_v26, %v7037_v28  ;;  %v7039_v60 = vpop.f32.mrb[169].mxu0  ;;  %v13026_v47 = vor.u32 %v9939_v4, %v9938_v24 }
 0x4df   :  { %v7213_v10 = vmul.f32 %v7179_v58, %v7039_v60  ;;  %v7041_v57 = vpop.f32.mrb[170].mxu0 }
 0x4e0   :  { %v7220_v56 = vadd.f32 %v7212_v20, %v6893_v41  ;;  %v7042_v61 = vpop.f32.mrb[171].mxu0  ;;  %v7506_v27 = vrot.slane %v13026_v47, %v11353_v52  ;;  %v7522_v57 = vrot.slane %v13026_v47, %v11410_v29 }
 0x4e1   :  { %v7221_v18 = vadd.f32 %v7213_v10, %v6894_v62  ;;  %v6833_v11 = vpop.f32.mrb[164].mxu1 }
 0x4e2   :  { %v6891_v39 = vmul.f32 %v6872_v49, %v6833_v11  ;;  %v6835_v54 = vpop.f32.mrb[165].mxu1 }
 0x4e3   :  { %v6892_v12 = vmul.f32 %v6876_v5, %v6835_v54  ;;  %v6837_v51 = vpop.f32.mrb[166].mxu1 }
 0x4e4   :  { %v6899_v41 = vadd.f32 %v6891_v39, %v6572_v30  ;;  %v6838_v36 = vpop.f32.mrb[167].mxu1  ;;  %v7514_v51 = vrot.slane %v13026_v47, %v11574_v23 }
 0x4e5   :  { %v6900_v62 = vadd.f32 %v6892_v12, %v6573_v7  ;;  %v7119_v31 = vpop.f32.mrb[172].mxu0  ;;  %v7502_v7 = vrot.slane %v13026_v47, %v11346_v45 }
 0x4e6   :  { %v7216_v21 = vmul.f32 %v7191_v9, %v7119_v31  ;;  %v7121_v19 = vpop.f32.mrb[173].mxu0  ;;  %v7510_v9 = vrot.slane %v13026_v47, %v11556_v48 }
 0x4e7   :  { %v7217_v16 = vmul.f32 %v7195_v42, %v7121_v19  ;;  %v7123_v50 = vpop.f32.mrb[174].mxu0 }
 0x4e8   :  { %v7224_v13 = vadd.f32 %v7216_v21, %v6897_v1  ;;  %v7124_v37 = vpop.f32.mrb[175].mxu0  ;;  %v7199_v1 = vrot.slane %v13002_v14, %v11613_v46  ;;  %v9951_v14 = vld [vmem:[%s13438_s4 + $0x86] ss:$8 sm:$0xf0] }
 0x4e9   :  { %v7225_v43 = vadd.f32 %v7217_v16, %v6898_v63  ;;  %v7078_v8 = vpop.f32.mrb[168].mxu1 }
 0x4ea   :  { %v7214_v30 = vmul.f32 %v7183_v2, %v7078_v8  ;;  %v7080_v33 = vpop.f32.mrb[169].mxu1 }
 0x4eb   :  { %v7215_v34 = vmul.f32 %v7187_v32, %v7080_v33  ;;  %v7082_v55 = vpop.f32.mrb[170].mxu1 }
 0x4ec   :  { %v7222_v38 = vadd.f32 %v7214_v30, %v6895_v22  ;;  %v7083_v25 = vpop.f32.mrb[171].mxu1  ;;  %v7518_v22 = vrot.slane %v13026_v47, %v11402_v17 }
 0x4ed   :  { %v7223_v59 = vadd.f32 %v7215_v34, %v6896_v40  ;;  %v7364_v15 = vpop.f32.mrb[176].mxu0  ;;  %v9950_v40 = vld [vmem:[%s13438_s4 + $0x86] ss:$8 sm:$0xf]  ;;  %v7530_v34 = vrot.slane %v13026_v47, %v11625_v44 }
 0x4ee   :  { %v7539_v6 = vmul.f32 %v7502_v7, %v7364_v15  ;;  %v7366_v26 = vpop.f32.mrb[177].mxu0  ;;  %v13050_v24 = vor.u32 %v9951_v14, %v9950_v40 }
 0x4ef   :  { %v7540_v63 = vmul.f32 %v7506_v27, %v7366_v26  ;;  %v7368_v53 = vpop.f32.mrb[178].mxu0 }
 0x4f0   :  { %v7547_v58 = vadd.f32 %v7539_v6, %v7220_v56  ;;  %v7369_v0 = vpop.f32.mrb[179].mxu0  ;;  %v7833_v32 = vrot.slane %v13050_v24, %v11353_v52  ;;  %v7849_v53 = vrot.slane %v13050_v24, %v11410_v29 }
 0x4f1   :  { %v7548_v28 = vadd.f32 %v7540_v63, %v7221_v18  ;;  %v7160_v20 = vpop.f32.mrb[172].mxu1 }
 0x4f2   :  { %v7218_v60 = vmul.f32 %v7199_v1, %v7160_v20  ;;  %v7162_v49 = vpop.f32.mrb[173].mxu1 }
 0x4f3   :  { %v7219_v10 = vmul.f32 %v7203_v35, %v7162_v49  ;;  %v7164_v5 = vpop.f32.mrb[174].mxu1 }
 0x4f4   :  { %v7226_v56 = vadd.f32 %v7218_v60, %v6899_v41  ;;  %v7165_v61 = vpop.f32.mrb[175].mxu1  ;;  %v7841_v5 = vrot.slane %v13050_v24, %v11574_v23 }
 0x4f5   :  { %v7227_v18 = vadd.f32 %v7219_v10, %v6900_v62  ;;  %v7446_v11 = vpop.f32.mrb[180].mxu0  ;;  %v7829_v62 = vrot.slane %v13050_v24, %v11346_v45 }
 0x4f6   :  { %v7543_v39 = vmul.f32 %v7518_v22, %v7446_v11  ;;  %v7448_v54 = vpop.f32.mrb[181].mxu0  ;;  %v7837_v22 = vrot.slane %v13050_v24, %v11556_v48 }
 0x4f7   :  { %v7544_v12 = vmul.f32 %v7522_v57, %v7448_v54  ;;  %v7450_v42 = vpop.f32.mrb[182].mxu0 }
 0x4f8   :  { %v7551_v4 = vadd.f32 %v7543_v39, %v7224_v13  ;;  %v7451_v36 = vpop.f32.mrb[183].mxu0  ;;  %v7526_v13 = vrot.slane %v13026_v47, %v11613_v46  ;;  %v9963_v47 = vld [vmem:[%s13438_s4 + $0x87] ss:$8 sm:$0xf0] }
 0x4f9   :  { %v7552_v31 = vadd.f32 %v7544_v12, %v7225_v43  ;;  %v7405_v21 = vpop.f32.mrb[176].mxu1 }
 0x4fa   :  { %v7541_v41 = vmul.f32 %v7510_v9, %v7405_v21  ;;  %v7407_v19 = vpop.f32.mrb[177].mxu1 }
 0x4fb   :  { %v7542_v2 = vmul.f32 %v7514_v51, %v7407_v19  ;;  %v7409_v16 = vpop.f32.mrb[178].mxu1 }
 0x4fc   :  { %v7549_v50 = vadd.f32 %v7541_v41, %v7222_v38  ;;  %v7410_v37 = vpop.f32.mrb[179].mxu1  ;;  %v7845_v38 = vrot.slane %v13050_v24, %v11402_v17 }
 0x4fd   :  { %v7550_v8 = vadd.f32 %v7542_v2, %v7223_v59  ;;  %v7691_v30 = vpop.f32.mrb[184].mxu0  ;;  %v9962_v59 = vld [vmem:[%s13438_s4 + $0x87] ss:$8 sm:$0xf]  ;;  %v7857_v2 = vrot.slane %v13050_v24, %v11625_v44 }
 0x4fe   :  { %v7866_v33 = vmul.f32 %v7829_v62, %v7691_v30  ;;  %v7693_v7 = vpop.f32.mrb[185].mxu0  ;;  %v13074_v40 = vor.u32 %v9963_v47, %v9962_v59 }
 0x4ff   :  { %v7867_v43 = vmul.f32 %v7833_v32, %v7693_v7  ;;  %v7695_v55 = vpop.f32.mrb[186].mxu0 }
 0x500   :  { %v7874_v27 = vadd.f32 %v7866_v33, %v7547_v58  ;;  %v7696_v25 = vpop.f32.mrb[187].mxu0  ;;  %v8160_v51 = vrot.slane %v13074_v40, %v11353_v52 }
 0x501   :  { %v7875_v15 = vadd.f32 %v7867_v43, %v7548_v28  ;;  %v7487_v6 = vpop.f32.mrb[180].mxu1  ;;  %v8172_v25 = vrot.slane %v13074_v40, %v11402_v17 }
 0x502   :  { %v7545_v26 = vmul.f32 %v7526_v13, %v7487_v6  ;;  %v7489_v1 = vpop.f32.mrb[181].mxu1  ;;  %v8164_v6 = vrot.slane %v13074_v40, %v11556_v48 }
 0x503   :  { %v7546_v63 = vmul.f32 %v7530_v34, %v7489_v1  ;;  %v7491_v35 = vpop.f32.mrb[182].mxu1 }
 0x504   :  { %v7553_v58 = vadd.f32 %v7545_v26, %v7226_v56  ;;  %v7492_v0 = vpop.f32.mrb[183].mxu1  ;;  %v8168_v26 = vrot.slane %v13074_v40, %v11574_v23 }
 0x505   :  { %v7554_v28 = vadd.f32 %v7546_v63, %v7227_v18  ;;  %v7773_v20 = vpop.f32.mrb[188].mxu0  ;;  %v8156_v18 = vrot.slane %v13074_v40, %v11346_v45 }
 0x506   :  { %v7870_v60 = vmul.f32 %v7845_v38, %v7773_v20  ;;  %v7775_v49 = vpop.f32.mrb[189].mxu0 }
 0x507   :  { %v7871_v10 = vmul.f32 %v7849_v53, %v7775_v49  ;;  %v7777_v57 = vpop.f32.mrb[190].mxu0 }
 0x508   :  { %v7878_v14 = vadd.f32 %v7870_v60, %v7551_v4  ;;  %v7778_v61 = vpop.f32.mrb[191].mxu0  ;;  %v7853_v4 = vrot.slane %v13050_v24, %v11613_v46  ;;  %v8176_v24 = vrot.slane %v13074_v40, %v11410_v29 }
 0x509   :  { %v7879_v11 = vadd.f32 %v7871_v10, %v7552_v31  ;;  %v7732_v39 = vpop.f32.mrb[184].mxu1 }
 0x50a   :  { %v7868_v56 = vmul.f32 %v7837_v22, %v7732_v39  ;;  %v7734_v54 = vpop.f32.mrb[185].mxu1  ;;  %v8180_v39 = vrot.slane %v13074_v40, %v11613_v46 }
 0x50b   :  { %v7869_v9 = vmul.f32 %v7841_v5, %v7734_v54  ;;  %v7736_v12 = vpop.f32.mrb[186].mxu1  ;;  %v8184_v54 = vrot.slane %v13074_v40, %v11625_v44 }
 0x50c   :  { %v7876_v42 = vadd.f32 %v7868_v56, %v7549_v50  ;;  %v7737_v36 = vpop.f32.mrb[187].mxu1 }
 0x50d   :  { %v7877_v21 = vadd.f32 %v7869_v9, %v7550_v8  ;;  %v8018_v41 = vpop.f32.mrb[192].mxu0 }
 0x50e   :  { %v8193_v19 = vmul.f32 %v8156_v18, %v8018_v41  ;;  %v8020_v62 = vpop.f32.mrb[193].mxu0 }
 0x50f   :  { %v8194_v31 = vmul.f32 %v8160_v51, %v8020_v62  ;;  %v8022_v16 = vpop.f32.mrb[194].mxu0 }
 0x510   :  { %v8201_v32 = vadd.f32 %v8193_v19, %v7874_v27  ;;  %v8023_v37 = vpop.f32.mrb[195].mxu0  ;;  %v9974_v27 = vld [vmem:[%s13438_s4 + $0xc0] ss:$8 sm:$0xf] }
 0x511   :  { %v8202_v30 = vadd.f32 %v8194_v31, %v7875_v15  ;;  %v7814_v33 = vpop.f32.mrb[188].mxu1  ;;  %v9975_v15 = vld [vmem:[%s13438_s4 + $0xc0] ss:$8 sm:$0xf0] }
 0x512   :  { %v7872_v7 = vmul.f32 %v7853_v4, %v7814_v33  ;;  %v7816_v13 = vpop.f32.mrb[189].mxu1  ;;  %v13100_v35 = vor.u32 %v9975_v15, %v9974_v27 }
 0x513   :  { %v7873_v50 = vmul.f32 %v7857_v2, %v7816_v13  ;;  %v7818_v43 = vpop.f32.mrb[190].mxu1 }
 0x514   :  { %v7880_v8 = vadd.f32 %v7872_v7, %v7553_v58  ;;  %v7819_v34 = vpop.f32.mrb[191].mxu1  ;;  %v8483_v61 = vrot.slane %v13100_v35, %v11346_v45  ;;  %v8487_v56 = vrot.slane %v13100_v35, %v11353_v52  ;;  %v8499_v37 = vrot.slane %v13100_v35, %v11402_v17 }
 0x515   :  { %v7881_v55 = vadd.f32 %v7873_v50, %v7554_v28  ;;  %v8491_v40 = vrot.slane %v13100_v35, %v11556_v48  ;;  %v8503_v33 = vrot.slane %v13100_v35, %v11410_v29  ;;  %v8495_v7 = vrot.slane %v13100_v35, %v11574_v23 }
 0x518   :  { %v8100_v1 = vpop.f32.mrb[196].mxu0 }
 0x519   :  { %v8059_v38 = vpop.f32.mrb[192].mxu1  ;;  %v8197_v59 = vmul.f32 %v8172_v25, %v8100_v1  ;;  %v8102_v63 = vpop.f32.mrb[197].mxu0 }
 0x51a   :  { %v8195_v53 = vmul.f32 %v8164_v6, %v8059_v38  ;;  %v8061_v47 = vpop.f32.mrb[193].mxu1  ;;  %v8198_v58 = vmul.f32 %v8176_v24, %v8102_v63  ;;  %v8104_v0 = vpop.f32.mrb[198].mxu0  ;;  %v9987_v6 = vld [vmem:[%s13438_s4 + $0xc1] ss:$8 sm:$0xf0] }
 0x51b   :  { %v8205_v28 = vadd.f32 %v8197_v59, %v7878_v14  ;;  %v8196_v20 = vmul.f32 %v8168_v26, %v8061_v47  ;;  %v8063_v60 = vpop.f32.mrb[194].mxu1  ;;  %v8105_v49 = vpop.f32.mrb[199].mxu0  ;;  %v8507_v47 = vrot.slane %v13100_v35, %v11613_v46 }
 0x51c   :  { %v8203_v22 = vadd.f32 %v8195_v53, %v7876_v42  ;;  %v8206_v10 = vadd.f32 %v8198_v58, %v7879_v11  ;;  %v8064_v5 = vpop.f32.mrb[195].mxu1  ;;  %v8511_v58 = vrot.slane %v13100_v35, %v11625_v44 }
 0x51d   :  { %v8204_v57 = vadd.f32 %v8196_v20, %v7877_v21 }
 0x520   :  { %v8345_v14 = vpop.f32.mrb[200].mxu0 }
 0x521   :  { %v8141_v18 = vpop.f32.mrb[196].mxu1  ;;  %v8520_v9 = vmul.f32 %v8483_v61, %v8345_v14  ;;  %v8347_v12 = vpop.f32.mrb[201].mxu0 }
 0x522   :  { %v8199_v51 = vmul.f32 %v8180_v39, %v8141_v18  ;;  %v8143_v11 = vpop.f32.mrb[197].mxu1  ;;  %v8521_v42 = vmul.f32 %v8487_v56, %v8347_v12  ;;  %v8349_v36 = vpop.f32.mrb[202].mxu0 }
 0x523   :  { %v8528_v21 = vadd.f32 %v8520_v9, %v8201_v32  ;;  %v8200_v41 = vmul.f32 %v8184_v54, %v8143_v11  ;;  %v8145_v19 = vpop.f32.mrb[198].mxu1  ;;  %v8350_v62 = vpop.f32.mrb[203].mxu0 }
 0x524   :  { %v8207_v4 = vadd.f32 %v8199_v51, %v7880_v8  ;;  %v8529_v31 = vadd.f32 %v8521_v42, %v8202_v30  ;;  %v8146_v2 = vpop.f32.mrb[199].mxu1  ;;  %v9986_v30 = vld [vmem:[%s13438_s4 + $0xc1] ss:$8 sm:$0xf] }
 0x525   :  { %v8208_v16 = vadd.f32 %v8200_v41, %v7881_v55  ;;  %v8805_v53 = vor.u32 %v9987_v6, %v9986_v30  ;;  %v9998_v41 = vld [vmem:[%s13438_s4 + $0xc2] ss:$8 sm:$0xf] }
 0x526   :  { %v9999_v2 = vld [vmem:[%s13438_s4 + $0xc2] ss:$8 sm:$0xf0] }
 0x527   :  { %v8810_v20 = vrot.slane %v8805_v53, %v11346_v45  ;;  %v8818_v9 = vrot.slane %v8805_v53, %v11556_v48  ;;  %v8822_v51 = vrot.slane %v8805_v53, %v11574_v23  ;;  %v8826_v36 = vrot.slane %v8805_v53, %v11402_v17 }
 0x528   :  { %v8427_v32 = vpop.f32.mrb[204].mxu0  ;;  %v8834_v30 = vrot.slane %v8805_v53, %v11613_v46 }
 0x529   :  { %v8386_v13 = vpop.f32.mrb[200].mxu1  ;;  %v8524_v50 = vmul.f32 %v8499_v37, %v8427_v32  ;;  %v8429_v43 = vpop.f32.mrb[205].mxu0 }
 0x52a   :  { %v8522_v8 = vmul.f32 %v8491_v40, %v8386_v13  ;;  %v8388_v34 = vpop.f32.mrb[201].mxu1  ;;  %v8525_v55 = vmul.f32 %v8503_v33, %v8429_v43  ;;  %v8431_v25 = vpop.f32.mrb[206].mxu0  ;;  %v13140_v13 = vor.u32 %v9999_v2, %v9998_v41 }
 0x52b   :  { %v8532_v24 = vadd.f32 %v8524_v50, %v8205_v28  ;;  %v8523_v27 = vmul.f32 %v8495_v7, %v8388_v34  ;;  %v8390_v15 = vpop.f32.mrb[202].mxu1  ;;  %v8432_v26 = vpop.f32.mrb[207].mxu0  ;;  %v8814_v28 = vrot.slane %v8805_v53, %v11353_v52 }
 0x52c   :  { %v8530_v1 = vadd.f32 %v8522_v8, %v8203_v22  ;;  %v8533_v38 = vadd.f32 %v8525_v55, %v8206_v10  ;;  %v8391_v59 = vpop.f32.mrb[203].mxu1  ;;  %v8838_v55 = vrot.slane %v8805_v53, %v11625_v44 }
 0x52d   :  { %v8531_v63 = vadd.f32 %v8523_v27, %v8204_v57  ;;  %v9137_v27 = vrot.slane %v13140_v13, %v11346_v45 }
 0x531   :  { %v8468_v0 = vpop.f32.mrb[204].mxu1 }
 0x532   :  { %v8526_v60 = vmul.f32 %v8507_v47, %v8468_v0  ;;  %v8470_v49 = vpop.f32.mrb[205].mxu1 }
 0x533   :  { %v8527_v5 = vmul.f32 %v8511_v58, %v8470_v49  ;;  %v8472_v61 = vpop.f32.mrb[206].mxu1 }
 0x534   :  { %v8534_v22 = vadd.f32 %v8526_v60, %v8207_v4  ;;  %v8473_v10 = vpop.f32.mrb[207].mxu1  ;;  %v8672_v39 = vpop.f32.mrb[208].mxu0  ;;  %v8830_v4 = vrot.slane %v8805_v53, %v11410_v29 }
 0x535   :  { %v8535_v57 = vadd.f32 %v8527_v5, %v8208_v16  ;;  %v8847_v56 = vmul.f32 %v8810_v20, %v8672_v39  ;;  %v8674_v54 = vpop.f32.mrb[209].mxu0  ;;  %v9149_v5 = vrot.slane %v13140_v13, %v11574_v23  ;;  %v9153_v39 = vrot.slane %v13140_v13, %v11402_v17 }
 0x536   :  { %v8848_v14 = vmul.f32 %v8814_v28, %v8674_v54  ;;  %v8676_v18 = vpop.f32.mrb[210].mxu0  ;;  %v9157_v54 = vrot.slane %v13140_v13, %v11410_v29 }
 0x537   :  { %v8855_v35 = vadd.f32 %v8847_v56, %v8528_v21  ;;  %v8677_v12 = vpop.f32.mrb[211].mxu0 }
 0x538   :  { %v8856_v11 = vadd.f32 %v8848_v14, %v8529_v31 }
 0x539   :  { %v8713_v42 = vpop.f32.mrb[208].mxu1 }
 0x53a   :  { %v8849_v19 = vmul.f32 %v8818_v9, %v8713_v42  ;;  %v8715_v62 = vpop.f32.mrb[209].mxu1 }
 0x53b   :  { %v8850_v21 = vmul.f32 %v8822_v51, %v8715_v62  ;;  %v8717_v16 = vpop.f32.mrb[210].mxu1  ;;  %v9161_v62 = vrot.slane %v13140_v13, %v11613_v46 }
 0x53c   :  { %v8857_v37 = vadd.f32 %v8849_v19, %v8530_v1  ;;  %v8718_v40 = vpop.f32.mrb[211].mxu1  ;;  %v8754_v31 = vpop.f32.mrb[212].mxu0  ;;  %v9141_v1 = vrot.slane %v13140_v13, %v11353_v52  ;;  %v9165_v16 = vrot.slane %v13140_v13, %v11625_v44 }
 0x53d   :  { %v8858_v33 = vadd.f32 %v8850_v21, %v8531_v63  ;;  %v8851_v7 = vmul.f32 %v8826_v36, %v8754_v31  ;;  %v8756_v32 = vpop.f32.mrb[213].mxu0 }
 0x53e   :  { %v8852_v50 = vmul.f32 %v8830_v4, %v8756_v32  ;;  %v8758_v43 = vpop.f32.mrb[214].mxu0 }
 0x53f   :  { %v8859_v8 = vadd.f32 %v8851_v7, %v8532_v24  ;;  %v8759_v34 = vpop.f32.mrb[215].mxu0 }
 0x540   :  { %v8860_v25 = vadd.f32 %v8852_v50, %v8533_v38  ;;  %v9145_v38 = vrot.slane %v13140_v13, %v11556_v48 }
 0x541   :  { %v8795_v6 = vpop.f32.mrb[212].mxu1 }
 0x542   :  { %v8853_v15 = vmul.f32 %v8834_v30, %v8795_v6  ;;  %v8797_v26 = vpop.f32.mrb[213].mxu1 }
 0x543   :  { %v8854_v59 = vmul.f32 %v8838_v55, %v8797_v26  ;;  %v8799_v63 = vpop.f32.mrb[214].mxu1 }
 0x544   :  { %v8861_v47 = vadd.f32 %v8853_v15, %v8534_v22  ;;  %v8800_v58 = vpop.f32.mrb[215].mxu1  ;;  %v8999_v0 = vpop.f32.mrb[216].mxu0 }
 0x545   :  { %v8862_v20 = vadd.f32 %v8854_v59, %v8535_v57  ;;  %v9174_v24 = vmul.f32 %v9137_v27, %v8999_v0  ;;  %v9001_v60 = vpop.f32.mrb[217].mxu0 }
 0x546   :  { %v9175_v49 = vmul.f32 %v9141_v1, %v9001_v60  ;;  %v9003_v53 = vpop.f32.mrb[218].mxu0 }
 0x547   :  { %v13150_v28 = vadd.f32 %v9174_v24, %v8855_v35  ;;  %v9004_v45 = vpop.f32.mrb[219].mxu0 }
 0x548   :  { %v13154_v52 = vadd.f32 %v9175_v49, %v8856_v11 }
 0x549   :  { %v9190_v61 = vsel %vm232_vm1, %v13150_v28, 0.0  ;;  %v9208_v22 = vmul.f32 %v13150_v28, %v13150_v28  ;;  %v9040_v10 = vpop.f32.mrb[216].mxu1 }
 0x54a   :  { %v9191_v48 = vsel %vm232_vm1, %v13154_v52, 0.0  ;;  %v9209_v57 = vmul.f32 %v13154_v52, %v13154_v52  ;;  %v9176_v56 = vmul.f32 %v9145_v38, %v9040_v10  ;;  %v9042_v23 = vpop.f32.mrb[217].mxu1 }
 0x54b   :  { %v9216_v14 = vsel %vm232_vm1, %v9208_v22, 0.0  ;;  %v9192_v18 = vadd.f32 %v9191_v48, %v9190_v61  ;;  %v9177_v9 = vmul.f32 %v9149_v5, %v9042_v23  ;;  %v9044_v35 = vpop.f32.mrb[218].mxu1 }
 0x54c   :  { %v9217_v12 = vsel %vm232_vm1, %v9209_v57, 0.0  ;;  %v13170_v51 = vadd.f32 %v9176_v56, %v8857_v37  ;;  %v9045_v17 = vpop.f32.mrb[219].mxu1  ;;  %v9081_v11 = vpop.f32.mrb[220].mxu0 }
 0x54d   :  { %v9218_v42 = vadd.f32 %v9217_v12, %v9216_v14  ;;  %v13172_v36 = vadd.f32 %v9177_v9, %v8858_v33  ;;  %v9178_v41 = vmul.f32 %v9153_v39, %v9081_v11  ;;  %v9083_v19 = vpop.f32.mrb[221].mxu0  ;;  %v9237_v12 = vld [vmem:[%s13439_s7] sm:$0xf] }
 0x54e   :  { %v9193_v29 = vsel %vm232_vm1, %v13170_v51, 0.0  ;;  %v9210_v4 = vmul.f32 %v13170_v51, %v13170_v51  ;;  %v9179_v2 = vmul.f32 %v9157_v54, %v9083_v19  ;;  %v9085_v21 = vpop.f32.mrb[222].mxu0 }
 0x54f   :  { %v9194_v37 = vadd.f32 %v9193_v29, %v9192_v18  ;;  %v9195_v40 = vsel %vm232_vm1, %v13172_v36, 0.0  ;;  %v9211_v31 = vmul.f32 %v13172_v36, %v13172_v36  ;;  %v13186_v33 = vadd.f32 %v9178_v41, %v8859_v8  ;;  %v9086_v46 = vpop.f32.mrb[223].mxu0 }
 0x550   :  { %v9219_v7 = vsel %vm232_vm1, %v9210_v4, 0.0  ;;  %v9187_v32 = vadd.f32 %v9179_v2, %v8860_v25 }
 0x551   :  { %v9220_v50 = vadd.f32 %v9219_v7, %v9218_v42  ;;  %v9196_v43 = vadd.f32 %v9195_v40, %v9194_v37  ;;  %v9221_v30 = vsel %vm232_vm1, %v9211_v31, 0.0  ;;  %v9197_v44 = vsel %vm232_vm1, %v13186_v33, 0.0  ;;  %v9122_v13 = vpop.f32.mrb[220].mxu1  ;;  %v9241_v42 = vld [vmem:[%s13440_s8] sm:$0xf] }
 0x552   :  { %v9212_v34 = vmul.f32 %v13186_v33, %v13186_v33  ;;  %v9199_v55 = vsel %vm232_vm1, %v9187_v32, 0.0  ;;  %v9213_v6 = vmul.f32 %v9187_v32, %v9187_v32  ;;  %v9180_v8 = vmul.f32 %v9161_v62, %v9122_v13  ;;  %v9124_v27 = vpop.f32.mrb[221].mxu1 }
 0x553   :  { %v9222_v15 = vadd.f32 %v9221_v30, %v9220_v50  ;;  %v9198_v26 = vadd.f32 %v9197_v44, %v9196_v43  ;;  %v9181_v1 = vmul.f32 %v9165_v16, %v9124_v27  ;;  %v9126_v25 = vpop.f32.mrb[222].mxu1 }
 0x554   :  { %v9223_v59 = vsel %vm232_vm1, %v9212_v34, 0.0  ;;  %v9188_v63 = vadd.f32 %v9180_v8, %v8861_v47  ;;  %v9127_v58 = vpop.f32.mrb[223].mxu1  ;;  %v9225_v0 = vsel %vm232_vm1, %v9213_v6, 0.0 }
 0x555   :  { %v9189_v24 = vadd.f32 %v9181_v1, %v8862_v20  ;;  %v9200_v60 = vadd.f32 %v9199_v55, %v9198_v26  ;;  %v9224_v49 = vadd.f32 %v9223_v59, %v9222_v15 }
 0x556   :  { %v9214_v53 = vmul.f32 %v9188_v63, %v9188_v63  ;;  %v9201_v38 = vsel %vm232_vm1, %v9188_v63, 0.0 }
 0x557   :  { %v9202_v45 = vadd.f32 %v9201_v38, %v9200_v60  ;;  %v9203_v5 = vsel %vm232_vm1, %v9189_v24, 0.0  ;;  %v9215_v61 = vmul.f32 %v9189_v24, %v9189_v24  ;;  %v9226_v22 = vadd.f32 %v9225_v0, %v9224_v49  ;;  %v10037_v0 = vld [vmem:[%s13441_s3] sm:$0xff]  }
 0x558   :  { %v9227_v10 = vsel %vm232_vm1, %v9214_v53, 0.0 }
 0x559   :  { %v9204_v39 = vadd.f32 %v9203_v5, %v9202_v45  ;;  %v9228_v48 = vadd.f32 %v9227_v10, %v9226_v22  ;;  %v9229_v47 = vsel %vm232_vm1, %v9215_v61, 0.0 }
 0x55b   :  { %9205 = vadd.xlane.f32.xlu1 %v9204_v39  ;;  %v9230_v57 = vadd.f32 %v9229_v47, %v9228_v48 }
 0x55d   :  { %9231 = vadd.xlane.f32.xlu0 %v9230_v57 }
 0x5e8   :  { %v9206_v20 = vpop.xlane.xlu1 %9205 }
 0x5e9   :  { %v9207_v56 = vmul.f32 0.0009765625, %v9206_v20 }
 0x5ea   :  { %v9232_v23 = vpop.xlane.xlu0 %9231 }
 0x5eb   :  { %v9234_v54 = vmul.f32 %v9207_v56, %v9207_v56  ;;  %v9233_v14 = vmul.f32 0.0009765625, %v9232_v23 }
 0x5ed   :  { %v9235_v18 = vsub.f32 %v9233_v14, %v9234_v54 }
 0x5ef   :  { %v9236_v9 = vmax.f32 %v9235_v18, 0.0 }
 0x5f1   :  { %v9238_v35 = vadd.f32 1e-05, %v9236_v9 }
 0x5f3   :  { %10040 = vrsqrt.f32 %v9238_v35 }
 0x5fd   :  { %v10041_v17 = vpop.eup %10040 }
 0x5fe   :  { %v9240_v11 = vmul.f32 %v10041_v17, %v9237_v12 }
 0x600   :  { %9246 = vperm.xlu0 %10029, %v9240_v11   ;;  %v9242_v41 = vmul.f32 %v9240_v11, %v9207_v56 }
 0x602   :  { %v9243_v19 = vsub.f32 %v9241_v42, %v9242_v41 }
 0x604   :  { %9259 = vperm.xlu1 %10028, %v9243_v19  }
 0x67f   :  { %v9247_v62 = vpop.permute.xlu0 %9246 }
 0x680   :  { %v9250_v29 = vmul.f32 %v9247_v62, %v13154_v52  ;;  %v9252_v4 = vmul.f32 %v9247_v62, %v13172_v36  ;;  %v9249_v2 = vmul.f32 %v9247_v62, %v13150_v28  ;;  %v9251_v21 = vmul.f32 %v9247_v62, %v13170_v51 }
 0x681   :  { %v9254_v37 = vmul.f32 %v9247_v62, %v9187_v32  ;;  %v9256_v40 = vmul.f32 %v9247_v62, %v9189_v24  ;;  %v9253_v31 = vmul.f32 %v9247_v62, %v13186_v33  ;;  %v9255_v46 = vmul.f32 %v9247_v62, %v9188_v63 }
 0x683   :  { %v9260_v16 = vpop.permute.xlu1 %9259 }
 0x684   :  { %v9263_v7 = vadd.f32 %v9260_v16, %v9250_v29  ;;  %v9265_v50 = vadd.f32 %v9260_v16, %v9252_v4  ;;  %v9262_v43 = vadd.f32 %v9260_v16, %v9249_v2  ;;  %v9264_v30 = vadd.f32 %v9260_v16, %v9251_v21 }
 0x685   :  { %v9267_v44 = vadd.f32 %v9260_v16, %v9254_v37  ;;  %v9269_v13 = vadd.f32 %v9260_v16, %v9256_v40  ;;  %v9266_v34 = vadd.f32 %v9260_v16, %v9253_v31  ;;  %v9268_v52 = vadd.f32 %v9260_v16, %v9255_v46 }
 0x686   :  { %v9271_v55 = vmax.f32 %v9263_v7, 0.0  ;;  %v9273_v36 = vmax.f32 %v9265_v50, 0.0  ;;  %v9270_v6 = vmax.f32 %v9262_v43, 0.0  ;;  %v9272_v28 = vmax.f32 %v9264_v30, 0.0 }
 0x687   :  { %v9275_v8 = vmax.f32 %v9267_v44, 0.0  ;;  %v9277_v51 = vmax.f32 %v9269_v13, 0.0  ;;  %v9274_v27 = vmax.f32 %v9266_v34, 0.0  ;;  %v9276_v32 = vmax.f32 %v9268_v52, 0.0 }
 0x688   :  { %v9281_v15 = vpack.c.bf16 %v9271_v55, %v9271_v55  ;;  %v9283_v26 = vpack.c.bf16 %v9273_v36, %v9273_v36  ;;  %v9280_v33 = vpack.c.bf16 %v9270_v6, %v9270_v6  ;;  %v9282_v1 = vpack.c.bf16 %v9272_v28, %v9272_v28 }
 0x689   :  { %v9285_v25 = vpack.c.bf16 %v9275_v8, %v9275_v8  ;;  %v9287_v59 = vpack.c.bf16 %v9277_v51, %v9277_v51  ;;  %v9284_v24 = vpack.c.bf16 %v9274_v27, %v9274_v27  ;;  %v9286_v60 = vpack.c.bf16 %v9276_v32, %v9276_v32 }
 0x68a   :  { %10001 = vmatprep.subr.msk.bf16.mxu0 %vm458_vm3, %v9281_v15  ;;  %10003 = vmatprep.subr.msk.bf16.mxu1 %vm458_vm3, %v9283_v26  ;;  %v9297_v63 = vsel %vm458_vm3, %v9280_v33, 0  ;;  %v9303_v58 = vsel %vm458_vm3, %v9282_v1, 0 }
 0x68b   :  { %9321 = vmatpush1.bf16.msra.mxu0 %v9297_v63  ;;  %9364 = vmatpush1.bf16.msra.mxu1 %v9303_v58  ;;  %v9309_v49 = vsel %vm458_vm3, %v9284_v24, 0  ;;  %v9315_v53 = vsel %vm458_vm3, %v9286_v60, 0 }
 0x68c   :  { %10005 = vmatprep.subr.msk.bf16.mxu0 %vm458_vm3, %v9285_v25  ;;  %10007 = vmatprep.subr.msk.bf16.mxu1 %vm458_vm3, %v9287_v59 }
 0x68e   :  { %10002 = vmatmul.mubr.msk.bf16.vlgmr.msra.gmra.mrb[224].mxu0 %vm454_vm4, %v10037_v0  ;;  %10004 = vmatmul.mubr.msk.bf16.vlgmr.msra.gmra.mrb[224].mxu1 %vm454_vm4, %v10037_v0 }
 0x68f   :  { %9407 = vmatpush1.bf16.msra.mxu0 %v9309_v49  ;;  %9450 = vmatpush1.bf16.msra.mxu1 %v9315_v53 }
 0x690   :  { %9438 = vmatprep.mubr.bf16.mxu0 %v10063_v3  ;;  %9481 = vmatprep.mubr.bf16.mxu1 %v10063_v3 }
 0x696   :  { %10006 = vmatmul.mubr.msk.bf16.vlgmr.msra.gmra.mrb[228].mxu0 %vm454_vm4, %v10037_v0  ;;  %10008 = vmatmul.mubr.msk.bf16.vlgmr.msra.gmra.mrb[228].mxu1 %vm454_vm4, %v10037_v0 }
 0x761   :  { %v13229_v38 = vpop.f32.mrb[224].mxu0  ;;  %v13231_v45 = vpop.f32.mrb[224].mxu1 }
 0x762   :  { %v9512_v5 = vmul.f32 %v13229_v38, %v13229_v38  ;;  %v13235_v61 = vpop.f32.mrb[225].mxu0  ;;  %v13237_v22 = vpop.f32.mrb[225].mxu1  ;;  %v9514_v48 = vmul.f32 %v13231_v45, %v13231_v45 }
 0x763   :  { %v9492_v10 = vadd.f32 %v13235_v61, %v13229_v38  ;;  %v9513_v3 = vmul.f32 %v13235_v61, %v13235_v61  ;;  %v13243_v39 = vpop.f32.mrb[226].mxu0  ;;  %v13247_v47 = vpop.f32.mrb[226].mxu1  ;;  %v9515_v56 = vmul.f32 %v13237_v22, %v13237_v22 }
 0x764   :  { %v9520_v57 = vmul.f32 %v13243_v39, %v13243_v39  ;;  %v13251_v20 = vpop.f32.mrb[227].mxu0  ;;  %v9522_v23 = vmul.f32 %v13247_v47, %v13247_v47  ;;  %v13257_v54 = vpop.f32.mrb[227].mxu1 }
 0x765   :  { %v9528_v14 = vadd.f32 %v9513_v3, %v9512_v5  ;;  %v9493_v18 = vadd.f32 %v9492_v10, %v13231_v45  ;;  %v9501_v9 = vadd.f32 %v13251_v20, %v13243_v39  ;;  %v9521_v35 = vmul.f32 %v13251_v20, %v13251_v20 }
 0x766   :  { %v9523_v4 = vmul.f32 %v13257_v54, %v13257_v54 }
 0x767   :  { %v9529_v12 = vadd.f32 %v9528_v14, %v9514_v48  ;;  %v9537_v17 = vadd.f32 %v9521_v35, %v9520_v57  ;;  %v9494_v11 = vadd.f32 %v9493_v18, %v13237_v22  ;;  %v9502_v42 = vadd.f32 %v9501_v9, %v13247_v47 }
 0x769   :  { %v9530_v41 = vadd.f32 %v9529_v12, %v9515_v56  ;;  %v9538_v19 = vadd.f32 %v9537_v17, %v9522_v23  ;;  %v13266_v62 = vpop.f32.mrb[228].mxu0  ;;  %v9503_v29 = vadd.f32 %v9502_v42, %v13257_v54  ;;  %v13271_v2 = vpop.f32.mrb[228].mxu1  ;;  %v9554_v17 = vld [vmem:[%s13442_s9] sm:$0xff] }
 0x76a   :  { %v9495_v21 = vadd.f32 %v9494_v11, %v13266_v62  ;;  %v9516_v16 = vmul.f32 %v13266_v62, %v13266_v62  ;;  %v13276_v37 = vpop.f32.mrb[229].mxu0  ;;  %v13278_v40 = vpop.f32.mrb[229].mxu1  ;;  %v9518_v50 = vmul.f32 %v13271_v2, %v13271_v2 }
 0x76b   :  { %v9539_v31 = vadd.f32 %v9538_v19, %v9523_v4  ;;  %v9517_v46 = vmul.f32 %v13276_v37, %v13276_v37  ;;  %v13282_v7 = vpop.f32.mrb[230].mxu0  ;;  %v13286_v43 = vpop.f32.mrb[230].mxu1  ;;  %v9519_v27 = vmul.f32 %v13278_v40, %v13278_v40  ;;  %v9555_v19 = vld [vmem:[%s13442_s9 + $0x8] sm:$0xff] }
 0x76c   :  { %v9531_v30 = vadd.f32 %v9530_v41, %v9516_v16  ;;  %v9496_v44 = vadd.f32 %v9495_v21, %v13276_v37  ;;  %v9504_v13 = vadd.f32 %v9503_v29, %v13282_v7  ;;  %v9524_v34 = vmul.f32 %v13282_v7, %v13282_v7  ;;  %v13292_v52 = vpop.f32.mrb[231].mxu0  ;;  %v13294_v55 = vpop.f32.mrb[231].mxu1  ;;  %v9562_v41 = vld [vmem:[%s13443_s10] sm:$0xff] }
 0x76d   :  { %v9525_v36 = vmul.f32 %v13292_v52, %v13292_v52  ;;  %v9526_v32 = vmul.f32 %v13286_v43, %v13286_v43  ;;  %v9527_v63 = vmul.f32 %v13294_v55, %v13294_v55 }
 0x76e   :  { %v9532_v6 = vadd.f32 %v9531_v30, %v9517_v46  ;;  %v9540_v28 = vadd.f32 %v9539_v31, %v9524_v34  ;;  %v9497_v8 = vadd.f32 %v9496_v44, %v13271_v2  ;;  %v9505_v51 = vadd.f32 %v9504_v13, %v13292_v52  ;;  %v9563_v31 = vld [vmem:[%s13443_s10 + $0x8] sm:$0xff] }
 0x770   :  { %v9533_v15 = vadd.f32 %v9532_v6, %v9518_v50  ;;  %v9541_v26 = vadd.f32 %v9540_v28, %v9525_v36  ;;  %v9498_v33 = vadd.f32 %v9497_v8, %v13278_v40  ;;  %v9506_v1 = vadd.f32 %v9505_v51, %v13286_v43 }
 0x772   :  { %v9542_v25 = vadd.f32 %v9541_v26, %v9526_v32  ;;  %v9507_v59 = vadd.f32 %v9506_v1, %v13294_v55  ;;  %9499 = vadd.xlane.f32.xlu1 %v9498_v33  ;;  %v9534_v58 = vadd.f32 %v9533_v15, %v9519_v27 }
 0x774   :  { %v9543_v0 = vadd.f32 %v9542_v25, %v9527_v63  ;;  %9508 = vadd.xlane.f32.xlu0 %v9507_v59  ;;  %v10049_v59 = vld [vmem:[%s13433_s0 + $0x18] sm:$0xff] }
 0x776   :  { %9535 = vadd.xlane.f32.xlu1 %v9534_v58  ;;  %v10050_v58 = vld [vmem:[%s13433_s0 + $0x20] sm:$0xff] }
 0x77a   :  { %9544 = vadd.xlane.f32.xlu1 %v9543_v0 }
 0x7ff   :  { %v9500_v24 = vpop.xlane.xlu1 %9499 }
 0x800   :  { %v9510_v60 = vmul.f32 0.0009765625, %v9500_v24  ;;  %v10051_v24 = vld [vmem:[%s13433_s0 + $0x28] sm:$0xff] }
 0x801   :  { %v9509_v49 = vpop.xlane.xlu0 %9508 }
 0x802   :  { %v9548_v5 = vmul.f32 %v9510_v60, %v9510_v60  ;;  %v9511_v10 = vmul.f32 0.0009765625, %v9509_v49  ;;  %v10052_v49 = vld [vmem:[%s13433_s0 + $0x30] sm:$0xff] }
 0x803   :  { %v9536_v53 = vpop.xlane.xlu1 %9535 }
 0x804   :  { %v9546_v3 = vmul.f32 0.0009765625, %v9536_v53  ;;  %v9549_v56 = vmul.f32 %v9511_v10, %v9511_v10 }
 0x806   :  { %v9550_v48 = vsub.f32 %v9546_v3, %v9548_v5  ;;  %v10053_v5 = vld [vmem:[%s13433_s0 + $0x38] sm:$0xff] }
 0x807   :  { %v9545_v57 = vpop.xlane.xlu1 %9544 }
 0x808   :  { %v9552_v23 = vmax.f32 %v9550_v48, 0.0  ;;  %v9547_v14 = vmul.f32 0.0009765625, %v9545_v57 }
 0x80a   :  { %v9556_v18 = vadd.f32 1e-05, %v9552_v23  ;;  %v9551_v9 = vsub.f32 %v9547_v14, %v9549_v56 }
 0x80c   :  { %10042 = vrsqrt.f32 %v9556_v18  ;;  %v9553_v35 = vmax.f32 %v9551_v9, 0.0 }
 0x80e   :  { %v9557_v12 = vadd.f32 1e-05, %v9553_v35 }
 0x810   :  { %10044 = vrsqrt.f32 %v9557_v12 }
 0x816   :  { %v10043_v11 = vpop.eup %10042 }
 0x817   :  { %v9560_v42 = vmul.f32 %v10043_v11, %v9554_v17 }
 0x819   :  { %9570 = vperm.xlu1 %10028, %v9560_v42   ;;  %v9564_v29 = vmul.f32 %v9560_v42, %v9510_v60 }
 0x81a   :  { %v10045_v4 = vpop.eup %10044 }
 0x81b   :  { %v9566_v21 = vsub.f32 %v9562_v41, %v9564_v29  ;;  %v9561_v16 = vmul.f32 %v10045_v4, %v9555_v19 }
 0x81d   :  { %9596 = vperm.xlu1 %10028, %v9566_v21   ;;  %9575 = vperm.xlu0 %10029, %v9561_v16   ;;  %v9565_v46 = vmul.f32 %v9561_v16, %v9511_v10 }
 0x81f   :  { %v9567_v50 = vsub.f32 %v9563_v31, %v9565_v46 }
 0x821   :  { %9601 = vperm.xlu1 %10028, %v9567_v50  }
 0x898   :  { %v9571_v30 = vpop.permute.xlu1 %9570 }
 0x899   :  { %v9578_v44 = vmul.f32 %v9571_v30, %v13229_v38  ;;  %v9579_v13 = vmul.f32 %v9571_v30, %v13235_v61  ;;  %v9580_v34 = vmul.f32 %v9571_v30, %v13231_v45  ;;  %v9581_v36 = vmul.f32 %v9571_v30, %v13237_v22  ;;  %v10046_v45 = vld [vmem:[%s13433_s0] sm:$0xff] }
 0x89a   :  { %v9582_v6 = vmul.f32 %v9571_v30, %v13266_v62  ;;  %v9583_v28 = vmul.f32 %v9571_v30, %v13276_v37  ;;  %v9584_v8 = vmul.f32 %v9571_v30, %v13271_v2  ;;  %v9585_v51 = vmul.f32 %v9571_v30, %v13278_v40  ;;  %v10047_v62 = vld [vmem:[%s13433_s0 + $0x8] sm:$0xff]  ;;  %v10048_v37 = vld [vmem:[%s13433_s0 + $0x10] sm:$0xff]  ;;  %v10054_v30 = vld [vmem:[%s13433_s0 + $0x40] sm:$0xff] }
 0x89c   :  { %v9597_v27 = vpop.permute.xlu1 %9596  ;;  %v9576_v3 = vpop.permute.xlu0 %9575 }
 0x89d   :  { %v9604_v32 = vadd.f32 %v9597_v27, %v9578_v44  ;;  %v9605_v15 = vadd.f32 %v9597_v27, %v9579_v13  ;;  %v9606_v26 = vadd.f32 %v9597_v27, %v9580_v34  ;;  %v9607_v33 = vadd.f32 %v9597_v27, %v9581_v36  ;;  %v10057_v13 = vld [vmem:[%s13433_s0 + $0x58] sm:$0xff]  ;;  %v10058_v36 = vld [vmem:[%s13433_s0 + $0x60] sm:$0xff] }
 0x89e   :  { %v9608_v38 = vadd.f32 %v9597_v27, %v9582_v6  ;;  %v9609_v1 = vadd.f32 %v9597_v27, %v9583_v28  ;;  %v9610_v61 = vadd.f32 %v9597_v27, %v9584_v8  ;;  %v9611_v25 = vadd.f32 %v9597_v27, %v9585_v51  ;;  %v10059_v28 = vld [vmem:[%s13433_s0 + $0x68] sm:$0xff]  ;;  %v10060_v51 = vld [vmem:[%s13433_s0 + $0x70] sm:$0xff] }
 0x89f   :  { %v9620_v22 = vadd.f32 %v10046_v45, %v9604_v32  ;;  %v9621_v2 = vadd.f32 %v10047_v62, %v9605_v15  ;;  %v9622_v40 = vadd.f32 %v10048_v37, %v9606_v26  ;;  %v9623_v63 = vadd.f32 %v10049_v59, %v9607_v33  ;;  %v10061_v32 = vld [vmem:[%s13433_s0 + $0x78] sm:$0xff] }
 0x8a0   :  { %v9624_v0 = vadd.f32 %v10050_v58, %v9608_v38  ;;  %v9625_v60 = vadd.f32 %v10051_v24, %v9609_v1  ;;  %v9626_v53 = vadd.f32 %v10052_v49, %v9610_v61  ;;  %v9627_v10 = vadd.f32 %v10053_v5, %v9611_v25  ;;  %v9602_v12 = vpop.permute.xlu1 %9601 }
 0x8a1   :  { %v9636_v48 = vmax.f32 %v9620_v22, 0.0  ;;  %v9637_v57 = vmax.f32 %v9621_v2, 0.0  ;;  %v9638_v56 = vmax.f32 %v9622_v40, 0.0  ;;  %v9639_v23 = vmax.f32 %v9623_v63, 0.0 }
 0x8a2   :  { %v9640_v14 = vmax.f32 %v9624_v0, 0.0  ;;  %v9641_v18 = vmax.f32 %v9625_v60, 0.0  ;;  %v9642_v9 = vmax.f32 %v9626_v53, 0.0  ;;  %v9643_v35 = vmax.f32 %v9627_v10, 0.0 }
 0x8a3   :  { %9652 = vst [vmem:[%s13444_s11] sm:$0xff] %v9636_v48  ;;  %9653 = vst [vmem:[%s13444_s11 + $0x8] sm:$0xff] %v9637_v57  ;;  %v9586_v17 = vmul.f32 %v9576_v3, %v13243_v39  ;;  %v9587_v11 = vmul.f32 %v9576_v3, %v13251_v20  ;;  %v9588_v42 = vmul.f32 %v9576_v3, %v13247_v47 }
 0x8a4   :  { %9654 = vst [vmem:[%s13444_s11 + $0x10] sm:$0xff] %v9638_v56  ;;  %9655 = vst [vmem:[%s13444_s11 + $0x18] sm:$0xff] %v9639_v23  ;;  %v9589_v41 = vmul.f32 %v9576_v3, %v13257_v54  ;;  %v9590_v39 = vmul.f32 %v9576_v3, %v13282_v7  ;;  %v9591_v47 = vmul.f32 %v9576_v3, %v13292_v52  ;;  %v10055_v7 = vld [vmem:[%s13433_s0 + $0x48] sm:$0xff]  ;;  %v10056_v52 = vld [vmem:[%s13433_s0 + $0x50] sm:$0xff] }
 0x8a5   :  { %9656 = vst [vmem:[%s13444_s11 + $0x20] sm:$0xff] %v9640_v14  ;;  %9657 = vst [vmem:[%s13444_s11 + $0x28] sm:$0xff] %v9641_v18  ;;  %v9592_v20 = vmul.f32 %v9576_v3, %v13286_v43  ;;  %v9593_v54 = vmul.f32 %v9576_v3, %v13294_v55  ;;  %v9612_v19 = vadd.f32 %v9602_v12, %v9586_v17 }
 0x8a6   :  { %9658 = vst [vmem:[%s13444_s11 + $0x30] sm:$0xff] %v9642_v9  ;;  %9659 = vst [vmem:[%s13444_s11 + $0x38] sm:$0xff] %v9643_v35  ;;  %v9613_v29 = vadd.f32 %v9602_v12, %v9587_v11  ;;  %v9614_v4 = vadd.f32 %v9602_v12, %v9588_v42  ;;  %v9615_v21 = vadd.f32 %v9602_v12, %v9589_v41 }
 0x8a7   :  { %v9616_v16 = vadd.f32 %v9602_v12, %v9590_v39  ;;  %v9617_v31 = vadd.f32 %v9602_v12, %v9591_v47  ;;  %v9618_v46 = vadd.f32 %v9602_v12, %v9592_v20  ;;  %v9619_v50 = vadd.f32 %v9602_v12, %v9593_v54 }
 0x8a8   :  { %v9628_v44 = vadd.f32 %v10054_v30, %v9612_v19  ;;  %v9629_v43 = vadd.f32 %v10055_v7, %v9613_v29  ;;  %v9630_v55 = vadd.f32 %v10056_v52, %v9614_v4  ;;  %v9631_v34 = vadd.f32 %v10057_v13, %v9615_v21 }
 0x8a9   :  { %v9632_v6 = vadd.f32 %v10058_v36, %v9616_v16  ;;  %v9633_v8 = vadd.f32 %v10059_v28, %v9617_v31  ;;  %v9634_v27 = vadd.f32 %v10060_v51, %v9618_v46  ;;  %v9635_v15 = vadd.f32 %v10061_v32, %v9619_v50 }
 0x8aa   :  { %v9644_v26 = vmax.f32 %v9628_v44, 0.0  ;;  %v9645_v33 = vmax.f32 %v9629_v43, 0.0  ;;  %v9646_v38 = vmax.f32 %v9630_v55, 0.0  ;;  %v9647_v1 = vmax.f32 %v9631_v34, 0.0 }
 0x8ab   :  { %v9648_v61 = vmax.f32 %v9632_v6, 0.0  ;;  %v9649_v25 = vmax.f32 %v9633_v8, 0.0  ;;  %v9650_v45 = vmax.f32 %v9634_v27, 0.0  ;;  %v9651_v22 = vmax.f32 %v9635_v15, 0.0 }
 0x8ac   :  { %9660 = vst [vmem:[%s13444_s11 + $0x40] sm:$0xff] %v9644_v26  ;;  %9661 = vst [vmem:[%s13444_s11 + $0x48] sm:$0xff] %v9645_v33 }
 0x8ad   :  { %9662 = vst [vmem:[%s13444_s11 + $0x50] sm:$0xff] %v9646_v38  ;;  %9663 = vst [vmem:[%s13444_s11 + $0x58] sm:$0xff] %v9647_v1 }
 0x8ae   :  { %9664 = vst [vmem:[%s13444_s11 + $0x60] sm:$0xff] %v9648_v61  ;;  %9665 = vst [vmem:[%s13444_s11 + $0x68] sm:$0xff] %v9649_v25 }
 0x8af   :  { %9666 = vst [vmem:[%s13444_s11 + $0x70] sm:$0xff] %v9650_v45  ;;  %9667 = vst [vmem:[%s13444_s11 + $0x78] sm:$0xff] %v9651_v22 }

</bundles_post_ra>
